<compile_context>
chip_gen: v7x
topology: tpu7x:2x2x1
jax: 0.10.0
libtpu: 0.0.40
codegen_flags: <defaults>
</compile_context>

<pallas_src>
import functools

import jax
import jax.numpy as jnp
from jax.experimental import pallas as pl
from jax.experimental.pallas import tpu as pltpu

# ----------------------------- small hyper-params -----------------------------
B = 2            # batch
T = 8            # sequence length (tokens)
C_CHARS = 16     # chars per token   (ELMo: 50)
CHAR_VOCAB = 64  # char vocabulary   (ELMo: 262)
CHAR_EMB = 8     # char embedding    (ELMo: 16)  -> C*E = 128 (lane dense)
FILTERS = ((1, 8), (2, 8), (3, 16))   # (width, n_filters)  (ELMo: up to 7 / 2048)
CNN_DIM = sum(f for _, f in FILTERS)  # 32
N_HIGHWAY = 2
PROJ_DIM = 32    # ELMo: 512
LSTM_H = 32      # per-direction hidden -> fused gate row is 8H = 256 lanes
EMBED_SIZE = 2 * PROJ_DIM             # 64  (ELMo: 1024)
N_TOK = B * T

assert PROJ_DIM == LSTM_H, "scalar-mix layer0 duplication assumes proj_dim == lstm_h"
assert C_CHARS & (C_CHARS - 1) == 0, "log-tree max-pool assumes power-of-two positions"


def _vmem_spec():
    return pl.BlockSpec(memory_space=pltpu.MemorySpace.VMEM)


def _smem_spec():
    return pl.BlockSpec(memory_space=pltpu.MemorySpace.SMEM)


# -------------------------- in-kernel helper functions --------------------------
def _block_reverse(x, n_batch, seq_len):
    """Reverse the time order of a time-major (T*B, W) matrix (blocks of n_batch rows).
    Done once per LSTM layer, off the recurrent critical path."""
    return jnp.concatenate(
        [x[(seq_len - 1 - t) * n_batch:(seq_len - t) * n_batch, :]
         for t in range(seq_len)], axis=0)


def _bilstm_layer(x, wxf_ref, wxb_ref, wh_ref, b_ref, out_sref,
                  n_batch, seq_len, hidden):
    """Fused fw+bw LSTM layer over a time-major input x: (T*B, Din) f32.

    Gate-column layout (8H lanes): [i_f i_b | f_f f_b | o_f o_b | g_f g_b].
    wh_ref is block-diagonal (2H, 8H), so h=[h_f|h_b] only feeds its own direction.
    Writes the bidirectional output [fw|bw] (time-major) into out_sref (T*B, 2H).
    """
    two_h = 2 * hidden
    x_bf = x.astype(jnp.bfloat16)
    xr_bf = _block_reverse(x, n_batch, seq_len).astype(jnp.bfloat16)
    # Hoisted input projection for both directions / all gates, off the recurrence.
    # wxf has zeros in bw columns and wxb zeros in fw columns, so the add interleaves
    # fw gates for time s with bw gates for time T-1-s in row-block s.
    g_all = (jnp.dot(x_bf, wxf_ref[...], preferred_element_type=jnp.float32)
             + jnp.dot(xr_bf, wxb_ref[...], preferred_element_type=jnp.float32)
             + b_ref[...])                                            # (T*B, 8H)
    wh = wh_ref[...]                                                  # (2H, 8H) bf16

    h = jnp.zeros((n_batch, two_h), jnp.float32)                      # [h_f | h_b]
    c = jnp.zeros((n_batch, two_h), jnp.float32)                      # [c_f | c_b]
    for s in range(seq_len):                     # fully unrolled (static, short)
        tb = seq_len - 1 - s
        gates = (g_all[s * n_batch:(s + 1) * n_batch, :]
                 + jnp.dot(h.astype(jnp.bfloat16), wh,
                           preferred_element_type=jnp.float32))       # (B, 8H)
        sg = jax.nn.sigmoid(gates[:, :3 * two_h])   # i|f|o of both dirs: one EUP pass
        gg = jnp.tanh(gates[:, 3 * two_h:])         # g of both dirs
        i_g = sg[:, :two_h]
        f_g = sg[:, two_h:2 * two_h]
        o_g = sg[:, 2 * two_h:]
        c = f_g * c + i_g * gg
        h = o_g * jnp.tanh(c)
        # Stream outputs straight to VMEM scratch (fw half -> time s, bw half -> tb).
        out_sref[s * n_batch:(s + 1) * n_batch, :hidden] = h[:, :hidden]
        out_sref[tb * n_batch:(tb + 1) * n_batch, hidden:] = h[:, hidden:]


# ------------------------------- fused Pallas kernel ----------------------------
def elmo_fused_kernel(
    coef_ref,                                  # SMEM (4,): [s0, s1, s2, gamma]
    char_emb_ref,                              # (N, C*E) bf16, time-major rows
    conv_toep_ref,                             # (C*E, C_CHARS*CNN_DIM) bf16 Toeplitz conv
    conv_b_ref,                                # (1, CNN_DIM) f32
    hw1_w_ref, hw1_b_ref, hw2_w_ref, hw2_b_ref,
    proj_w_ref, proj_b_ref,
    l1_wxf_ref, l1_wxb_ref, l1_wh_ref, l1_b_ref,
    l2_wxf_ref, l2_wxb_ref, l2_wh_ref, l2_b_ref,
    out_ref,                                   # (N, 2*PROJ_DIM) f32, time-major rows
    out1_sref, out2_sref,                      # VMEM scratch (N, 2H) f32
    *, n_batch, seq_len, cnn_dim, hidden,
):
    # ---- char CNN: one Toeplitz matmul covers every width and position ------------
    y = jnp.dot(char_emb_ref[...], conv_toep_ref[...],
                preferred_element_type=jnp.float32)       # (N, n_pos_blocks*CNN_DIM)
    n_blk = y.shape[-1] // cnn_dim                        # power of two by construction
    while n_blk > 1:                                      # log-tree max-pool over positions
        half = n_blk // 2
        y = jnp.maximum(y[:, :half * cnn_dim], y[:, half * cnn_dim:])
        n_blk = half
    # Bias is position-constant and ReLU is monotone, so bias+activation AFTER the
    # position max-pool is equivalent to the reference order.  (Do NOT swap in a
    # non-monotone activation without moving it back before the pool.)
    x = jnp.maximum(y + conv_b_ref[...], 0.0)             # (N, CNN_DIM)

    # ---- 2x highway (AllenNLP convention: gate*x + (1-gate)*relu(nonlinear)) ------
    d = cnn_dim
    for hw_ref, hb_ref in ((hw1_w_ref, hw1_b_ref), (hw2_w_ref, hw2_b_ref)):
        pr = jnp.dot(x.astype(jnp.bfloat16), hw_ref[...],
                     preferred_element_type=jnp.float32) + hb_ref[...]    # (N, 2D)
        nonlin = jnp.maximum(pr[:, :d], 0.0)
        gate = jax.nn.sigmoid(pr[:, d:])
        x = gate * x + (1.0 - gate) * nonlin

    # ---- projection to PROJ_DIM -----------------------------------------------------
    tok = jnp.dot(x.astype(jnp.bfloat16), proj_w_ref[...],
                  preferred_element_type=jnp.float32) + proj_b_ref[...]   # (N, PROJ)

    # ---- biLSTM layer 1 / layer 2 (fused fw+bw, streamed to VMEM scratch) -----------
    _bilstm_layer(tok, l1_wxf_ref, l1_wxb_ref, l1_wh_ref, l1_b_ref, out1_sref,
                  n_batch, seq_len, hidden)
    out1 = out1_sref[...]                                                 # (N, 2H)
    _bilstm_layer(out1, l2_wxf_ref, l2_wxb_ref, l2_wh_ref, l2_b_ref, out2_sref,
                  n_batch, seq_len, hidden)
    out2_raw = out2_sref[...]                                             # (N, 2H)

    # ---- scalar mix -------------------------------------------------------------------
    # layer0 = [tok|tok]; layer2 = out2_raw + out1 (residual).  Fold the residual into
    # the coefficients and write the two 32-lane output halves separately so that
    # [tok,tok] is never materialized:
    #   mix = gamma * (s0*[tok|tok] + (s1+s2)*out1 + s2*out2_raw)
    s0 = coef_ref[0]
    s1 = coef_ref[1]
    s2 = coef_ref[2]
    gamma = coef_ref[3]
    base = (s1 + s2) * out1 + s2 * out2_raw                               # (N, 2H)
    t0 = s0 * tok                                                         # (N, H)
    out_ref[:, :hidden] = gamma * (base[:, :hidden] + t0)
    out_ref[:, hidden:] = gamma * (base[:, hidden:] + t0)


# ------------------------------- kernel wrapper ---------------------------------
def elmo_fused(coef, char_emb2, weights):
    n_tok = char_emb2.shape[0]
    kernel = functools.partial(
        elmo_fused_kernel, n_batch=B, seq_len=T, cnn_dim=CNN_DIM, hidden=LSTM_H)
    n_inputs = 2 + len(weights)
    # TODO(synk): at real ELMo sizes, add a leading 'parallel' grid axis over token tiles
    #             (uses both v7x TensorCores) and tile the hoisted gate matmuls over the
    #             8H dimension with an 'arbitrary' reduction axis + explicit
    #             vmem_limit_bytes (v7x has 64 MiB VMEM vs 128 MiB on v5e/v6e).  At the
    #             current toy size the per-step grid overhead would dominate.
    return pl.pallas_call(
        kernel,
        out_shape=jax.ShapeDtypeStruct((n_tok, EMBED_SIZE), jnp.float32),
        in_specs=[_smem_spec()] + [_vmem_spec()] * (n_inputs - 1),
        out_specs=_vmem_spec(),
        scratch_shapes=[pltpu.VMEM((n_tok, 2 * LSTM_H), jnp.float32),
                        pltpu.VMEM((n_tok, 2 * LSTM_H), jnp.float32)],
    )(coef, char_emb2, *weights)


# ------------------------------- parameter init ---------------------------------
def init_params(key):
    keys = iter(jax.random.split(key, 32))

    def nrm(shape, scale=0.1):
        return scale * jax.random.normal(next(keys), shape, jnp.float32)

    p = {}
    p["char_embed"] = nrm((CHAR_VOCAB, CHAR_EMB), 0.5)
    p["conv_w"] = [nrm((w * CHAR_EMB, f)) for w, f in FILTERS]
    p["conv_b"] = jnp.concatenate([nrm((1, f)) for _, f in FILTERS], axis=-1)  # (1,CNN_DIM)
    p["highway"] = [(nrm((CNN_DIM, 2 * CNN_DIM)), nrm((1, 2 * CNN_DIM)))
                    for _ in range(N_HIGHWAY)]
    p["proj"] = (nrm((CNN_DIM, PROJ_DIM)), nrm((1, PROJ_DIM)))

    def lstm_dir(din):     # original gate order along the 4H axis: [i, f, g, o]
        return (nrm((din, 4 * LSTM_H)), nrm((LSTM_H, 4 * LSTM_H)), nrm((1, 4 * LSTM_H)))

    p["lstm1_fw"] = lstm_dir(PROJ_DIM)
    p["lstm1_bw"] = lstm_dir(PROJ_DIM)
    p["lstm2_fw"] = lstm_dir(2 * LSTM_H)
    p["lstm2_bw"] = lstm_dir(2 * LSTM_H)
    p["mix_w"] = nrm((3,), 0.1)
    p["gamma"] = jnp.ones((1,), jnp.float32)
    return p


# --------------------------- host-side weight packing ----------------------------
def _split_gates(w):
    """Split a (rows, 4H) gate axis in the original [i, f, g, o] order into (i, f, o, g)."""
    h = LSTM_H
    return w[:, 0:h], w[:, h:2 * h], w[:, 3 * h:4 * h], w[:, 2 * h:3 * h]


def _interleave_dirs(fw_parts, bw_parts):
    """(i,f,o,g) per direction -> fused layout [i_f i_b | f_f f_b | o_f o_b | g_f g_b]."""
    cols = []
    for a, b in zip(fw_parts, bw_parts):
        cols.extend([a, b])
    return jnp.concatenate(cols, axis=1)


def _pack_bilstm(fw, bw):
    """Pack one bidirectional layer for the fused kernel.

    Returns:
      wxf: (Din, 8H) bf16 — forward input weights in fused gate columns, bw columns zero
      wxb: (Din, 8H) bf16 — backward input weights, fw columns zero (applied to the
           time-reversed input so adding the two interleaves fw(t) with bw(T-1-t))
      wh : (2H, 8H)  bf16 — block-diagonal recurrent weight for h = [h_f | h_b]
      b  : (1, 8H)   f32  — fused-layout gate bias (both directions)
    """
    wx_f, wh_f, b_f = fw
    wx_b, wh_b, b_b = bw
    h = LSTM_H
    zx = jnp.zeros((wx_f.shape[0], h), jnp.float32)
    zh = jnp.zeros((h, h), jnp.float32)
    wxf = _interleave_dirs(_split_gates(wx_f), (zx,) * 4)
    wxb = _interleave_dirs((zx,) * 4, _split_gates(wx_b))
    wh = jnp.concatenate(
        [_interleave_dirs(_split_gates(wh_f), (zh,) * 4),
         _interleave_dirs((zh,) * 4, _split_gates(wh_b))], axis=0)
    bias = _interleave_dirs(_split_gates(b_f), _split_gates(b_b))
    bf = lambda a: a.astype(jnp.bfloat16)
    return bf(wxf), bf(wxb), bf(wh), bias


def _pack_conv_toeplitz(conv_ws):
    """Shifted-filter (Toeplitz) conv weight: (C*E, C_CHARS*CNN_DIM).

    Column block p holds the [w1|w2|w3] filters shifted down by p*E rows, so
    char_emb @ W yields every conv position for every width in one MXU matmul.
    Positions past a width's valid range duplicate position 0 (a no-op under the
    max-pool), padding the block count to a power of two for the log-tree pool.
    """
    e, c = CHAR_EMB, C_CHARS
    cols = []
    for pos in range(c):
        blocks = []
        for (w, _), cw in zip(FILTERS, conv_ws):
            p_eff = pos if pos + w <= c else 0
            blk = jnp.zeros((c * e, cw.shape[1]), jnp.float32)
            blk = blk.at[p_eff * e:p_eff * e + w * e, :].set(cw)
            blocks.append(blk)
        cols.append(jnp.concatenate(blocks, axis=1))      # (C*E, CNN_DIM)
    return jnp.concatenate(cols, axis=1)                  # (128, 512) here


def pack_weights(p):
    """One-time host-side packing (bf16 matmul weights, f32 biases).  In a real model
    this happens once at load time, not per forward call."""
    bf = lambda a: a.astype(jnp.bfloat16)
    (hw1_w, hw1_b), (hw2_w, hw2_b) = p["highway"]
    proj_w, proj_b = p["proj"]
    conv_toep = bf(_pack_conv_toeplitz(p["conv_w"]))
    l1 = _pack_bilstm(p["lstm1_fw"], p["lstm1_bw"])
    l2 = _pack_bilstm(p["lstm2_fw"], p["lstm2_bw"])
    return (
        conv_toep, p["conv_b"],
        bf(hw1_w), hw1_b, bf(hw2_w), hw2_b,
        bf(proj_w), proj_b,
        *l1, *l2,
    )


def prepare_inputs(params):
    """Host-side, one-time: scalar-mix softmax + weight packing."""
    s = jax.nn.softmax(params["mix_w"])
    coef = jnp.concatenate([s, params["gamma"]]).astype(jnp.float32)       # (4,)
    return params["char_embed"], coef, pack_weights(params)


# ------------------------------- forward (glue) ----------------------------------
def elmo_forward(char_ids, char_embed, coef, weights):
    """char_ids: (B, T, C_CHARS) int32  ->  (B, T, EMBED_SIZE) float32."""
    bv, tv, cc = char_ids.shape
    n = bv * tv
    # Time-major row layout (row = t*B + b): per-step LSTM slices become contiguous.
    ids_tm = jnp.transpose(char_ids, (1, 0, 2)).reshape(n, cc)
    # TODO(synk): char-embedding gather stays in XLA (data-dependent table lookup).
    ce = jnp.take(char_embed, ids_tm, axis=0).reshape(n, cc * CHAR_EMB)
    mixed = elmo_fused(coef, ce.astype(jnp.bfloat16), weights)             # (T*B, EMBED)
    return jnp.transpose(mixed.reshape(tv, bv, EMBED_SIZE), (1, 0, 2))


# ---------------------------------- main -----------------------------------------
if __name__ == "__main__":
    key = jax.random.PRNGKey(0)
    k_in, k_par = jax.random.split(key)

    char_ids = jax.random.randint(k_in, (B, T, C_CHARS), 0, CHAR_VOCAB, dtype=jnp.int32)
    params = init_params(k_par)
    char_embed, coef, weights = prepare_inputs(params)     # one-time packing

    out = jax.jit(elmo_forward)(char_ids, char_embed, coef, weights)
    out = jax.block_until_ready(out)

    assert out.shape == (B, T, EMBED_SIZE), out.shape
    assert out.dtype == jnp.float32
    assert bool(jnp.all(jnp.isfinite(out)))
    print("KERNEL_OK")
</pallas_src>

<mosaic_0001>
module attributes {stable_mosaic.version = 11 : i64} {
  func.func @elmo_fused_kernel(%arg0: memref<4xf32, #tpu.memory_space<smem>>, %arg1: memref<16x128xbf16, #tpu.memory_space<vmem>>, %arg2: memref<128x512xbf16, #tpu.memory_space<vmem>>, %arg3: memref<1x32xf32, #tpu.memory_space<vmem>>, %arg4: memref<32x64xbf16, #tpu.memory_space<vmem>>, %arg5: memref<1x64xf32, #tpu.memory_space<vmem>>, %arg6: memref<32x64xbf16, #tpu.memory_space<vmem>>, %arg7: memref<1x64xf32, #tpu.memory_space<vmem>>, %arg8: memref<32x32xbf16, #tpu.memory_space<vmem>>, %arg9: memref<1x32xf32, #tpu.memory_space<vmem>>, %arg10: memref<32x256xbf16, #tpu.memory_space<vmem>>, %arg11: memref<32x256xbf16, #tpu.memory_space<vmem>>, %arg12: memref<64x256xbf16, #tpu.memory_space<vmem>>, %arg13: memref<1x256xf32, #tpu.memory_space<vmem>>, %arg14: memref<64x256xbf16, #tpu.memory_space<vmem>>, %arg15: memref<64x256xbf16, #tpu.memory_space<vmem>>, %arg16: memref<64x256xbf16, #tpu.memory_space<vmem>>, %arg17: memref<1x256xf32, #tpu.memory_space<vmem>>, %arg18: memref<16x64xf32, #tpu.memory_space<vmem>>, %arg19: memref<16x64xf32, #tpu.memory_space<vmem>>, %arg20: memref<16x64xf32, #tpu.memory_space<vmem>>) attributes {dimension_semantics = [], scalar_prefetch = 0 : i64, scratch_operands = 2 : i64, tpu.core_type = #tpu.core_type<tc>} {
    %c0 = arith.constant 0 : index
    %c0_0 = arith.constant 0 : index
    %0 = vector.load %arg1[%c0, %c0_0] : memref<16x128xbf16, #tpu.memory_space<vmem>>, vector<16x128xbf16>
    %c0_1 = arith.constant 0 : index
    %c0_2 = arith.constant 0 : index
    %1 = vector.load %arg2[%c0_1, %c0_2] : memref<128x512xbf16, #tpu.memory_space<vmem>>, vector<128x512xbf16>
    %cst = arith.constant dense<0.000000e+00> : vector<16x512xf32>
    %2 = tpu.matmul %0, %1, %cst {dimension_numbers = #tpu.dot_dimension_numbers<[1], [0], [0], [1], [0, 0, 1, 1], [], []>} : vector<16x128xbf16>, vector<128x512xbf16>, vector<16x512xf32> -> vector<16x512xf32>
    %3 = vector.extract_strided_slice %2 {offsets = [0, 0], sizes = [16, 256], strides = [1, 1]} : vector<16x512xf32> to vector<16x256xf32>
    %4 = vector.extract_strided_slice %2 {offsets = [0, 256], sizes = [16, 256], strides = [1, 1]} : vector<16x512xf32> to vector<16x256xf32>
    %5 = arith.maximumf %3, %4 : vector<16x256xf32>
    %6 = vector.extract_strided_slice %5 {offsets = [0, 0], sizes = [16, 128], strides = [1, 1]} : vector<16x256xf32> to vector<16x128xf32>
    %7 = vector.extract_strided_slice %5 {offsets = [0, 128], sizes = [16, 128], strides = [1, 1]} : vector<16x256xf32> to vector<16x128xf32>
    %8 = arith.maximumf %6, %7 : vector<16x128xf32>
    %9 = vector.extract_strided_slice %8 {offsets = [0, 0], sizes = [16, 64], strides = [1, 1]} : vector<16x128xf32> to vector<16x64xf32>
    %10 = vector.extract_strided_slice %8 {offsets = [0, 64], sizes = [16, 64], strides = [1, 1]} : vector<16x128xf32> to vector<16x64xf32>
    %11 = arith.maximumf %9, %10 : vector<16x64xf32>
    %12 = vector.extract_strided_slice %11 {offsets = [0, 0], sizes = [16, 32], strides = [1, 1]} : vector<16x64xf32> to vector<16x32xf32>
    %13 = vector.extract_strided_slice %11 {offsets = [0, 32], sizes = [16, 32], strides = [1, 1]} : vector<16x64xf32> to vector<16x32xf32>
    %14 = arith.maximumf %12, %13 : vector<16x32xf32>
    %c0_3 = arith.constant 0 : index
    %c0_4 = arith.constant 0 : index
    %15 = vector.load %arg3[%c0_3, %c0_4] : memref<1x32xf32, #tpu.memory_space<vmem>>, vector<1x32xf32>
    %16 = vector.broadcast %15 : vector<1x32xf32> to vector<16x32xf32>
    %17 = arith.addf %14, %16 : vector<16x32xf32>
    %cst_5 = arith.constant 0.000000e+00 : f32
    %18 = vector.broadcast %cst_5 : f32 to vector<16x32xf32>
    %19 = arith.maximumf %17, %18 : vector<16x32xf32>
    %20 = arith.truncf %19 : vector<16x32xf32> to vector<16x32xbf16>
    %c0_6 = arith.constant 0 : index
    %c0_7 = arith.constant 0 : index
    %21 = vector.load %arg4[%c0_6, %c0_7] : memref<32x64xbf16, #tpu.memory_space<vmem>>, vector<32x64xbf16>
    %cst_8 = arith.constant dense<0.000000e+00> : vector<16x64xf32>
    %22 = tpu.matmul %20, %21, %cst_8 {dimension_numbers = #tpu.dot_dimension_numbers<[1], [0], [0], [1], [0, 0, 1, 1], [], []>} : vector<16x32xbf16>, vector<32x64xbf16>, vector<16x64xf32> -> vector<16x64xf32>
    %c0_9 = arith.constant 0 : index
    %c0_10 = arith.constant 0 : index
    %23 = vector.load %arg5[%c0_9, %c0_10] : memref<1x64xf32, #tpu.memory_space<vmem>>, vector<1x64xf32>
    %24 = vector.broadcast %23 : vector<1x64xf32> to vector<16x64xf32>
    %25 = arith.addf %22, %24 : vector<16x64xf32>
    %26 = vector.extract_strided_slice %25 {offsets = [0, 0], sizes = [16, 32], strides = [1, 1]} : vector<16x64xf32> to vector<16x32xf32>
    %cst_11 = arith.constant 0.000000e+00 : f32
    %27 = vector.broadcast %cst_11 : f32 to vector<16x32xf32>
    %28 = arith.maximumf %26, %27 : vector<16x32xf32>
    %29 = vector.extract_strided_slice %25 {offsets = [0, 32], sizes = [16, 32], strides = [1, 1]} : vector<16x64xf32> to vector<16x32xf32>
    %30 = arith.negf %29 : vector<16x32xf32>
    %31 = math.exp %30 : vector<16x32xf32>
    %cst_12 = arith.constant 1.000000e+00 : f32
    %32 = vector.broadcast %cst_12 : f32 to vector<16x32xf32>
    %33 = arith.addf %32, %31 : vector<16x32xf32>
    %34 = arith.divf %32, %33 : vector<16x32xf32>
    %35 = arith.mulf %34, %19 : vector<16x32xf32>
    %cst_13 = arith.constant 1.000000e+00 : f32
    %36 = vector.broadcast %cst_13 : f32 to vector<16x32xf32>
    %37 = arith.subf %36, %34 : vector<16x32xf32>
    %38 = arith.mulf %37, %28 : vector<16x32xf32>
    %39 = arith.addf %35, %38 : vector<16x32xf32>
    %40 = arith.truncf %39 : vector<16x32xf32> to vector<16x32xbf16>
    %c0_14 = arith.constant 0 : index
    %c0_15 = arith.constant 0 : index
    %41 = vector.load %arg6[%c0_14, %c0_15] : memref<32x64xbf16, #tpu.memory_space<vmem>>, vector<32x64xbf16>
    %cst_16 = arith.constant dense<0.000000e+00> : vector<16x64xf32>
    %42 = tpu.matmul %40, %41, %cst_16 {dimension_numbers = #tpu.dot_dimension_numbers<[1], [0], [0], [1], [0, 0, 1, 1], [], []>} : vector<16x32xbf16>, vector<32x64xbf16>, vector<16x64xf32> -> vector<16x64xf32>
    %c0_17 = arith.constant 0 : index
    %c0_18 = arith.constant 0 : index
    %43 = vector.load %arg7[%c0_17, %c0_18] : memref<1x64xf32, #tpu.memory_space<vmem>>, vector<1x64xf32>
    %44 = vector.broadcast %43 : vector<1x64xf32> to vector<16x64xf32>
    %45 = arith.addf %42, %44 : vector<16x64xf32>
    %46 = vector.extract_strided_slice %45 {offsets = [0, 0], sizes = [16, 32], strides = [1, 1]} : vector<16x64xf32> to vector<16x32xf32>
    %cst_19 = arith.constant 0.000000e+00 : f32
    %47 = vector.broadcast %cst_19 : f32 to vector<16x32xf32>
    %48 = arith.maximumf %46, %47 : vector<16x32xf32>
    %49 = vector.extract_strided_slice %45 {offsets = [0, 32], sizes = [16, 32], strides = [1, 1]} : vector<16x64xf32> to vector<16x32xf32>
    %50 = arith.negf %49 : vector<16x32xf32>
    %51 = math.exp %50 : vector<16x32xf32>
    %cst_20 = arith.constant 1.000000e+00 : f32
    %52 = vector.broadcast %cst_20 : f32 to vector<16x32xf32>
    %53 = arith.addf %52, %51 : vector<16x32xf32>
    %54 = arith.divf %52, %53 : vector<16x32xf32>
    %55 = arith.mulf %54, %39 : vector<16x32xf32>
    %cst_21 = arith.constant 1.000000e+00 : f32
    %56 = vector.broadcast %cst_21 : f32 to vector<16x32xf32>
    %57 = arith.subf %56, %54 : vector<16x32xf32>
    %58 = arith.mulf %57, %48 : vector<16x32xf32>
    %59 = arith.addf %55, %58 : vector<16x32xf32>
    %60 = arith.truncf %59 : vector<16x32xf32> to vector<16x32xbf16>
    %c0_22 = arith.constant 0 : index
    %c0_23 = arith.constant 0 : index
    %61 = vector.load %arg8[%c0_22, %c0_23] : memref<32x32xbf16, #tpu.memory_space<vmem>>, vector<32x32xbf16>
    %cst_24 = arith.constant dense<0.000000e+00> : vector<16x32xf32>
    %62 = tpu.matmul %60, %61, %cst_24 {dimension_numbers = #tpu.dot_dimension_numbers<[1], [0], [0], [1], [0, 0, 1, 1], [], []>} : vector<16x32xbf16>, vector<32x32xbf16>, vector<16x32xf32> -> vector<16x32xf32>
    %c0_25 = arith.constant 0 : index
    %c0_26 = arith.constant 0 : index
    %63 = vector.load %arg9[%c0_25, %c0_26] : memref<1x32xf32, #tpu.memory_space<vmem>>, vector<1x32xf32>
    %64 = vector.broadcast %63 : vector<1x32xf32> to vector<16x32xf32>
    %65 = arith.addf %62, %64 : vector<16x32xf32>
    %66 = arith.truncf %65 : vector<16x32xf32> to vector<16x32xbf16>
    %67 = vector.extract_strided_slice %65 {offsets = [14, 0], sizes = [2, 32], strides = [1, 1]} : vector<16x32xf32> to vector<2x32xf32>
    %68 = vector.extract_strided_slice %65 {offsets = [12, 0], sizes = [2, 32], strides = [1, 1]} : vector<16x32xf32> to vector<2x32xf32>
    %69 = vector.extract_strided_slice %65 {offsets = [10, 0], sizes = [2, 32], strides = [1, 1]} : vector<16x32xf32> to vector<2x32xf32>
    %70 = vector.extract_strided_slice %65 {offsets = [8, 0], sizes = [2, 32], strides = [1, 1]} : vector<16x32xf32> to vector<2x32xf32>
    %71 = vector.extract_strided_slice %65 {offsets = [6, 0], sizes = [2, 32], strides = [1, 1]} : vector<16x32xf32> to vector<2x32xf32>
    %72 = vector.extract_strided_slice %65 {offsets = [4, 0], sizes = [2, 32], strides = [1, 1]} : vector<16x32xf32> to vector<2x32xf32>
    %73 = vector.extract_strided_slice %65 {offsets = [2, 0], sizes = [2, 32], strides = [1, 1]} : vector<16x32xf32> to vector<2x32xf32>
    %74 = vector.extract_strided_slice %65 {offsets = [0, 0], sizes = [2, 32], strides = [1, 1]} : vector<16x32xf32> to vector<2x32xf32>
    %75 = tpu.concatenate %67, %68, %69, %70, %71, %72, %73, %74 in 0 : vector<2x32xf32>, vector<2x32xf32>, vector<2x32xf32>, vector<2x32xf32>, vector<2x32xf32>, vector<2x32xf32>, vector<2x32xf32>, vector<2x32xf32> -> vector<16x32xf32>
    %76 = arith.truncf %75 : vector<16x32xf32> to vector<16x32xbf16>
    %c0_27 = arith.constant 0 : index
    %c0_28 = arith.constant 0 : index
    %77 = vector.load %arg10[%c0_27, %c0_28] : memref<32x256xbf16, #tpu.memory_space<vmem>>, vector<32x256xbf16>
    %cst_29 = arith.constant dense<0.000000e+00> : vector<16x256xf32>
    %78 = tpu.matmul %66, %77, %cst_29 {dimension_numbers = #tpu.dot_dimension_numbers<[1], [0], [0], [1], [0, 0, 1, 1], [], []>} : vector<16x32xbf16>, vector<32x256xbf16>, vector<16x256xf32> -> vector<16x256xf32>
    %c0_30 = arith.constant 0 : index
    %c0_31 = arith.constant 0 : index
    %79 = vector.load %arg11[%c0_30, %c0_31] : memref<32x256xbf16, #tpu.memory_space<vmem>>, vector<32x256xbf16>
    %cst_32 = arith.constant dense<0.000000e+00> : vector<16x256xf32>
    %80 = tpu.matmul %76, %79, %cst_32 {dimension_numbers = #tpu.dot_dimension_numbers<[1], [0], [0], [1], [0, 0, 1, 1], [], []>} : vector<16x32xbf16>, vector<32x256xbf16>, vector<16x256xf32> -> vector<16x256xf32>
    %81 = arith.addf %78, %80 : vector<16x256xf32>
    %c0_33 = arith.constant 0 : index
    %c0_34 = arith.constant 0 : index
    %82 = vector.load %arg13[%c0_33, %c0_34] : memref<1x256xf32, #tpu.memory_space<vmem>>, vector<1x256xf32>
    %83 = vector.broadcast %82 : vector<1x256xf32> to vector<16x256xf32>
    %84 = arith.addf %81, %83 : vector<16x256xf32>
    %c0_35 = arith.constant 0 : index
    %c0_36 = arith.constant 0 : index
    %85 = vector.load %arg12[%c0_35, %c0_36] : memref<64x256xbf16, #tpu.memory_space<vmem>>, vector<64x256xbf16>
    %cst_37 = arith.constant 0.000000e+00 : f32
    %86 = vector.broadcast %cst_37 : f32 to vector<2x64xf32>
    %cst_38 = arith.constant 0.000000e+00 : f32
    %87 = vector.broadcast %cst_38 : f32 to vector<2x64xf32>
    %88 = vector.extract_strided_slice %84 {offsets = [0, 0], sizes = [2, 256], strides = [1, 1]} : vector<16x256xf32> to vector<2x256xf32>
    %89 = arith.truncf %86 : vector<2x64xf32> to vector<2x64xbf16>
    %cst_39 = arith.constant dense<0.000000e+00> : vector<2x256xf32>
    %90 = tpu.matmul %89, %85, %cst_39 {dimension_numbers = #tpu.dot_dimension_numbers<[1], [0], [0], [1], [0, 0, 1, 1], [], []>} : vector<2x64xbf16>, vector<64x256xbf16>, vector<2x256xf32> -> vector<2x256xf32>
    %91 = arith.addf %88, %90 : vector<2x256xf32>
    %92 = vector.extract_strided_slice %91 {offsets = [0, 0], sizes = [2, 192], strides = [1, 1]} : vector<2x256xf32> to vector<2x192xf32>
    %93 = arith.negf %92 : vector<2x192xf32>
    %94 = math.exp %93 : vector<2x192xf32>
    %cst_40 = arith.constant 1.000000e+00 : f32
    %95 = vector.broadcast %cst_40 : f32 to vector<2x192xf32>
    %96 = arith.addf %95, %94 : vector<2x192xf32>
    %97 = arith.divf %95, %96 : vector<2x192xf32>
    %98 = vector.extract_strided_slice %91 {offsets = [0, 192], sizes = [2, 64], strides = [1, 1]} : vector<2x256xf32> to vector<2x64xf32>
    %99 = math.tanh %98 : vector<2x64xf32>
    %100 = vector.extract_strided_slice %97 {offsets = [0, 0], sizes = [2, 64], strides = [1, 1]} : vector<2x192xf32> to vector<2x64xf32>
    %101 = vector.extract_strided_slice %97 {offsets = [0, 64], sizes = [2, 64], strides = [1, 1]} : vector<2x192xf32> to vector<2x64xf32>
    %102 = vector.extract_strided_slice %97 {offsets = [0, 128], sizes = [2, 64], strides = [1, 1]} : vector<2x192xf32> to vector<2x64xf32>
    %103 = arith.mulf %101, %87 : vector<2x64xf32>
    %104 = arith.mulf %100, %99 : vector<2x64xf32>
    %105 = arith.addf %103, %104 : vector<2x64xf32>
    %106 = math.tanh %105 : vector<2x64xf32>
    %107 = arith.mulf %102, %106 : vector<2x64xf32>
    %108 = vector.extract_strided_slice %107 {offsets = [0, 0], sizes = [2, 32], strides = [1, 1]} : vector<2x64xf32> to vector<2x32xf32>
    %c0_41 = arith.constant 0 : index
    %c0_42 = arith.constant 0 : index
    %109 = vector.load %arg19[%c0_41, %c0_42] : memref<16x64xf32, #tpu.memory_space<vmem>>, vector<2x32xf32>
    tpu.vector_store %arg19[%c0_41, %c0_42], %108 {strides = array<i32>} : memref<16x64xf32, #tpu.memory_space<vmem>>, vector<2x32xf32>,
    %110 = vector.extract_strided_slice %107 {offsets = [0, 32], sizes = [2, 32], strides = [1, 1]} : vector<2x64xf32> to vector<2x32xf32>
    %c14 = arith.constant 14 : index
    %c32 = arith.constant 32 : index
    %111 = vector.load %arg19[%c14, %c32] : memref<16x64xf32, #tpu.memory_space<vmem>>, vector<2x32xf32>
    tpu.vector_store %arg19[%c14, %c32], %110 {strides = array<i32>} : memref<16x64xf32, #tpu.memory_space<vmem>>, vector<2x32xf32>,
    %112 = vector.extract_strided_slice %84 {offsets = [2, 0], sizes = [2, 256], strides = [1, 1]} : vector<16x256xf32> to vector<2x256xf32>
    %113 = arith.truncf %107 : vector<2x64xf32> to vector<2x64xbf16>
    %cst_43 = arith.constant dense<0.000000e+00> : vector<2x256xf32>
    %114 = tpu.matmul %113, %85, %cst_43 {dimension_numbers = #tpu.dot_dimension_numbers<[1], [0], [0], [1], [0, 0, 1, 1], [], []>} : vector<2x64xbf16>, vector<64x256xbf16>, vector<2x256xf32> -> vector<2x256xf32>
    %115 = arith.addf %112, %114 : vector<2x256xf32>
    %116 = vector.extract_strided_slice %115 {offsets = [0, 0], sizes = [2, 192], strides = [1, 1]} : vector<2x256xf32> to vector<2x192xf32>
    %117 = arith.negf %116 : vector<2x192xf32>
    %118 = math.exp %117 : vector<2x192xf32>
    %cst_44 = arith.constant 1.000000e+00 : f32
    %119 = vector.broadcast %cst_44 : f32 to vector<2x192xf32>
    %120 = arith.addf %119, %118 : vector<2x192xf32>
    %121 = arith.divf %119, %120 : vector<2x192xf32>
    %122 = vector.extract_strided_slice %115 {offsets = [0, 192], sizes = [2, 64], strides = [1, 1]} : vector<2x256xf32> to vector<2x64xf32>
    %123 = math.tanh %122 : vector<2x64xf32>
    %124 = vector.extract_strided_slice %121 {offsets = [0, 0], sizes = [2, 64], strides = [1, 1]} : vector<2x192xf32> to vector<2x64xf32>
    %125 = vector.extract_strided_slice %121 {offsets = [0, 64], sizes = [2, 64], strides = [1, 1]} : vector<2x192xf32> to vector<2x64xf32>
    %126 = vector.extract_strided_slice %121 {offsets = [0, 128], sizes = [2, 64], strides = [1, 1]} : vector<2x192xf32> to vector<2x64xf32>
    %127 = arith.mulf %125, %105 : vector<2x64xf32>
    %128 = arith.mulf %124, %123 : vector<2x64xf32>
    %129 = arith.addf %127, %128 : vector<2x64xf32>
    %130 = math.tanh %129 : vector<2x64xf32>
    %131 = arith.mulf %126, %130 : vector<2x64xf32>
    %132 = vector.extract_strided_slice %131 {offsets = [0, 0], sizes = [2, 32], strides = [1, 1]} : vector<2x64xf32> to vector<2x32xf32>
    %c2 = arith.constant 2 : index
    %c0_45 = arith.constant 0 : index
    %133 = vector.load %arg19[%c2, %c0_45] : memref<16x64xf32, #tpu.memory_space<vmem>>, vector<2x32xf32>
    tpu.vector_store %arg19[%c2, %c0_45], %132 {strides = array<i32>} : memref<16x64xf32, #tpu.memory_space<vmem>>, vector<2x32xf32>,
    %134 = vector.extract_strided_slice %131 {offsets = [0, 32], sizes = [2, 32], strides = [1, 1]} : vector<2x64xf32> to vector<2x32xf32>
    %c12 = arith.constant 12 : index
    %c32_46 = arith.constant 32 : index
    %135 = vector.load %arg19[%c12, %c32_46] : memref<16x64xf32, #tpu.memory_space<vmem>>, vector<2x32xf32>
    tpu.vector_store %arg19[%c12, %c32_46], %134 {strides = array<i32>} : memref<16x64xf32, #tpu.memory_space<vmem>>, vector<2x32xf32>,
    %136 = vector.extract_strided_slice %84 {offsets = [4, 0], sizes = [2, 256], strides = [1, 1]} : vector<16x256xf32> to vector<2x256xf32>
    %137 = arith.truncf %131 : vector<2x64xf32> to vector<2x64xbf16>
    %cst_47 = arith.constant dense<0.000000e+00> : vector<2x256xf32>
    %138 = tpu.matmul %137, %85, %cst_47 {dimension_numbers = #tpu.dot_dimension_numbers<[1], [0], [0], [1], [0, 0, 1, 1], [], []>} : vector<2x64xbf16>, vector<64x256xbf16>, vector<2x256xf32> -> vector<2x256xf32>
    %139 = arith.addf %136, %138 : vector<2x256xf32>
    %140 = vector.extract_strided_slice %139 {offsets = [0, 0], sizes = [2, 192], strides = [1, 1]} : vector<2x256xf32> to vector<2x192xf32>
    %141 = arith.negf %140 : vector<2x192xf32>
    %142 = math.exp %141 : vector<2x192xf32>
    %cst_48 = arith.constant 1.000000e+00 : f32
    %143 = vector.broadcast %cst_48 : f32 to vector<2x192xf32>
    %144 = arith.addf %143, %142 : vector<2x192xf32>
    %145 = arith.divf %143, %144 : vector<2x192xf32>
    %146 = vector.extract_strided_slice %139 {offsets = [0, 192], sizes = [2, 64], strides = [1, 1]} : vector<2x256xf32> to vector<2x64xf32>
    %147 = math.tanh %146 : vector<2x64xf32>
    %148 = vector.extract_strided_slice %145 {offsets = [0, 0], sizes = [2, 64], strides = [1, 1]} : vector<2x192xf32> to vector<2x64xf32>
    %149 = vector.extract_strided_slice %145 {offsets = [0, 64], sizes = [2, 64], strides = [1, 1]} : vector<2x192xf32> to vector<2x64xf32>
    %150 = vector.extract_strided_slice %145 {offsets = [0, 128], sizes = [2, 64], strides = [1, 1]} : vector<2x192xf32> to vector<2x64xf32>
    %151 = arith.mulf %149, %129 : vector<2x64xf32>
    %152 = arith.mulf %148, %147 : vector<2x64xf32>
    %153 = arith.addf %151, %152 : vector<2x64xf32>
    %154 = math.tanh %153 : vector<2x64xf32>
    %155 = arith.mulf %150, %154 : vector<2x64xf32>
    %156 = vector.extract_strided_slice %155 {offsets = [0, 0], sizes = [2, 32], strides = [1, 1]} : vector<2x64xf32> to vector<2x32xf32>
    %c4 = arith.constant 4 : index
    %c0_49 = arith.constant 0 : index
    %157 = vector.load %arg19[%c4, %c0_49] : memref<16x64xf32, #tpu.memory_space<vmem>>, vector<2x32xf32>
    tpu.vector_store %arg19[%c4, %c0_49], %156 {strides = array<i32>} : memref<16x64xf32, #tpu.memory_space<vmem>>, vector<2x32xf32>,
    %158 = vector.extract_strided_slice %155 {offsets = [0, 32], sizes = [2, 32], strides = [1, 1]} : vector<2x64xf32> to vector<2x32xf32>
    %c10 = arith.constant 10 : index
    %c32_50 = arith.constant 32 : index
    %159 = vector.load %arg19[%c10, %c32_50] : memref<16x64xf32, #tpu.memory_space<vmem>>, vector<2x32xf32>
    tpu.vector_store %arg19[%c10, %c32_50], %158 {strides = array<i32>} : memref<16x64xf32, #tpu.memory_space<vmem>>, vector<2x32xf32>,
    %160 = vector.extract_strided_slice %84 {offsets = [6, 0], sizes = [2, 256], strides = [1, 1]} : vector<16x256xf32> to vector<2x256xf32>
    %161 = arith.truncf %155 : vector<2x64xf32> to vector<2x64xbf16>
    %cst_51 = arith.constant dense<0.000000e+00> : vector<2x256xf32>
    %162 = tpu.matmul %161, %85, %cst_51 {dimension_numbers = #tpu.dot_dimension_numbers<[1], [0], [0], [1], [0, 0, 1, 1], [], []>} : vector<2x64xbf16>, vector<64x256xbf16>, vector<2x256xf32> -> vector<2x256xf32>
    %163 = arith.addf %160, %162 : vector<2x256xf32>
    %164 = vector.extract_strided_slice %163 {offsets = [0, 0], sizes = [2, 192], strides = [1, 1]} : vector<2x256xf32> to vector<2x192xf32>
    %165 = arith.negf %164 : vector<2x192xf32>
    %166 = math.exp %165 : vector<2x192xf32>
    %cst_52 = arith.constant 1.000000e+00 : f32
    %167 = vector.broadcast %cst_52 : f32 to vector<2x192xf32>
    %168 = arith.addf %167, %166 : vector<2x192xf32>
    %169 = arith.divf %167, %168 : vector<2x192xf32>
    %170 = vector.extract_strided_slice %163 {offsets = [0, 192], sizes = [2, 64], strides = [1, 1]} : vector<2x256xf32> to vector<2x64xf32>
    %171 = math.tanh %170 : vector<2x64xf32>
    %172 = vector.extract_strided_slice %169 {offsets = [0, 0], sizes = [2, 64], strides = [1, 1]} : vector<2x192xf32> to vector<2x64xf32>
    %173 = vector.extract_strided_slice %169 {offsets = [0, 64], sizes = [2, 64], strides = [1, 1]} : vector<2x192xf32> to vector<2x64xf32>
    %174 = vector.extract_strided_slice %169 {offsets = [0, 128], sizes = [2, 64], strides = [1, 1]} : vector<2x192xf32> to vector<2x64xf32>
    %175 = arith.mulf %173, %153 : vector<2x64xf32>
    %176 = arith.mulf %172, %171 : vector<2x64xf32>
    %177 = arith.addf %175, %176 : vector<2x64xf32>
    %178 = math.tanh %177 : vector<2x64xf32>
    %179 = arith.mulf %174, %178 : vector<2x64xf32>
    %180 = vector.extract_strided_slice %179 {offsets = [0, 0], sizes = [2, 32], strides = [1, 1]} : vector<2x64xf32> to vector<2x32xf32>
    %c6 = arith.constant 6 : index
    %c0_53 = arith.constant 0 : index
    %181 = vector.load %arg19[%c6, %c0_53] : memref<16x64xf32, #tpu.memory_space<vmem>>, vector<2x32xf32>
    tpu.vector_store %arg19[%c6, %c0_53], %180 {strides = array<i32>} : memref<16x64xf32, #tpu.memory_space<vmem>>, vector<2x32xf32>,
    %182 = vector.extract_strided_slice %179 {offsets = [0, 32], sizes = [2, 32], strides = [1, 1]} : vector<2x64xf32> to vector<2x32xf32>
    %c8 = arith.constant 8 : index
    %c32_54 = arith.constant 32 : index
    %183 = vector.load %arg19[%c8, %c32_54] : memref<16x64xf32, #tpu.memory_space<vmem>>, vector<2x32xf32>
    tpu.vector_store %arg19[%c8, %c32_54], %182 {strides = array<i32>} : memref<16x64xf32, #tpu.memory_space<vmem>>, vector<2x32xf32>,
    %184 = vector.extract_strided_slice %84 {offsets = [8, 0], sizes = [2, 256], strides = [1, 1]} : vector<16x256xf32> to vector<2x256xf32>
    %185 = arith.truncf %179 : vector<2x64xf32> to vector<2x64xbf16>
    %cst_55 = arith.constant dense<0.000000e+00> : vector<2x256xf32>
    %186 = tpu.matmul %185, %85, %cst_55 {dimension_numbers = #tpu.dot_dimension_numbers<[1], [0], [0], [1], [0, 0, 1, 1], [], []>} : vector<2x64xbf16>, vector<64x256xbf16>, vector<2x256xf32> -> vector<2x256xf32>
    %187 = arith.addf %184, %186 : vector<2x256xf32>
    %188 = vector.extract_strided_slice %187 {offsets = [0, 0], sizes = [2, 192], strides = [1, 1]} : vector<2x256xf32> to vector<2x192xf32>
    %189 = arith.negf %188 : vector<2x192xf32>
    %190 = math.exp %189 : vector<2x192xf32>
    %cst_56 = arith.constant 1.000000e+00 : f32
    %191 = vector.broadcast %cst_56 : f32 to vector<2x192xf32>
    %192 = arith.addf %191, %190 : vector<2x192xf32>
    %193 = arith.divf %191, %192 : vector<2x192xf32>
    %194 = vector.extract_strided_slice %187 {offsets = [0, 192], sizes = [2, 64], strides = [1, 1]} : vector<2x256xf32> to vector<2x64xf32>
    %195 = math.tanh %194 : vector<2x64xf32>
    %196 = vector.extract_strided_slice %193 {offsets = [0, 0], sizes = [2, 64], strides = [1, 1]} : vector<2x192xf32> to vector<2x64xf32>
    %197 = vector.extract_strided_slice %193 {offsets = [0, 64], sizes = [2, 64], strides = [1, 1]} : vector<2x192xf32> to vector<2x64xf32>
    %198 = vector.extract_strided_slice %193 {offsets = [0, 128], sizes = [2, 64], strides = [1, 1]} : vector<2x192xf32> to vector<2x64xf32>
    %199 = arith.mulf %197, %177 : vector<2x64xf32>
    %200 = arith.mulf %196, %195 : vector<2x64xf32>
    %201 = arith.addf %199, %200 : vector<2x64xf32>
    %202 = math.tanh %201 : vector<2x64xf32>
    %203 = arith.mulf %198, %202 : vector<2x64xf32>
    %204 = vector.extract_strided_slice %203 {offsets = [0, 0], sizes = [2, 32], strides = [1, 1]} : vector<2x64xf32> to vector<2x32xf32>
    %c8_57 = arith.constant 8 : index
    %c0_58 = arith.constant 0 : index
    %205 = vector.load %arg19[%c8_57, %c0_58] : memref<16x64xf32, #tpu.memory_space<vmem>>, vector<2x32xf32>
    tpu.vector_store %arg19[%c8_57, %c0_58], %204 {strides = array<i32>} : memref<16x64xf32, #tpu.memory_space<vmem>>, vector<2x32xf32>,
    %206 = vector.extract_strided_slice %203 {offsets = [0, 32], sizes = [2, 32], strides = [1, 1]} : vector<2x64xf32> to vector<2x32xf32>
    %c6_59 = arith.constant 6 : index
    %c32_60 = arith.constant 32 : index
    %207 = vector.load %arg19[%c6_59, %c32_60] : memref<16x64xf32, #tpu.memory_space<vmem>>, vector<2x32xf32>
    tpu.vector_store %arg19[%c6_59, %c32_60], %206 {strides = array<i32>} : memref<16x64xf32, #tpu.memory_space<vmem>>, vector<2x32xf32>,
    %208 = vector.extract_strided_slice %84 {offsets = [10, 0], sizes = [2, 256], strides = [1, 1]} : vector<16x256xf32> to vector<2x256xf32>
    %209 = arith.truncf %203 : vector<2x64xf32> to vector<2x64xbf16>
    %cst_61 = arith.constant dense<0.000000e+00> : vector<2x256xf32>
    %210 = tpu.matmul %209, %85, %cst_61 {dimension_numbers = #tpu.dot_dimension_numbers<[1], [0], [0], [1], [0, 0, 1, 1], [], []>} : vector<2x64xbf16>, vector<64x256xbf16>, vector<2x256xf32> -> vector<2x256xf32>
    %211 = arith.addf %208, %210 : vector<2x256xf32>
    %212 = vector.extract_strided_slice %211 {offsets = [0, 0], sizes = [2, 192], strides = [1, 1]} : vector<2x256xf32> to vector<2x192xf32>
    %213 = arith.negf %212 : vector<2x192xf32>
    %214 = math.exp %213 : vector<2x192xf32>
    %cst_62 = arith.constant 1.000000e+00 : f32
    %215 = vector.broadcast %cst_62 : f32 to vector<2x192xf32>
    %216 = arith.addf %215, %214 : vector<2x192xf32>
    %217 = arith.divf %215, %216 : vector<2x192xf32>
    %218 = vector.extract_strided_slice %211 {offsets = [0, 192], sizes = [2, 64], strides = [1, 1]} : vector<2x256xf32> to vector<2x64xf32>
    %219 = math.tanh %218 : vector<2x64xf32>
    %220 = vector.extract_strided_slice %217 {offsets = [0, 0], sizes = [2, 64], strides = [1, 1]} : vector<2x192xf32> to vector<2x64xf32>
    %221 = vector.extract_strided_slice %217 {offsets = [0, 64], sizes = [2, 64], strides = [1, 1]} : vector<2x192xf32> to vector<2x64xf32>
    %222 = vector.extract_strided_slice %217 {offsets = [0, 128], sizes = [2, 64], strides = [1, 1]} : vector<2x192xf32> to vector<2x64xf32>
    %223 = arith.mulf %221, %201 : vector<2x64xf32>
    %224 = arith.mulf %220, %219 : vector<2x64xf32>
    %225 = arith.addf %223, %224 : vector<2x64xf32>
    %226 = math.tanh %225 : vector<2x64xf32>
    %227 = arith.mulf %222, %226 : vector<2x64xf32>
    %228 = vector.extract_strided_slice %227 {offsets = [0, 0], sizes = [2, 32], strides = [1, 1]} : vector<2x64xf32> to vector<2x32xf32>
    %c10_63 = arith.constant 10 : index
    %c0_64 = arith.constant 0 : index
    %229 = vector.load %arg19[%c10_63, %c0_64] : memref<16x64xf32, #tpu.memory_space<vmem>>, vector<2x32xf32>
    tpu.vector_store %arg19[%c10_63, %c0_64], %228 {strides = array<i32>} : memref<16x64xf32, #tpu.memory_space<vmem>>, vector<2x32xf32>,
    %230 = vector.extract_strided_slice %227 {offsets = [0, 32], sizes = [2, 32], strides = [1, 1]} : vector<2x64xf32> to vector<2x32xf32>
    %c4_65 = arith.constant 4 : index
    %c32_66 = arith.constant 32 : index
    %231 = vector.load %arg19[%c4_65, %c32_66] : memref<16x64xf32, #tpu.memory_space<vmem>>, vector<2x32xf32>
    tpu.vector_store %arg19[%c4_65, %c32_66], %230 {strides = array<i32>} : memref<16x64xf32, #tpu.memory_space<vmem>>, vector<2x32xf32>,
    %232 = vector.extract_strided_slice %84 {offsets = [12, 0], sizes = [2, 256], strides = [1, 1]} : vector<16x256xf32> to vector<2x256xf32>
    %233 = arith.truncf %227 : vector<2x64xf32> to vector<2x64xbf16>
    %cst_67 = arith.constant dense<0.000000e+00> : vector<2x256xf32>
    %234 = tpu.matmul %233, %85, %cst_67 {dimension_numbers = #tpu.dot_dimension_numbers<[1], [0], [0], [1], [0, 0, 1, 1], [], []>} : vector<2x64xbf16>, vector<64x256xbf16>, vector<2x256xf32> -> vector<2x256xf32>
    %235 = arith.addf %232, %234 : vector<2x256xf32>
    %236 = vector.extract_strided_slice %235 {offsets = [0, 0], sizes = [2, 192], strides = [1, 1]} : vector<2x256xf32> to vector<2x192xf32>
    %237 = arith.negf %236 : vector<2x192xf32>
    %238 = math.exp %237 : vector<2x192xf32>
    %cst_68 = arith.constant 1.000000e+00 : f32
    %239 = vector.broadcast %cst_68 : f32 to vector<2x192xf32>
    %240 = arith.addf %239, %238 : vector<2x192xf32>
    %241 = arith.divf %239, %240 : vector<2x192xf32>
    %242 = vector.extract_strided_slice %235 {offsets = [0, 192], sizes = [2, 64], strides = [1, 1]} : vector<2x256xf32> to vector<2x64xf32>
    %243 = math.tanh %242 : vector<2x64xf32>
    %244 = vector.extract_strided_slice %241 {offsets = [0, 0], sizes = [2, 64], strides = [1, 1]} : vector<2x192xf32> to vector<2x64xf32>
    %245 = vector.extract_strided_slice %241 {offsets = [0, 64], sizes = [2, 64], strides = [1, 1]} : vector<2x192xf32> to vector<2x64xf32>
    %246 = vector.extract_strided_slice %241 {offsets = [0, 128], sizes = [2, 64], strides = [1, 1]} : vector<2x192xf32> to vector<2x64xf32>
    %247 = arith.mulf %245, %225 : vector<2x64xf32>
    %248 = arith.mulf %244, %243 : vector<2x64xf32>
    %249 = arith.addf %247, %248 : vector<2x64xf32>
    %250 = math.tanh %249 : vector<2x64xf32>
    %251 = arith.mulf %246, %250 : vector<2x64xf32>
    %252 = vector.extract_strided_slice %251 {offsets = [0, 0], sizes = [2, 32], strides = [1, 1]} : vector<2x64xf32> to vector<2x32xf32>
    %c12_69 = arith.constant 12 : index
    %c0_70 = arith.constant 0 : index
    %253 = vector.load %arg19[%c12_69, %c0_70] : memref<16x64xf32, #tpu.memory_space<vmem>>, vector<2x32xf32>
    tpu.vector_store %arg19[%c12_69, %c0_70], %252 {strides = array<i32>} : memref<16x64xf32, #tpu.memory_space<vmem>>, vector<2x32xf32>,
    %254 = vector.extract_strided_slice %251 {offsets = [0, 32], sizes = [2, 32], strides = [1, 1]} : vector<2x64xf32> to vector<2x32xf32>
    %c2_71 = arith.constant 2 : index
    %c32_72 = arith.constant 32 : index
    %255 = vector.load %arg19[%c2_71, %c32_72] : memref<16x64xf32, #tpu.memory_space<vmem>>, vector<2x32xf32>
    tpu.vector_store %arg19[%c2_71, %c32_72], %254 {strides = array<i32>} : memref<16x64xf32, #tpu.memory_space<vmem>>, vector<2x32xf32>,
    %256 = vector.extract_strided_slice %84 {offsets = [14, 0], sizes = [2, 256], strides = [1, 1]} : vector<16x256xf32> to vector<2x256xf32>
    %257 = arith.truncf %251 : vector<2x64xf32> to vector<2x64xbf16>
    %cst_73 = arith.constant dense<0.000000e+00> : vector<2x256xf32>
    %258 = tpu.matmul %257, %85, %cst_73 {dimension_numbers = #tpu.dot_dimension_numbers<[1], [0], [0], [1], [0, 0, 1, 1], [], []>} : vector<2x64xbf16>, vector<64x256xbf16>, vector<2x256xf32> -> vector<2x256xf32>
    %259 = arith.addf %256, %258 : vector<2x256xf32>
    %260 = vector.extract_strided_slice %259 {offsets = [0, 0], sizes = [2, 192], strides = [1, 1]} : vector<2x256xf32> to vector<2x192xf32>
    %261 = arith.negf %260 : vector<2x192xf32>
    %262 = math.exp %261 : vector<2x192xf32>
    %cst_74 = arith.constant 1.000000e+00 : f32
    %263 = vector.broadcast %cst_74 : f32 to vector<2x192xf32>
    %264 = arith.addf %263, %262 : vector<2x192xf32>
    %265 = arith.divf %263, %264 : vector<2x192xf32>
    %266 = vector.extract_strided_slice %259 {offsets = [0, 192], sizes = [2, 64], strides = [1, 1]} : vector<2x256xf32> to vector<2x64xf32>
    %267 = math.tanh %266 : vector<2x64xf32>
    %268 = vector.extract_strided_slice %265 {offsets = [0, 0], sizes = [2, 64], strides = [1, 1]} : vector<2x192xf32> to vector<2x64xf32>
    %269 = vector.extract_strided_slice %265 {offsets = [0, 64], sizes = [2, 64], strides = [1, 1]} : vector<2x192xf32> to vector<2x64xf32>
    %270 = vector.extract_strided_slice %265 {offsets = [0, 128], sizes = [2, 64], strides = [1, 1]} : vector<2x192xf32> to vector<2x64xf32>
    %271 = arith.mulf %269, %249 : vector<2x64xf32>
    %272 = arith.mulf %268, %267 : vector<2x64xf32>
    %273 = arith.addf %271, %272 : vector<2x64xf32>
    %274 = math.tanh %273 : vector<2x64xf32>
    %275 = arith.mulf %270, %274 : vector<2x64xf32>
    %276 = vector.extract_strided_slice %275 {offsets = [0, 0], sizes = [2, 32], strides = [1, 1]} : vector<2x64xf32> to vector<2x32xf32>
    %c14_75 = arith.constant 14 : index
    %c0_76 = arith.constant 0 : index
    %277 = vector.load %arg19[%c14_75, %c0_76] : memref<16x64xf32, #tpu.memory_space<vmem>>, vector<2x32xf32>
    tpu.vector_store %arg19[%c14_75, %c0_76], %276 {strides = array<i32>} : memref<16x64xf32, #tpu.memory_space<vmem>>, vector<2x32xf32>,
    %278 = vector.extract_strided_slice %275 {offsets = [0, 32], sizes = [2, 32], strides = [1, 1]} : vector<2x64xf32> to vector<2x32xf32>
    %c0_77 = arith.constant 0 : index
    %c32_78 = arith.constant 32 : index
    %279 = vector.load %arg19[%c0_77, %c32_78] : memref<16x64xf32, #tpu.memory_space<vmem>>, vector<2x32xf32>
    tpu.vector_store %arg19[%c0_77, %c32_78], %278 {strides = array<i32>} : memref<16x64xf32, #tpu.memory_space<vmem>>, vector<2x32xf32>,
    %c0_79 = arith.constant 0 : index
    %c0_80 = arith.constant 0 : index
    %280 = vector.load %arg19[%c0_79, %c0_80] : memref<16x64xf32, #tpu.memory_space<vmem>>, vector<16x64xf32>
    %281 = arith.truncf %280 : vector<16x64xf32> to vector<16x64xbf16>
    %282 = vector.extract_strided_slice %280 {offsets = [14, 0], sizes = [2, 64], strides = [1, 1]} : vector<16x64xf32> to vector<2x64xf32>
    %283 = vector.extract_strided_slice %280 {offsets = [12, 0], sizes = [2, 64], strides = [1, 1]} : vector<16x64xf32> to vector<2x64xf32>
    %284 = vector.extract_strided_slice %280 {offsets = [10, 0], sizes = [2, 64], strides = [1, 1]} : vector<16x64xf32> to vector<2x64xf32>
    %285 = vector.extract_strided_slice %280 {offsets = [8, 0], sizes = [2, 64], strides = [1, 1]} : vector<16x64xf32> to vector<2x64xf32>
    %286 = vector.extract_strided_slice %280 {offsets = [6, 0], sizes = [2, 64], strides = [1, 1]} : vector<16x64xf32> to vector<2x64xf32>
    %287 = vector.extract_strided_slice %280 {offsets = [4, 0], sizes = [2, 64], strides = [1, 1]} : vector<16x64xf32> to vector<2x64xf32>
    %288 = vector.extract_strided_slice %280 {offsets = [2, 0], sizes = [2, 64], strides = [1, 1]} : vector<16x64xf32> to vector<2x64xf32>
    %289 = vector.extract_strided_slice %280 {offsets = [0, 0], sizes = [2, 64], strides = [1, 1]} : vector<16x64xf32> to vector<2x64xf32>
    %290 = tpu.concatenate %282, %283, %284, %285, %286, %287, %288, %289 in 0 : vector<2x64xf32>, vector<2x64xf32>, vector<2x64xf32>, vector<2x64xf32>, vector<2x64xf32>, vector<2x64xf32>, vector<2x64xf32>, vector<2x64xf32> -> vector<16x64xf32>
    %291 = arith.truncf %290 : vector<16x64xf32> to vector<16x64xbf16>
    %c0_81 = arith.constant 0 : index
    %c0_82 = arith.constant 0 : index
    %292 = vector.load %arg14[%c0_81, %c0_82] : memref<64x256xbf16, #tpu.memory_space<vmem>>, vector<64x256xbf16>
    %cst_83 = arith.constant dense<0.000000e+00> : vector<16x256xf32>
    %293 = tpu.matmul %281, %292, %cst_83 {dimension_numbers = #tpu.dot_dimension_numbers<[1], [0], [0], [1], [0, 0, 1, 1], [], []>} : vector<16x64xbf16>, vector<64x256xbf16>, vector<16x256xf32> -> vector<16x256xf32>
    %c0_84 = arith.constant 0 : index
    %c0_85 = arith.constant 0 : index
    %294 = vector.load %arg15[%c0_84, %c0_85] : memref<64x256xbf16, #tpu.memory_space<vmem>>, vector<64x256xbf16>
    %cst_86 = arith.constant dense<0.000000e+00> : vector<16x256xf32>
    %295 = tpu.matmul %291, %294, %cst_86 {dimension_numbers = #tpu.dot_dimension_numbers<[1], [0], [0], [1], [0, 0, 1, 1], [], []>} : vector<16x64xbf16>, vector<64x256xbf16>, vector<16x256xf32> -> vector<16x256xf32>
    %296 = arith.addf %293, %295 : vector<16x256xf32>
    %c0_87 = arith.constant 0 : index
    %c0_88 = arith.constant 0 : index
    %297 = vector.load %arg17[%c0_87, %c0_88] : memref<1x256xf32, #tpu.memory_space<vmem>>, vector<1x256xf32>
    %298 = vector.broadcast %297 : vector<1x256xf32> to vector<16x256xf32>
    %299 = arith.addf %296, %298 : vector<16x256xf32>
    %c0_89 = arith.constant 0 : index
    %c0_90 = arith.constant 0 : index
    %300 = vector.load %arg16[%c0_89, %c0_90] : memref<64x256xbf16, #tpu.memory_space<vmem>>, vector<64x256xbf16>
    %cst_91 = arith.constant 0.000000e+00 : f32
    %301 = vector.broadcast %cst_91 : f32 to vector<2x64xf32>
    %cst_92 = arith.constant 0.000000e+00 : f32
    %302 = vector.broadcast %cst_92 : f32 to vector<2x64xf32>
    %303 = vector.extract_strided_slice %299 {offsets = [0, 0], sizes = [2, 256], strides = [1, 1]} : vector<16x256xf32> to vector<2x256xf32>
    %304 = arith.truncf %301 : vector<2x64xf32> to vector<2x64xbf16>
    %cst_93 = arith.constant dense<0.000000e+00> : vector<2x256xf32>
    %305 = tpu.matmul %304, %300, %cst_93 {dimension_numbers = #tpu.dot_dimension_numbers<[1], [0], [0], [1], [0, 0, 1, 1], [], []>} : vector<2x64xbf16>, vector<64x256xbf16>, vector<2x256xf32> -> vector<2x256xf32>
    %306 = arith.addf %303, %305 : vector<2x256xf32>
    %307 = vector.extract_strided_slice %306 {offsets = [0, 0], sizes = [2, 192], strides = [1, 1]} : vector<2x256xf32> to vector<2x192xf32>
    %308 = arith.negf %307 : vector<2x192xf32>
    %309 = math.exp %308 : vector<2x192xf32>
    %cst_94 = arith.constant 1.000000e+00 : f32
    %310 = vector.broadcast %cst_94 : f32 to vector<2x192xf32>
    %311 = arith.addf %310, %309 : vector<2x192xf32>
    %312 = arith.divf %310, %311 : vector<2x192xf32>
    %313 = vector.extract_strided_slice %306 {offsets = [0, 192], sizes = [2, 64], strides = [1, 1]} : vector<2x256xf32> to vector<2x64xf32>
    %314 = math.tanh %313 : vector<2x64xf32>
    %315 = vector.extract_strided_slice %312 {offsets = [0, 0], sizes = [2, 64], strides = [1, 1]} : vector<2x192xf32> to vector<2x64xf32>
    %316 = vector.extract_strided_slice %312 {offsets = [0, 64], sizes = [2, 64], strides = [1, 1]} : vector<2x192xf32> to vector<2x64xf32>
    %317 = vector.extract_strided_slice %312 {offsets = [0, 128], sizes = [2, 64], strides = [1, 1]} : vector<2x192xf32> to vector<2x64xf32>
    %318 = arith.mulf %316, %302 : vector<2x64xf32>
    %319 = arith.mulf %315, %314 : vector<2x64xf32>
    %320 = arith.addf %318, %319 : vector<2x64xf32>
    %321 = math.tanh %320 : vector<2x64xf32>
    %322 = arith.mulf %317, %321 : vector<2x64xf32>
    %323 = vector.extract_strided_slice %322 {offsets = [0, 0], sizes = [2, 32], strides = [1, 1]} : vector<2x64xf32> to vector<2x32xf32>
    %c0_95 = arith.constant 0 : index
    %c0_96 = arith.constant 0 : index
    %324 = vector.load %arg20[%c0_95, %c0_96] : memref<16x64xf32, #tpu.memory_space<vmem>>, vector<2x32xf32>
    tpu.vector_store %arg20[%c0_95, %c0_96], %323 {strides = array<i32>} : memref<16x64xf32, #tpu.memory_space<vmem>>, vector<2x32xf32>,
    %325 = vector.extract_strided_slice %322 {offsets = [0, 32], sizes = [2, 32], strides = [1, 1]} : vector<2x64xf32> to vector<2x32xf32>
    %c14_97 = arith.constant 14 : index
    %c32_98 = arith.constant 32 : index
    %326 = vector.load %arg20[%c14_97, %c32_98] : memref<16x64xf32, #tpu.memory_space<vmem>>, vector<2x32xf32>
    tpu.vector_store %arg20[%c14_97, %c32_98], %325 {strides = array<i32>} : memref<16x64xf32, #tpu.memory_space<vmem>>, vector<2x32xf32>,
    %327 = vector.extract_strided_slice %299 {offsets = [2, 0], sizes = [2, 256], strides = [1, 1]} : vector<16x256xf32> to vector<2x256xf32>
    %328 = arith.truncf %322 : vector<2x64xf32> to vector<2x64xbf16>
    %cst_99 = arith.constant dense<0.000000e+00> : vector<2x256xf32>
    %329 = tpu.matmul %328, %300, %cst_99 {dimension_numbers = #tpu.dot_dimension_numbers<[1], [0], [0], [1], [0, 0, 1, 1], [], []>} : vector<2x64xbf16>, vector<64x256xbf16>, vector<2x256xf32> -> vector<2x256xf32>
    %330 = arith.addf %327, %329 : vector<2x256xf32>
    %331 = vector.extract_strided_slice %330 {offsets = [0, 0], sizes = [2, 192], strides = [1, 1]} : vector<2x256xf32> to vector<2x192xf32>
    %332 = arith.negf %331 : vector<2x192xf32>
    %333 = math.exp %332 : vector<2x192xf32>
    %cst_100 = arith.constant 1.000000e+00 : f32
    %334 = vector.broadcast %cst_100 : f32 to vector<2x192xf32>
    %335 = arith.addf %334, %333 : vector<2x192xf32>
    %336 = arith.divf %334, %335 : vector<2x192xf32>
    %337 = vector.extract_strided_slice %330 {offsets = [0, 192], sizes = [2, 64], strides = [1, 1]} : vector<2x256xf32> to vector<2x64xf32>
    %338 = math.tanh %337 : vector<2x64xf32>
    %339 = vector.extract_strided_slice %336 {offsets = [0, 0], sizes = [2, 64], strides = [1, 1]} : vector<2x192xf32> to vector<2x64xf32>
    %340 = vector.extract_strided_slice %336 {offsets = [0, 64], sizes = [2, 64], strides = [1, 1]} : vector<2x192xf32> to vector<2x64xf32>
    %341 = vector.extract_strided_slice %336 {offsets = [0, 128], sizes = [2, 64], strides = [1, 1]} : vector<2x192xf32> to vector<2x64xf32>
    %342 = arith.mulf %340, %320 : vector<2x64xf32>
    %343 = arith.mulf %339, %338 : vector<2x64xf32>
    %344 = arith.addf %342, %343 : vector<2x64xf32>
    %345 = math.tanh %344 : vector<2x64xf32>
    %346 = arith.mulf %341, %345 : vector<2x64xf32>
    %347 = vector.extract_strided_slice %346 {offsets = [0, 0], sizes = [2, 32], strides = [1, 1]} : vector<2x64xf32> to vector<2x32xf32>
    %c2_101 = arith.constant 2 : index
    %c0_102 = arith.constant 0 : index
    %348 = vector.load %arg20[%c2_101, %c0_102] : memref<16x64xf32, #tpu.memory_space<vmem>>, vector<2x32xf32>
    tpu.vector_store %arg20[%c2_101, %c0_102], %347 {strides = array<i32>} : memref<16x64xf32, #tpu.memory_space<vmem>>, vector<2x32xf32>,
    %349 = vector.extract_strided_slice %346 {offsets = [0, 32], sizes = [2, 32], strides = [1, 1]} : vector<2x64xf32> to vector<2x32xf32>
    %c12_103 = arith.constant 12 : index
    %c32_104 = arith.constant 32 : index
    %350 = vector.load %arg20[%c12_103, %c32_104] : memref<16x64xf32, #tpu.memory_space<vmem>>, vector<2x32xf32>
    tpu.vector_store %arg20[%c12_103, %c32_104], %349 {strides = array<i32>} : memref<16x64xf32, #tpu.memory_space<vmem>>, vector<2x32xf32>,
    %351 = vector.extract_strided_slice %299 {offsets = [4, 0], sizes = [2, 256], strides = [1, 1]} : vector<16x256xf32> to vector<2x256xf32>
    %352 = arith.truncf %346 : vector<2x64xf32> to vector<2x64xbf16>
    %cst_105 = arith.constant dense<0.000000e+00> : vector<2x256xf32>
    %353 = tpu.matmul %352, %300, %cst_105 {dimension_numbers = #tpu.dot_dimension_numbers<[1], [0], [0], [1], [0, 0, 1, 1], [], []>} : vector<2x64xbf16>, vector<64x256xbf16>, vector<2x256xf32> -> vector<2x256xf32>
    %354 = arith.addf %351, %353 : vector<2x256xf32>
    %355 = vector.extract_strided_slice %354 {offsets = [0, 0], sizes = [2, 192], strides = [1, 1]} : vector<2x256xf32> to vector<2x192xf32>
    %356 = arith.negf %355 : vector<2x192xf32>
    %357 = math.exp %356 : vector<2x192xf32>
    %cst_106 = arith.constant 1.000000e+00 : f32
    %358 = vector.broadcast %cst_106 : f32 to vector<2x192xf32>
    %359 = arith.addf %358, %357 : vector<2x192xf32>
    %360 = arith.divf %358, %359 : vector<2x192xf32>
    %361 = vector.extract_strided_slice %354 {offsets = [0, 192], sizes = [2, 64], strides = [1, 1]} : vector<2x256xf32> to vector<2x64xf32>
    %362 = math.tanh %361 : vector<2x64xf32>
    %363 = vector.extract_strided_slice %360 {offsets = [0, 0], sizes = [2, 64], strides = [1, 1]} : vector<2x192xf32> to vector<2x64xf32>
    %364 = vector.extract_strided_slice %360 {offsets = [0, 64], sizes = [2, 64], strides = [1, 1]} : vector<2x192xf32> to vector<2x64xf32>
    %365 = vector.extract_strided_slice %360 {offsets = [0, 128], sizes = [2, 64], strides = [1, 1]} : vector<2x192xf32> to vector<2x64xf32>
    %366 = arith.mulf %364, %344 : vector<2x64xf32>
    %367 = arith.mulf %363, %362 : vector<2x64xf32>
    %368 = arith.addf %366, %367 : vector<2x64xf32>
    %369 = math.tanh %368 : vector<2x64xf32>
    %370 = arith.mulf %365, %369 : vector<2x64xf32>
    %371 = vector.extract_strided_slice %370 {offsets = [0, 0], sizes = [2, 32], strides = [1, 1]} : vector<2x64xf32> to vector<2x32xf32>
    %c4_107 = arith.constant 4 : index
    %c0_108 = arith.constant 0 : index
    %372 = vector.load %arg20[%c4_107, %c0_108] : memref<16x64xf32, #tpu.memory_space<vmem>>, vector<2x32xf32>
    tpu.vector_store %arg20[%c4_107, %c0_108], %371 {strides = array<i32>} : memref<16x64xf32, #tpu.memory_space<vmem>>, vector<2x32xf32>,
    %373 = vector.extract_strided_slice %370 {offsets = [0, 32], sizes = [2, 32], strides = [1, 1]} : vector<2x64xf32> to vector<2x32xf32>
    %c10_109 = arith.constant 10 : index
    %c32_110 = arith.constant 32 : index
    %374 = vector.load %arg20[%c10_109, %c32_110] : memref<16x64xf32, #tpu.memory_space<vmem>>, vector<2x32xf32>
    tpu.vector_store %arg20[%c10_109, %c32_110], %373 {strides = array<i32>} : memref<16x64xf32, #tpu.memory_space<vmem>>, vector<2x32xf32>,
    %375 = vector.extract_strided_slice %299 {offsets = [6, 0], sizes = [2, 256], strides = [1, 1]} : vector<16x256xf32> to vector<2x256xf32>
    %376 = arith.truncf %370 : vector<2x64xf32> to vector<2x64xbf16>
    %cst_111 = arith.constant dense<0.000000e+00> : vector<2x256xf32>
    %377 = tpu.matmul %376, %300, %cst_111 {dimension_numbers = #tpu.dot_dimension_numbers<[1], [0], [0], [1], [0, 0, 1, 1], [], []>} : vector<2x64xbf16>, vector<64x256xbf16>, vector<2x256xf32> -> vector<2x256xf32>
    %378 = arith.addf %375, %377 : vector<2x256xf32>
    %379 = vector.extract_strided_slice %378 {offsets = [0, 0], sizes = [2, 192], strides = [1, 1]} : vector<2x256xf32> to vector<2x192xf32>
    %380 = arith.negf %379 : vector<2x192xf32>
    %381 = math.exp %380 : vector<2x192xf32>
    %cst_112 = arith.constant 1.000000e+00 : f32
    %382 = vector.broadcast %cst_112 : f32 to vector<2x192xf32>
    %383 = arith.addf %382, %381 : vector<2x192xf32>
    %384 = arith.divf %382, %383 : vector<2x192xf32>
    %385 = vector.extract_strided_slice %378 {offsets = [0, 192], sizes = [2, 64], strides = [1, 1]} : vector<2x256xf32> to vector<2x64xf32>
    %386 = math.tanh %385 : vector<2x64xf32>
    %387 = vector.extract_strided_slice %384 {offsets = [0, 0], sizes = [2, 64], strides = [1, 1]} : vector<2x192xf32> to vector<2x64xf32>
    %388 = vector.extract_strided_slice %384 {offsets = [0, 64], sizes = [2, 64], strides = [1, 1]} : vector<2x192xf32> to vector<2x64xf32>
    %389 = vector.extract_strided_slice %384 {offsets = [0, 128], sizes = [2, 64], strides = [1, 1]} : vector<2x192xf32> to vector<2x64xf32>
    %390 = arith.mulf %388, %368 : vector<2x64xf32>
    %391 = arith.mulf %387, %386 : vector<2x64xf32>
    %392 = arith.addf %390, %391 : vector<2x64xf32>
    %393 = math.tanh %392 : vector<2x64xf32>
    %394 = arith.mulf %389, %393 : vector<2x64xf32>
    %395 = vector.extract_strided_slice %394 {offsets = [0, 0], sizes = [2, 32], strides = [1, 1]} : vector<2x64xf32> to vector<2x32xf32>
    %c6_113 = arith.constant 6 : index
    %c0_114 = arith.constant 0 : index
    %396 = vector.load %arg20[%c6_113, %c0_114] : memref<16x64xf32, #tpu.memory_space<vmem>>, vector<2x32xf32>
    tpu.vector_store %arg20[%c6_113, %c0_114], %395 {strides = array<i32>} : memref<16x64xf32, #tpu.memory_space<vmem>>, vector<2x32xf32>,
    %397 = vector.extract_strided_slice %394 {offsets = [0, 32], sizes = [2, 32], strides = [1, 1]} : vector<2x64xf32> to vector<2x32xf32>
    %c8_115 = arith.constant 8 : index
    %c32_116 = arith.constant 32 : index
    %398 = vector.load %arg20[%c8_115, %c32_116] : memref<16x64xf32, #tpu.memory_space<vmem>>, vector<2x32xf32>
    tpu.vector_store %arg20[%c8_115, %c32_116], %397 {strides = array<i32>} : memref<16x64xf32, #tpu.memory_space<vmem>>, vector<2x32xf32>,
    %399 = vector.extract_strided_slice %299 {offsets = [8, 0], sizes = [2, 256], strides = [1, 1]} : vector<16x256xf32> to vector<2x256xf32>
    %400 = arith.truncf %394 : vector<2x64xf32> to vector<2x64xbf16>
    %cst_117 = arith.constant dense<0.000000e+00> : vector<2x256xf32>
    %401 = tpu.matmul %400, %300, %cst_117 {dimension_numbers = #tpu.dot_dimension_numbers<[1], [0], [0], [1], [0, 0, 1, 1], [], []>} : vector<2x64xbf16>, vector<64x256xbf16>, vector<2x256xf32> -> vector<2x256xf32>
    %402 = arith.addf %399, %401 : vector<2x256xf32>
    %403 = vector.extract_strided_slice %402 {offsets = [0, 0], sizes = [2, 192], strides = [1, 1]} : vector<2x256xf32> to vector<2x192xf32>
    %404 = arith.negf %403 : vector<2x192xf32>
    %405 = math.exp %404 : vector<2x192xf32>
    %cst_118 = arith.constant 1.000000e+00 : f32
    %406 = vector.broadcast %cst_118 : f32 to vector<2x192xf32>
    %407 = arith.addf %406, %405 : vector<2x192xf32>
    %408 = arith.divf %406, %407 : vector<2x192xf32>
    %409 = vector.extract_strided_slice %402 {offsets = [0, 192], sizes = [2, 64], strides = [1, 1]} : vector<2x256xf32> to vector<2x64xf32>
    %410 = math.tanh %409 : vector<2x64xf32>
    %411 = vector.extract_strided_slice %408 {offsets = [0, 0], sizes = [2, 64], strides = [1, 1]} : vector<2x192xf32> to vector<2x64xf32>
    %412 = vector.extract_strided_slice %408 {offsets = [0, 64], sizes = [2, 64], strides = [1, 1]} : vector<2x192xf32> to vector<2x64xf32>
    %413 = vector.extract_strided_slice %408 {offsets = [0, 128], sizes = [2, 64], strides = [1, 1]} : vector<2x192xf32> to vector<2x64xf32>
    %414 = arith.mulf %412, %392 : vector<2x64xf32>
    %415 = arith.mulf %411, %410 : vector<2x64xf32>
    %416 = arith.addf %414, %415 : vector<2x64xf32>
    %417 = math.tanh %416 : vector<2x64xf32>
    %418 = arith.mulf %413, %417 : vector<2x64xf32>
    %419 = vector.extract_strided_slice %418 {offsets = [0, 0], sizes = [2, 32], strides = [1, 1]} : vector<2x64xf32> to vector<2x32xf32>
    %c8_119 = arith.constant 8 : index
    %c0_120 = arith.constant 0 : index
    %420 = vector.load %arg20[%c8_119, %c0_120] : memref<16x64xf32, #tpu.memory_space<vmem>>, vector<2x32xf32>
    tpu.vector_store %arg20[%c8_119, %c0_120], %419 {strides = array<i32>} : memref<16x64xf32, #tpu.memory_space<vmem>>, vector<2x32xf32>,
    %421 = vector.extract_strided_slice %418 {offsets = [0, 32], sizes = [2, 32], strides = [1, 1]} : vector<2x64xf32> to vector<2x32xf32>
    %c6_121 = arith.constant 6 : index
    %c32_122 = arith.constant 32 : index
    %422 = vector.load %arg20[%c6_121, %c32_122] : memref<16x64xf32, #tpu.memory_space<vmem>>, vector<2x32xf32>
    tpu.vector_store %arg20[%c6_121, %c32_122], %421 {strides = array<i32>} : memref<16x64xf32, #tpu.memory_space<vmem>>, vector<2x32xf32>,
    %423 = vector.extract_strided_slice %299 {offsets = [10, 0], sizes = [2, 256], strides = [1, 1]} : vector<16x256xf32> to vector<2x256xf32>
    %424 = arith.truncf %418 : vector<2x64xf32> to vector<2x64xbf16>
    %cst_123 = arith.constant dense<0.000000e+00> : vector<2x256xf32>
    %425 = tpu.matmul %424, %300, %cst_123 {dimension_numbers = #tpu.dot_dimension_numbers<[1], [0], [0], [1], [0, 0, 1, 1], [], []>} : vector<2x64xbf16>, vector<64x256xbf16>, vector<2x256xf32> -> vector<2x256xf32>
    %426 = arith.addf %423, %425 : vector<2x256xf32>
    %427 = vector.extract_strided_slice %426 {offsets = [0, 0], sizes = [2, 192], strides = [1, 1]} : vector<2x256xf32> to vector<2x192xf32>
    %428 = arith.negf %427 : vector<2x192xf32>
    %429 = math.exp %428 : vector<2x192xf32>
    %cst_124 = arith.constant 1.000000e+00 : f32
    %430 = vector.broadcast %cst_124 : f32 to vector<2x192xf32>
    %431 = arith.addf %430, %429 : vector<2x192xf32>
    %432 = arith.divf %430, %431 : vector<2x192xf32>
    %433 = vector.extract_strided_slice %426 {offsets = [0, 192], sizes = [2, 64], strides = [1, 1]} : vector<2x256xf32> to vector<2x64xf32>
    %434 = math.tanh %433 : vector<2x64xf32>
    %435 = vector.extract_strided_slice %432 {offsets = [0, 0], sizes = [2, 64], strides = [1, 1]} : vector<2x192xf32> to vector<2x64xf32>
    %436 = vector.extract_strided_slice %432 {offsets = [0, 64], sizes = [2, 64], strides = [1, 1]} : vector<2x192xf32> to vector<2x64xf32>
    %437 = vector.extract_strided_slice %432 {offsets = [0, 128], sizes = [2, 64], strides = [1, 1]} : vector<2x192xf32> to vector<2x64xf32>
    %438 = arith.mulf %436, %416 : vector<2x64xf32>
    %439 = arith.mulf %435, %434 : vector<2x64xf32>
    %440 = arith.addf %438, %439 : vector<2x64xf32>
    %441 = math.tanh %440 : vector<2x64xf32>
    %442 = arith.mulf %437, %441 : vector<2x64xf32>
    %443 = vector.extract_strided_slice %442 {offsets = [0, 0], sizes = [2, 32], strides = [1, 1]} : vector<2x64xf32> to vector<2x32xf32>
    %c10_125 = arith.constant 10 : index
    %c0_126 = arith.constant 0 : index
    %444 = vector.load %arg20[%c10_125, %c0_126] : memref<16x64xf32, #tpu.memory_space<vmem>>, vector<2x32xf32>
    tpu.vector_store %arg20[%c10_125, %c0_126], %443 {strides = array<i32>} : memref<16x64xf32, #tpu.memory_space<vmem>>, vector<2x32xf32>,
    %445 = vector.extract_strided_slice %442 {offsets = [0, 32], sizes = [2, 32], strides = [1, 1]} : vector<2x64xf32> to vector<2x32xf32>
    %c4_127 = arith.constant 4 : index
    %c32_128 = arith.constant 32 : index
    %446 = vector.load %arg20[%c4_127, %c32_128] : memref<16x64xf32, #tpu.memory_space<vmem>>, vector<2x32xf32>
    tpu.vector_store %arg20[%c4_127, %c32_128], %445 {strides = array<i32>} : memref<16x64xf32, #tpu.memory_space<vmem>>, vector<2x32xf32>,
    %447 = vector.extract_strided_slice %299 {offsets = [12, 0], sizes = [2, 256], strides = [1, 1]} : vector<16x256xf32> to vector<2x256xf32>
    %448 = arith.truncf %442 : vector<2x64xf32> to vector<2x64xbf16>
    %cst_129 = arith.constant dense<0.000000e+00> : vector<2x256xf32>
    %449 = tpu.matmul %448, %300, %cst_129 {dimension_numbers = #tpu.dot_dimension_numbers<[1], [0], [0], [1], [0, 0, 1, 1], [], []>} : vector<2x64xbf16>, vector<64x256xbf16>, vector<2x256xf32> -> vector<2x256xf32>
    %450 = arith.addf %447, %449 : vector<2x256xf32>
    %451 = vector.extract_strided_slice %450 {offsets = [0, 0], sizes = [2, 192], strides = [1, 1]} : vector<2x256xf32> to vector<2x192xf32>
    %452 = arith.negf %451 : vector<2x192xf32>
    %453 = math.exp %452 : vector<2x192xf32>
    %cst_130 = arith.constant 1.000000e+00 : f32
    %454 = vector.broadcast %cst_130 : f32 to vector<2x192xf32>
    %455 = arith.addf %454, %453 : vector<2x192xf32>
    %456 = arith.divf %454, %455 : vector<2x192xf32>
    %457 = vector.extract_strided_slice %450 {offsets = [0, 192], sizes = [2, 64], strides = [1, 1]} : vector<2x256xf32> to vector<2x64xf32>
    %458 = math.tanh %457 : vector<2x64xf32>
    %459 = vector.extract_strided_slice %456 {offsets = [0, 0], sizes = [2, 64], strides = [1, 1]} : vector<2x192xf32> to vector<2x64xf32>
    %460 = vector.extract_strided_slice %456 {offsets = [0, 64], sizes = [2, 64], strides = [1, 1]} : vector<2x192xf32> to vector<2x64xf32>
    %461 = vector.extract_strided_slice %456 {offsets = [0, 128], sizes = [2, 64], strides = [1, 1]} : vector<2x192xf32> to vector<2x64xf32>
    %462 = arith.mulf %460, %440 : vector<2x64xf32>
    %463 = arith.mulf %459, %458 : vector<2x64xf32>
    %464 = arith.addf %462, %463 : vector<2x64xf32>
    %465 = math.tanh %464 : vector<2x64xf32>
    %466 = arith.mulf %461, %465 : vector<2x64xf32>
    %467 = vector.extract_strided_slice %466 {offsets = [0, 0], sizes = [2, 32], strides = [1, 1]} : vector<2x64xf32> to vector<2x32xf32>
    %c12_131 = arith.constant 12 : index
    %c0_132 = arith.constant 0 : index
    %468 = vector.load %arg20[%c12_131, %c0_132] : memref<16x64xf32, #tpu.memory_space<vmem>>, vector<2x32xf32>
    tpu.vector_store %arg20[%c12_131, %c0_132], %467 {strides = array<i32>} : memref<16x64xf32, #tpu.memory_space<vmem>>, vector<2x32xf32>,
    %469 = vector.extract_strided_slice %466 {offsets = [0, 32], sizes = [2, 32], strides = [1, 1]} : vector<2x64xf32> to vector<2x32xf32>
    %c2_133 = arith.constant 2 : index
    %c32_134 = arith.constant 32 : index
    %470 = vector.load %arg20[%c2_133, %c32_134] : memref<16x64xf32, #tpu.memory_space<vmem>>, vector<2x32xf32>
    tpu.vector_store %arg20[%c2_133, %c32_134], %469 {strides = array<i32>} : memref<16x64xf32, #tpu.memory_space<vmem>>, vector<2x32xf32>,
    %471 = vector.extract_strided_slice %299 {offsets = [14, 0], sizes = [2, 256], strides = [1, 1]} : vector<16x256xf32> to vector<2x256xf32>
    %472 = arith.truncf %466 : vector<2x64xf32> to vector<2x64xbf16>
    %cst_135 = arith.constant dense<0.000000e+00> : vector<2x256xf32>
    %473 = tpu.matmul %472, %300, %cst_135 {dimension_numbers = #tpu.dot_dimension_numbers<[1], [0], [0], [1], [0, 0, 1, 1], [], []>} : vector<2x64xbf16>, vector<64x256xbf16>, vector<2x256xf32> -> vector<2x256xf32>
    %474 = arith.addf %471, %473 : vector<2x256xf32>
    %475 = vector.extract_strided_slice %474 {offsets = [0, 0], sizes = [2, 192], strides = [1, 1]} : vector<2x256xf32> to vector<2x192xf32>
    %476 = arith.negf %475 : vector<2x192xf32>
    %477 = math.exp %476 : vector<2x192xf32>
    %cst_136 = arith.constant 1.000000e+00 : f32
    %478 = vector.broadcast %cst_136 : f32 to vector<2x192xf32>
    %479 = arith.addf %478, %477 : vector<2x192xf32>
    %480 = arith.divf %478, %479 : vector<2x192xf32>
    %481 = vector.extract_strided_slice %474 {offsets = [0, 192], sizes = [2, 64], strides = [1, 1]} : vector<2x256xf32> to vector<2x64xf32>
    %482 = math.tanh %481 : vector<2x64xf32>
    %483 = vector.extract_strided_slice %480 {offsets = [0, 0], sizes = [2, 64], strides = [1, 1]} : vector<2x192xf32> to vector<2x64xf32>
    %484 = vector.extract_strided_slice %480 {offsets = [0, 64], sizes = [2, 64], strides = [1, 1]} : vector<2x192xf32> to vector<2x64xf32>
    %485 = vector.extract_strided_slice %480 {offsets = [0, 128], sizes = [2, 64], strides = [1, 1]} : vector<2x192xf32> to vector<2x64xf32>
    %486 = arith.mulf %484, %464 : vector<2x64xf32>
    %487 = arith.mulf %483, %482 : vector<2x64xf32>
    %488 = arith.addf %486, %487 : vector<2x64xf32>
    %489 = math.tanh %488 : vector<2x64xf32>
    %490 = arith.mulf %485, %489 : vector<2x64xf32>
    %491 = vector.extract_strided_slice %490 {offsets = [0, 0], sizes = [2, 32], strides = [1, 1]} : vector<2x64xf32> to vector<2x32xf32>
    %c14_137 = arith.constant 14 : index
    %c0_138 = arith.constant 0 : index
    %492 = vector.load %arg20[%c14_137, %c0_138] : memref<16x64xf32, #tpu.memory_space<vmem>>, vector<2x32xf32>
    tpu.vector_store %arg20[%c14_137, %c0_138], %491 {strides = array<i32>} : memref<16x64xf32, #tpu.memory_space<vmem>>, vector<2x32xf32>,
    %493 = vector.extract_strided_slice %490 {offsets = [0, 32], sizes = [2, 32], strides = [1, 1]} : vector<2x64xf32> to vector<2x32xf32>
    %c0_139 = arith.constant 0 : index
    %c32_140 = arith.constant 32 : index
    %494 = vector.load %arg20[%c0_139, %c32_140] : memref<16x64xf32, #tpu.memory_space<vmem>>, vector<2x32xf32>
    tpu.vector_store %arg20[%c0_139, %c32_140], %493 {strides = array<i32>} : memref<16x64xf32, #tpu.memory_space<vmem>>, vector<2x32xf32>,
    %c0_141 = arith.constant 0 : index
    %c0_142 = arith.constant 0 : index
    %495 = vector.load %arg20[%c0_141, %c0_142] : memref<16x64xf32, #tpu.memory_space<vmem>>, vector<16x64xf32>
    %c0_143 = arith.constant 0 : index
    %496 = memref.load %arg0[%c0_143] : memref<4xf32, #tpu.memory_space<smem>>
    %c1 = arith.constant 1 : index
    %497 = memref.load %arg0[%c1] : memref<4xf32, #tpu.memory_space<smem>>
    %c2_144 = arith.constant 2 : index
    %498 = memref.load %arg0[%c2_144] : memref<4xf32, #tpu.memory_space<smem>>
    %c3 = arith.constant 3 : index
    %499 = memref.load %arg0[%c3] : memref<4xf32, #tpu.memory_space<smem>>
    %500 = arith.addf %497, %498 : f32
    %501 = vector.broadcast %500 : f32 to vector<16x64xf32>
    %502 = arith.mulf %501, %280 : vector<16x64xf32>
    %503 = vector.broadcast %498 : f32 to vector<16x64xf32>
    %504 = arith.mulf %503, %495 : vector<16x64xf32>
    %505 = arith.addf %502, %504 : vector<16x64xf32>
    %506 = vector.broadcast %496 : f32 to vector<16x32xf32>
    %507 = arith.mulf %506, %65 : vector<16x32xf32>
    %508 = vector.extract_strided_slice %505 {offsets = [0, 0], sizes = [16, 32], strides = [1, 1]} : vector<16x64xf32> to vector<16x32xf32>
    %509 = arith.addf %508, %507 : vector<16x32xf32>
    %510 = vector.broadcast %499 : f32 to vector<16x32xf32>
    %511 = arith.mulf %510, %509 : vector<16x32xf32>
    %c0_145 = arith.constant 0 : index
    %c0_146 = arith.constant 0 : index
    %512 = vector.load %arg18[%c0_145, %c0_146] : memref<16x64xf32, #tpu.memory_space<vmem>>, vector<16x32xf32>
    tpu.vector_store %arg18[%c0_145, %c0_146], %511 {strides = array<i32>} : memref<16x64xf32, #tpu.memory_space<vmem>>, vector<16x32xf32>,
    %513 = vector.extract_strided_slice %505 {offsets = [0, 32], sizes = [16, 32], strides = [1, 1]} : vector<16x64xf32> to vector<16x32xf32>
    %514 = arith.addf %513, %507 : vector<16x32xf32>
    %515 = vector.broadcast %499 : f32 to vector<16x32xf32>
    %516 = arith.mulf %515, %514 : vector<16x32xf32>
    %c0_147 = arith.constant 0 : index
    %c32_148 = arith.constant 32 : index
    %517 = vector.load %arg18[%c0_147, %c32_148] : memref<16x64xf32, #tpu.memory_space<vmem>>, vector<16x32xf32>
    tpu.vector_store %arg18[%c0_147, %c32_148], %516 {strides = array<i32>} : memref<16x64xf32, #tpu.memory_space<vmem>>, vector<16x32xf32>,
    return
  }
}

</mosaic_0001>

<bundles_post_ra>
// kernel: elmo_forward.1
= control target key start
LH: loop header
LB: loop body
LE: loop exit
PB: predicated region body
PF: predicated region fallthrough
CT: control target
= control target key end

     0   :  { %s3937_s0 = inlined_call_operand.vmem [shape: f32[4], index: 0, kind: input, shape index: {}]   ;;  %s3938_s1 = inlined_call_operand.vmem [shape: bf16[16,128], index: 1, kind: input, shape index: {}]   ;;  %s3939_s2 = inlined_call_operand.vmem [shape: bf16[128,512], index: 2, kind: input, shape index: {}]   ;;  %s3940_s3 = inlined_call_operand.vmem [shape: f32[1,32], index: 3, kind: input, shape index: {}]   ;;  %s3941_s4 = inlined_call_operand.vmem [shape: bf16[32,64], index: 4, kind: input, shape index: {}]   ;;  %s3942_s5 = inlined_call_operand.vmem [shape: f32[1,64], index: 5, kind: input, shape index: {}]   ;;  %s3943_s6 = inlined_call_operand.vmem [shape: bf16[32,64], index: 6, kind: input, shape index: {}]   ;;  %s3944_s7 = inlined_call_operand.vmem [shape: f32[1,64], index: 7, kind: input, shape index: {}]   ;;  %s3945_s8 = inlined_call_operand.vmem [shape: bf16[32,32], index: 8, kind: input, shape index: {}]   ;;  %s3946_s9 = inlined_call_operand.vmem [shape: f32[1,32], index: 9, kind: input, shape index: {}]   ;;  %s3947_s10 = inlined_call_operand.vmem [shape: bf16[32,256], index: 10, kind: input, shape index: {}]   ;;  %s3948_s11 = inlined_call_operand.vmem [shape: bf16[32,256], index: 11, kind: input, shape index: {}]   ;;  %s3949_s12 = inlined_call_operand.vmem [shape: bf16[64,256], index: 12, kind: input, shape index: {}]   ;;  %s3950_s13 = inlined_call_operand.vmem [shape: f32[1,256], index: 13, kind: input, shape index: {}]   ;;  %s3951_s14 = inlined_call_operand.vmem [shape: bf16[64,256], index: 14, kind: input, shape index: {}]   ;;  %s3952_s15 = inlined_call_operand.vmem [shape: bf16[64,256], index: 15, kind: input, shape index: {}]   ;;  %s3953_s16 = inlined_call_operand.vmem [shape: bf16[64,256], index: 16, kind: input, shape index: {}]   ;;  %s3954_s17 = inlined_call_operand.vmem [shape: f32[1,256], index: 17, kind: input, shape index: {}]   ;;  %s3955_s18 = inlined_call_operand.vmem [shape: f32[16,64], index: 18, kind: output, shape index: {}]  }
   0x1   :  { %3957 = sst [smem:[#allocation7_spill]] %s3937_s0 }
   0x2   :  { %3958 = sst [smem:[#allocation8_spill]] %s3938_s1 }
   0x3   :  { %3959 = sst [smem:[#allocation9_spill]] %s3939_s2 }
   0x4   :  { %23 = vsyncpa [#allocation5], 0  ;;  %s3960_s29 = sld [smem:[#allocation7_spill]] }
   0xa   :  { %s30_s30 = sshll.u32 %s3960_s29, 4  ;;  %s31_s30 = int_to_ptr.vmem [resolvable:$true] %s30_s30 }
   0xb   :  { %s3133_s0 = scalar_lea.vmem %s31_s30, 16  ;;  %p3138_p1 = scmp.lt.s32.totalorder %s31_s30, %s31_s30 }
   0xc   :  { %p3134_p0 = scmp.ne.s32.totalorder %s31_s30, %s3133_s0  ;;  %p3139_p2 = scmp.lt.s32.totalorder %s3133_s0, %s3133_s0 }
   0xe   :  { %p3140_p3 = por %p3139_p2, %p3138_p1 }
  0x10   :  { %p3141_p4 = pnand %p3140_p3, %p3134_p0 }
  0x12   :  { %3144 = shalt.err (!%p3141_p4)
}
  0x13   :  { %s3147_s19 = smov [#allocation4]  }
  0x14   :  { %33 = dma.vmem_to_smem %s31_s30, 16, %s3147_s19, [#allocation5]  }
  0x15   :  { %3145 = dma.done.wait [#allocation5], 16  }
  0x16   :  { %3146 = vsyncadd [#allocation5], 4294967280 }
  0x17   :  { %71 = sfence }
  0x18   :  { %s3961_s21 = sld [smem:[#allocation9_spill]]  ;;  %v3148_v2 = vmov 0   ;;  %s3962_s29 = sld [smem:[#allocation8_spill]]  ;;  %v2859_v48 = vld [vmem:[%s3941_s4] sm:$0xff]   ;;  %v3150_v49 = vmov 0.0   ;;  %v2860_v50 = vld [vmem:[%s3941_s4 + $0x8] sm:$0xff]  }
  0x19   :  { %305 = vmatprep.mubr.bf16.mxu0 %v3148_v2  ;;  %348 = vmatprep.mubr.bf16.mxu1 %v3148_v2  ;;  %vm3151_vm0 = vmmov 0   ;;  %s3152_s20 = smov 96   ;;  %v2652_v55 = vld [vmem:[%s3940_s3] ss:$0 sm:$0xff]  ;;  %s3153_s2 = smov 32   ;;  %vm420_vm1 = vcmask 261120  }
  0x1a   :  { %vm686_vm2 = vcmask 1041408   ;;  %vm688_vm3 = vcmask 1043456   ;;  %vm690_vm4 = vcmask 1045504   ;;  %vm977_vm5 = vcmask 254976   ;;  %s2761_s28 = sld [smem:[#allocation4 + $0x3]] }
  0x1b   :  { %vm979_vm6 = vcmask 517376   ;;  %vm900_vm7 = vcmask 523264   ;;  %vm1067_vm8 = vcmask 257026   ;;  %vm1069_vm9 = vcmask 519426  }
  0x1c   :  { %vm1159_vm10 = vcmask 259076   ;;  %vm1161_vm11 = vcmask 521476   ;;  %vm1251_vm12 = vcmask 261126   ;;  %vm1253_vm13 = vcmask 523526  }
  0x1d   :  { %vm2611_vm14 = vcmask 523520  }
  0x1e   :  { %v2810_v0 = vld [vmem:[%s3961_s21 + $0x4] ss:$16 sps:$4 sm:$0xff]   ;;  %v2812_v1 = vld [vmem:[%s3961_s21 + $0xc] ss:$16 sps:$4 sm:$0xff]   ;;  %v2814_v3 = vld [vmem:[%s3961_s21] ss:$16 sps:$4 sm:$0xff]  }
  0x1f   :  { %273 = vmatprep.subr.bf16.mxu0 %v2810_v0  ;;  %v2815_v4 = vld [vmem:[%s3961_s21 + $0x8] ss:$16 sps:$4 sm:$0xff]   ;;  %316 = vmatprep.subr.bf16.mxu1 %v2812_v1  ;;  %v2816_v5 = vld [vmem:[%s3961_s21 + $0x24] ss:$16 sps:$4 sm:$0xff]   ;;  %v2818_v6 = vld [vmem:[%s3961_s21 + $0x2c] ss:$16 sps:$4 sm:$0xff]  }
  0x20   :  { %274 = vmatpush1.bf16.msra.mxu0 %v2814_v3  ;;  %317 = vmatpush1.bf16.msra.mxu1 %v2815_v4  ;;  %v2820_v7 = vld [vmem:[%s3961_s21 + $0x20] ss:$16 sps:$4 sm:$0xff]   ;;  %v2821_v8 = vld [vmem:[%s3961_s21 + $0x28] ss:$16 sps:$4 sm:$0xff]   ;;  %v2822_v9 = vld [vmem:[%s3961_s21 + $0x44] ss:$16 sps:$4 sm:$0xff]  }
  0x21   :  { %275 = vmatprep.subr.bf16.mxu0 %v2816_v5  ;;  %318 = vmatprep.subr.bf16.mxu1 %v2818_v6  ;;  %v2824_v10 = vld [vmem:[%s3961_s21 + $0x4c] ss:$16 sps:$4 sm:$0xff]   ;;  %v2826_v11 = vld [vmem:[%s3961_s21 + $0x40] ss:$16 sps:$4 sm:$0xff]   ;;  %v2827_v12 = vld [vmem:[%s3961_s21 + $0x48] ss:$16 sps:$4 sm:$0xff]  }
  0x22   :  { %v2828_v13 = vld [vmem:[%s3961_s21 + $0x64] ss:$16 sps:$4 sm:$0xff]   ;;  %v2830_v14 = vld [vmem:[%s3961_s21 + $0x6c] ss:$16 sps:$4 sm:$0xff]   ;;  %v2832_v15 = vld [vmem:[%s3961_s21 + $0x60] ss:$16 sps:$4 sm:$0xff]  }
  0x23   :  { %v2833_v16 = vld [vmem:[%s3961_s21 + $0x68] ss:$16 sps:$4 sm:$0xff]   ;;  %v2834_v17 = vld [vmem:[%s3961_s21 + $0x84] ss:$16 sps:$4 sm:$0xff]   ;;  %v2836_v18 = vld [vmem:[%s3961_s21 + $0x8c] ss:$16 sps:$4 sm:$0xff]  }
  0x24   :  { %276 = vmatpush1.bf16.msra.mxu0 %v2820_v7  ;;  %319 = vmatpush1.bf16.msra.mxu1 %v2821_v8  ;;  %v2838_v19 = vld [vmem:[%s3961_s21 + $0x80] ss:$16 sps:$4 sm:$0xff]   ;;  %v2839_v20 = vld [vmem:[%s3961_s21 + $0x88] ss:$16 sps:$4 sm:$0xff]   ;;  %v2840_v21 = vld [vmem:[%s3961_s21 + $0xa4] ss:$16 sps:$4 sm:$0xff]  }
  0x25   :  { %277 = vmatprep.subr.bf16.mxu0 %v2822_v9  ;;  %320 = vmatprep.subr.bf16.mxu1 %v2824_v10  ;;  %v2842_v22 = vld [vmem:[%s3961_s21 + $0xac] ss:$16 sps:$4 sm:$0xff]   ;;  %v2844_v23 = vld [vmem:[%s3961_s21 + $0xa0] ss:$16 sps:$4 sm:$0xff]   ;;  %v2845_v24 = vld [vmem:[%s3961_s21 + $0xa8] ss:$16 sps:$4 sm:$0xff]  }
  0x26   :  { %v2846_v25 = vld [vmem:[%s3961_s21 + $0xc4] ss:$16 sps:$4 sm:$0xff]   ;;  %v2848_v26 = vld [vmem:[%s3961_s21 + $0xcc] ss:$16 sps:$4 sm:$0xff]   ;;  %v2850_v27 = vld [vmem:[%s3961_s21 + $0xc0] ss:$16 sps:$4 sm:$0xff]  }
  0x27   :  { %v2851_v28 = vld [vmem:[%s3961_s21 + $0xc8] ss:$16 sps:$4 sm:$0xff]   ;;  %v2852_v29 = vld [vmem:[%s3961_s21 + $0xe4] ss:$16 sps:$4 sm:$0xff]   ;;  %v2854_v30 = vld [vmem:[%s3961_s21 + $0xec] ss:$16 sps:$4 sm:$0xff]  }
  0x28   :  { %278 = vmatpush1.bf16.msra.mxu0 %v2826_v11  ;;  %321 = vmatpush1.bf16.msra.mxu1 %v2827_v12  ;;  %v2856_v31 = vld [vmem:[%s3961_s21 + $0xe0] ss:$16 sps:$4 sm:$0xff]   ;;  %v2857_v32 = vld [vmem:[%s3961_s21 + $0xe8] ss:$16 sps:$4 sm:$0xff]   ;;  %s3149_s21 = smov 64  }
  0x29   :  { %279 = vmatprep.subr.bf16.mxu0 %v2828_v13  ;;  %322 = vmatprep.subr.bf16.mxu1 %v2830_v14  ;;  %v2858_v33 = vld [vmem:[%s3962_s29] sm:$0xff]   ;;  %v2862_v8 = vld [vmem:[%s3943_s6 + $0x8] sm:$0xff]  }
  0x2a   :  { %v2653_v1 = vld [vmem:[%s3942_s5] ss:$0 sm:$0xff] }
  0x2b   :  { %v2861_v4 = vld [vmem:[%s3943_s6] sm:$0xff]  }
  0x2c   :  { %280 = vmatpush1.bf16.msra.mxu0 %v2832_v15  ;;  %323 = vmatpush1.bf16.msra.mxu1 %v2833_v16 }
  0x2d   :  { %281 = vmatprep.subr.bf16.mxu0 %v2834_v17  ;;  %324 = vmatprep.subr.bf16.mxu1 %v2836_v18 }
  0x30   :  { %282 = vmatpush1.bf16.msra.mxu0 %v2838_v19  ;;  %325 = vmatpush1.bf16.msra.mxu1 %v2839_v20 }
  0x31   :  { %283 = vmatprep.subr.bf16.mxu0 %v2840_v21  ;;  %326 = vmatprep.subr.bf16.mxu1 %v2842_v22 }
  0x34   :  { %284 = vmatpush1.bf16.msra.mxu0 %v2844_v23  ;;  %327 = vmatpush1.bf16.msra.mxu1 %v2845_v24 }
  0x35   :  { %285 = vmatprep.subr.bf16.mxu0 %v2846_v25  ;;  %328 = vmatprep.subr.bf16.mxu1 %v2848_v26 }
  0x38   :  { %286 = vmatpush1.bf16.msra.mxu0 %v2850_v27  ;;  %329 = vmatpush1.bf16.msra.mxu1 %v2851_v28 }
  0x39   :  { %287 = vmatprep.subr.bf16.mxu0 %v2852_v29  ;;  %330 = vmatprep.subr.bf16.mxu1 %v2854_v30 }
  0x3c   :  { %288 = vmatpush1.bf16.msra.mxu0 %v2856_v31  ;;  %331 = vmatpush1.bf16.msra.mxu1 %v2857_v32 }
  0x3d   :  { %2771 = vmatprep.subr.bf16.mxu0 %v3150_v49  ;;  %2779 = vmatprep.subr.bf16.mxu1 %v3150_v49 }
  0x3f   :  { %306 = vmatmul.mubr.bf16.vlgmr.msra.gmra.mrb[0].mxu0 %v2858_v33  ;;  %349 = vmatmul.mubr.bf16.vlgmr.msra.gmra.mrb[0].mxu1 %v2858_v33 }
  0x40   :  { %2772 = vmatpush3.bf16.msra.mxu0 %v2859_v48  ;;  %2775 = vmatprep.mubr.msk.bf16.mxu0 %vm3151_vm0, %v3150_v49 }
  0x41   :  { %2773 = vmatprep.subr.bf16.mxu0 %v3150_v49  ;;  %2783 = vmatprep.mubr.msk.bf16.mxu1 %vm3151_vm0, %v3150_v49 }
  0x42   :  { %2780 = vmatpush3.bf16.msra.mxu1 %v2861_v4  ;;  %v2865_v4 = vld [vmem:[%s3948_s11] ss:$8 sps:$4 sm:$0xff]  }
  0x43   :  { %2781 = vmatprep.subr.bf16.mxu1 %v3150_v49 }
  0x44   :  { %2774 = vmatpush3.bf16.msra.mxu0 %v2860_v50 }
  0x45   :  { %2787 = vmatprep.subr.bf16.mxu0 %v3150_v49 }
  0x46   :  { %2782 = vmatpush3.bf16.msra.mxu1 %v2862_v8  ;;  %v2868_v8 = vld [vmem:[%s3948_s11 + $0x10] ss:$8 sps:$4 sm:$0xff]  }
 0x112   :  { %v307_v34 = vpop.f32.mrb[0].mxu0  ;;  %v350_v35 = vpop.f32.mrb[0].mxu1 }
 0x113   :  { %v359_v36 = vmax.f32 %v307_v34, %v350_v35  ;;  %v309_v37 = vpop.f32.mrb[1].mxu0  ;;  %v352_v38 = vpop.f32.mrb[1].mxu1  ;;  %v2659_v35 = vld [vmem:[%s3944_s7] ss:$0 sm:$0xff] }
 0x114   :  { %v360_v39 = vmax.f32 %v309_v37, %v352_v38  ;;  %v311_v40 = vpop.f32.mrb[2].mxu0  ;;  %v354_v41 = vpop.f32.mrb[2].mxu1  ;;  %v2863_v37 = vld [vmem:[%s3945_s8] sm:$0xff]  }
 0x115   :  { %v361_v42 = vmax.f32 %v311_v40, %v354_v41  ;;  %v313_v43 = vpop.f32.mrb[3].mxu0  ;;  %v356_v44 = vpop.f32.mrb[3].mxu1  ;;  %v2864_v41 = vld [vmem:[%s3945_s8 + $0x8] sm:$0xff]  }
 0x116   :  { %v362_v45 = vmax.f32 %v313_v43, %v356_v44  ;;  %v363_v46 = vmax.f32 %v359_v36, %v360_v39 }
 0x118   :  { %v364_v47 = vmax.f32 %v361_v42, %v362_v45  ;;  %367 = vrot.lane.b32.xlu0 %v363_v46, %s3149_s21 }
 0x11c   :  { %369 = vrot.lane.b32.xlu0 %v364_v47, %s3149_s21 }
 0x18a   :  { %v368_v51 = vpop.permute.xlu0 %367 }
 0x18b   :  { %v373_v52 = vmax.f32 %v363_v46, %v368_v51 }
 0x18d   :  { %377 = vrot.lane.b32.xlu1 %v373_v52, %s3152_s20 }
 0x18e   :  { %v370_v53 = vpop.permute.xlu0 %369 }
 0x18f   :  { %v374_v54 = vmax.f32 %v364_v47, %v370_v53 }
 0x191   :  { %379 = vrot.lane.b32.xlu1 %v374_v54, %s3152_s20 }
 0x1ff   :  { %v378_v56 = vpop.permute.xlu1 %377 }
 0x200   :  { %v383_v57 = vmax.f32 %v373_v52, %v378_v56 }
 0x202   :  { %v392_v58 = vadd.f32 %v2652_v55, %v383_v57 }
 0x203   :  { %v380_v59 = vpop.permute.xlu1 %379 }
 0x204   :  { %v394_v60 = vmax.f32 %v392_v58, 0.0  ;;  %v384_v61 = vmax.f32 %v374_v54, %v380_v59 }
 0x206   :  { %v393_v62 = vadd.f32 %v2652_v55, %v384_v61  ;;  %481 = vrot.lane.b32.xlu0 %v394_v60, %s3153_s2 }
 0x208   :  { %v395_v63 = vmax.f32 %v393_v62, 0.0 }
 0x20a   :  { %v396_v0 = vpack.c.bf16 %v395_v63, %v394_v60  ;;  %483 = vrot.lane.b32.xlu1 %v395_v63, %s3153_s2 }
 0x20c   :  { %2776 = vmatmul.mubr.msk.bf16.vlgmr.msra.gmra.mrb[4].mxu0 %vm420_vm1, %v396_v0 }
 0x20d   :  { %2791 = vmatprep.mubr.msk.bf16.mxu0 %vm3151_vm0, %v3150_v49  ;;  %2788 = vmatpush3.bf16.msra.mxu0 %v2863_v37 }
 0x20e   :  { %2789 = vmatprep.subr.bf16.mxu0 %v3150_v49 }
 0x211   :  { %2790 = vmatpush3.bf16.msra.mxu0 %v2864_v41 }
 0x278   :  { %v482_v20 = vpop.permute.xlu0 %481 }
 0x27c   :  { %v484_v22 = vpop.permute.xlu1 %483 }
 0x2df   :  { %v458_v3 = vpop.f32.mrb[4].mxu0 }
 0x2e0   :  { %v459_v5 = vadd.f32 %v2653_v1, %v458_v3  ;;  %v2777_v6 = vpop.f32.mrb[5].mxu0  ;;  %v2867_v3 = vld [vmem:[%s3948_s11 + $0x4] ss:$8 sps:$4 sm:$0xff]  }
 0x2e1   :  { %v461_v7 = vpop.f32.mrb[6].mxu0  ;;  %727 = vmatprep.subr.bf16.mxu1 %v2867_v3  ;;  %v2870_v6 = vld [vmem:[%s3948_s11 + $0x14] ss:$8 sps:$4 sm:$0xff]  }
 0x2e2   :  { %v465_v9 = vmax.f32 %v459_v5, 0.0  ;;  %v462_v10 = vadd.f32 %v2653_v1, %v461_v7  ;;  %v2778_v11 = vpop.f32.mrb[7].mxu0  ;;  %v2657_v13 = vmul.f32 -1.442695, %v459_v5  ;;  %v3418_v5 = vld [vmem:[%s3949_s12 + $0x4] ss:$8 sps:$4 sm:$0xff]  }
 0x2e3   :  { %v3426_v7 = vld [vmem:[%s3949_s12] ss:$8 sps:$4 sm:$0xff]   ;;  %904 = vmatprep.subr.bf16.mxu0 %v3418_v5  ;;  %v3445_v11 = vld [vmem:[%s3949_s12 + $0x10] ss:$8 sps:$4 sm:$0xff]  }
 0x2e4   :  { %v466_v12 = vmax.f32 %v462_v10, 0.0  ;;  %493 = vrot.lane.b32.xlu0 %v465_v9, %s3153_s2  ;;  %v2658_v14 = vmul.f32 -1.442695, %v462_v10  ;;  %2925 = vpow2.f32 %v2657_v13  ;;  %v2876_v9 = vld [vmem:[%s3947_s10 + $0x4] ss:$8 sps:$4 sm:$0xff]  }
 0x2e5   :  { %v3439_v10 = vld [vmem:[%s3949_s12 + $0x14] ss:$8 sps:$4 sm:$0xff]   ;;  %v3456_v13 = vld [vmem:[%s3949_s12 + $0x20] ss:$8 sps:$4 sm:$0xff]  }
 0x2e6   :  { %495 = vrot.lane.b32.xlu1 %v466_v12, %s3153_s2  ;;  %2927 = vpow2.f32 %v2658_v14  ;;  %v3451_v12 = vld [vmem:[%s3949_s12 + $0x24] ss:$8 sps:$4 sm:$0xff]   ;;  %v3463_v14 = vld [vmem:[%s3949_s12 + $0x34] ss:$8 sps:$4 sm:$0xff]  }
 0x2ee   :  { %v2926_v15 = vpop.eup %2925 }
 0x2ef   :  { %v473_v17 = vadd.f32 1.0, %v2926_v15  ;;  %v3468_v15 = vld [vmem:[%s3949_s12 + $0x30] ss:$8 sps:$4 sm:$0xff]   ;;  %s3483_s12 = sld [smem:[#allocation4]] }
 0x2f0   :  { %v2928_v16 = vpop.eup %2927 }
 0x2f1   :  { %v474_v18 = vadd.f32 1.0, %v2928_v16  ;;  %2929 = vrcp.f32 %v473_v17  ;;  %v2665_v16 = vld [vmem:[%s3946_s9] ss:$0 sm:$0xff] }
 0x2f3   :  { %2931 = vrcp.f32 %v474_v18 }
 0x2fb   :  { %v2930_v19 = vpop.eup %2929 }
 0x2fc   :  { %v489_v23 = vsub.f32 1.0, %v2930_v19  ;;  %v487_v28 = vmul.f32 %v2930_v19, %v482_v20 }
 0x2fd   :  { %v2932_v21 = vpop.eup %2931 }
 0x2fe   :  { %v490_v26 = vsub.f32 1.0, %v2932_v21  ;;  %v488_v29 = vmul.f32 %v2932_v21, %v484_v22 }
 0x356   :  { %v494_v24 = vpop.permute.xlu0 %493 }
 0x357   :  { %v499_v25 = vmul.f32 %v494_v24, %v489_v23 }
 0x358   :  { %v496_v27 = vpop.permute.xlu1 %495 }
 0x359   :  { %v500_v30 = vmul.f32 %v496_v27, %v490_v26  ;;  %v501_v31 = vadd.f32 %v499_v25, %v487_v28  ;;  %v2589_v25 = vstv %s3483_s12  ;;  %s2760_s12 = sld [smem:[#allocation4 + $0x2]] }
 0x35b   :  { %v502_v32 = vadd.f32 %v500_v30, %v488_v29 }
 0x35d   :  { %v503_v33 = vpack.c.bf16 %v502_v32, %v501_v31 }
 0x35f   :  { %516 = vrot.lane.b32.xlu0 %v503_v33, %s3152_s20 }
 0x3d1   :  { %v517_v34 = vpop.permute.xlu0 %516 }
 0x3d2   :  { %2784 = vmatmul.mubr.msk.bf16.vlgmr.msra.gmra.mrb[4].mxu1 %vm420_vm1, %v517_v34  ;;  %v2874_v34 = vld [vmem:[%s3947_s10] ss:$8 sps:$4 sm:$0xff]  }
 0x3d3   :  { %759 = vmatprep.mubr.bf16.mxu1 %v3148_v2  ;;  %728 = vmatpush1.bf16.msra.mxu1 %v2865_v4 }
 0x3d4   :  { %729 = vmatprep.subr.bf16.mxu1 %v2870_v6 }
 0x3d7   :  { %730 = vmatpush1.bf16.msra.mxu1 %v2868_v8 }
 0x3d8   :  { %793 = vmatprep.subr.bf16.mxu1 %v2876_v9 }
 0x4a5   :  { %v567_v36 = vpop.f32.mrb[4].mxu1 }
 0x4a6   :  { %v568_v38 = vadd.f32 %v2659_v35, %v567_v36  ;;  %v2785_v39 = vpop.f32.mrb[5].mxu1 }
 0x4a7   :  { %v570_v40 = vpop.f32.mrb[6].mxu1  ;;  %v2883_v39 = vld [vmem:[%s3947_s10 + $0x10] ss:$8 sps:$4 sm:$0xff]  }
 0x4a8   :  { %v574_v42 = vmax.f32 %v568_v38, 0.0  ;;  %v571_v43 = vadd.f32 %v2659_v35, %v570_v40  ;;  %v2786_v44 = vpop.f32.mrb[7].mxu1  ;;  %v2663_v46 = vmul.f32 -1.442695, %v568_v38  ;;  %v2885_v38 = vld [vmem:[%s3947_s10 + $0x14] ss:$8 sps:$4 sm:$0xff]  }
 0x4a9   :  { %v838_v44 = vlaneseq }
 0x4aa   :  { %v575_v45 = vmax.f32 %v571_v43, 0.0  ;;  %594 = vrot.lane.b32.xlu1 %v574_v42, %s3153_s2  ;;  %v2664_v47 = vmul.f32 -1.442695, %v571_v43  ;;  %2933 = vpow2.f32 %v2663_v46 }
 0x4ac   :  { %596 = vrot.lane.b32.xlu0 %v575_v45, %s3153_s2  ;;  %2935 = vpow2.f32 %v2664_v47  ;;  %v3526_v45 = vshrl.u32 %v838_v44, 7  ;;  %v836_v47 = vld [vmem:[%s3950_s13] sm:$0x3] }
 0x4ae   :  { %v840_v46 = vsub.s32 0, %v3526_v45 }
 0x4b4   :  { %v2934_v48 = vpop.eup %2933 }
 0x4b5   :  { %v582_v51 = vadd.f32 1.0, %v2934_v48  ;;  %v844_v48 = vsub.s32 1, %v3526_v45 }
 0x4b6   :  { %v2936_v50 = vpop.eup %2935 }
 0x4b7   :  { %v583_v52 = vadd.f32 1.0, %v2936_v50  ;;  %2937 = vrcp.f32 %v582_v51  ;;  %v841_v50 = vrot.slane %v836_v47, %v840_v46  ;;  %v845_v51 = vrot.slane %v836_v47, %v844_v48 }
 0x4b9   :  { %2939 = vrcp.f32 %v583_v52 }
 0x4c1   :  { %v2938_v53 = vpop.eup %2937 }
 0x4c2   :  { %v590_v55 = vsub.f32 1.0, %v2938_v53  ;;  %v588_v59 = vmul.f32 %v2938_v53, %v501_v31 }
 0x4c3   :  { %v2940_v54 = vpop.eup %2939 }
 0x4c4   :  { %v591_v57 = vsub.f32 1.0, %v2940_v54  ;;  %v589_v60 = vmul.f32 %v2940_v54, %v502_v32 }
 0x51c   :  { %v595_v49 = vpop.permute.xlu1 %594 }
 0x51d   :  { %v600_v56 = vmul.f32 %v595_v49, %v590_v55 }
 0x51e   :  { %v597_v58 = vpop.permute.xlu0 %596 }
 0x51f   :  { %v601_v61 = vmul.f32 %v597_v58, %v591_v57  ;;  %v602_v62 = vadd.f32 %v600_v56, %v588_v59 }
 0x521   :  { %v603_v63 = vadd.f32 %v601_v61, %v589_v60 }
 0x523   :  { %v604_v0 = vpack.c.bf16 %v603_v63, %v602_v62 }
 0x525   :  { %617 = vrot.lane.b32.xlu1 %v604_v0, %s3152_s20 }
 0x597   :  { %v618_v1 = vpop.permute.xlu1 %617 }
 0x598   :  { %2792 = vmatmul.mubr.msk.bf16.vlgmr.msra.gmra.mrb[8].mxu0 %vm420_vm1, %v618_v1 }
 0x599   :  { %936 = vmatprep.mubr.bf16.mxu0 %v3148_v2  ;;  %905 = vmatpush1.bf16.msra.mxu0 %v3426_v7 }
 0x59a   :  { %906 = vmatprep.subr.bf16.mxu0 %v3439_v10 }
 0x59d   :  { %907 = vmatpush1.bf16.msra.mxu0 %v3445_v11 }
 0x59e   :  { %908 = vmatprep.subr.bf16.mxu0 %v3451_v12 }
 0x5a1   :  { %909 = vmatpush1.bf16.msra.mxu0 %v3456_v13 }
 0x5a2   :  { %910 = vmatprep.subr.bf16.mxu0 %v3463_v14 }
 0x5a5   :  { %911 = vmatpush1.bf16.msra.mxu0 %v3468_v15 }
 0x5a6   :  { %1077 = vmatprep.subr.bf16.mxu0 %v3418_v5 }
 0x5a8   :  { %937 = vmatmul.mubr.bf16.vlgmr.msra.gmra.mrb[12].mxu0 %v3148_v2 }
 0x5a9   :  { %1078 = vmatpush1.bf16.msra.mxu0 %v3426_v7  ;;  %1109 = vmatprep.mubr.bf16.mxu0 %v3148_v2 }
 0x5aa   :  { %1079 = vmatprep.subr.bf16.mxu0 %v3439_v10 }
 0x5ad   :  { %1080 = vmatpush1.bf16.msra.mxu0 %v3445_v11 }
 0x5ae   :  { %1081 = vmatprep.subr.bf16.mxu0 %v3451_v12 }
 0x5b1   :  { %1082 = vmatpush1.bf16.msra.mxu0 %v3456_v13 }
 0x5b2   :  { %1083 = vmatprep.subr.bf16.mxu0 %v3463_v14 }
 0x5b5   :  { %1084 = vmatpush1.bf16.msra.mxu0 %v3468_v15 }
 0x5b6   :  { %1261 = vmatprep.subr.bf16.mxu0 %v3418_v5 }
 0x66b   :  { %v668_v17 = vpop.f32.mrb[8].mxu0 }
 0x66c   :  { %v3488_v18 = vadd.f32 %v2665_v16, %v668_v17  ;;  %v2793_v19 = vpop.f32.mrb[9].mxu0 }
 0x66d   :  { %v671_v20 = vpop.f32.mrb[10].mxu0 }
 0x66e   :  { %v682_v21 = vrot.slane %v3488_v18, 6  ;;  %v684_v22 = vrot.slane %v3488_v18, 2  ;;  %v672_v23 = vadd.f32 %v2665_v16, %v671_v20  ;;  %v2794_v24 = vpop.f32.mrb[11].mxu0 }
 0x670   :  { %v692_v26 = vsel %vm686_vm2, %v682_v21, %v684_v22  ;;  %v675_v27 = vpack.c.bf16 %v672_v23, %v3488_v18  ;;  %v677_v28 = vrot.slane %v672_v23, 6  ;;  %v679_v29 = vrot.slane %v672_v23, 2 }
 0x671   :  { %v693_v30 = vsel %vm688_vm3, %v692_v26, %v682_v21  ;;  %v3498_v31 = vmul.f32 %v2589_v25, %v672_v23 }
 0x672   :  { %v687_v32 = vsel %vm686_vm2, %v677_v28, %v679_v29  ;;  %v694_v36 = vsel %vm690_vm4, %v693_v30, %v684_v22 }
 0x673   :  { %v689_v33 = vsel %vm688_vm3, %v687_v32, %v677_v28 }
 0x674   :  { %v691_v35 = vsel %vm690_vm4, %v689_v33, %v679_v29 }
 0x675   :  { %v695_v37 = vpack.c.bf16 %v694_v36, %v691_v35 }
 0x677   :  { %2673 = vmatmul.mubr.msk.bf16.vlgmr.msra.gmra.mrb[8].mxu1 %vm420_vm1, %v695_v37 }
 0x678   :  { %794 = vmatpush1.bf16.msra.mxu1 %v2874_v34  ;;  %825 = vmatprep.mubr.bf16.mxu1 %v3148_v2 }
 0x679   :  { %795 = vmatprep.subr.bf16.mxu1 %v2885_v38 }
 0x67b   :  { %v938_v40 = vpop.f32.mrb[12].mxu0 }
 0x67c   :  { %796 = vmatpush1.bf16.msra.mxu1 %v2883_v39  ;;  %v940_v41 = vpop.f32.mrb[13].mxu0 }
 0x67d   :  { %985 = vmatprep.subr.bf16.mxu1 %v3418_v5  ;;  %v942_v42 = vpop.f32.mrb[14].mxu0 }
 0x67e   :  { %v943_v43 = vpop.f32.mrb[15].mxu0 }
 0x683   :  { %2678 = vmatmul.mubr.msk.bf16.vlgmr.msra.gmra.mrb[8].mxu1 %vm420_vm1, %v675_v27 }
 0x684   :  { %986 = vmatpush1.bf16.msra.mxu1 %v3426_v7  ;;  %1017 = vmatprep.mubr.bf16.mxu1 %v3148_v2 }
 0x685   :  { %987 = vmatprep.subr.bf16.mxu1 %v3439_v10 }
 0x688   :  { %988 = vmatpush1.bf16.msra.mxu1 %v3445_v11 }
 0x689   :  { %989 = vmatprep.subr.bf16.mxu1 %v3451_v12 }
 0x68c   :  { %990 = vmatpush1.bf16.msra.mxu1 %v3456_v13 }
 0x68d   :  { %991 = vmatprep.subr.bf16.mxu1 %v3463_v14 }
 0x690   :  { %992 = vmatpush1.bf16.msra.mxu1 %v3468_v15 }
 0x691   :  { %1169 = vmatprep.subr.bf16.mxu1 %v3418_v5 }
 0x756   :  { %v827_v52 = vpop.f32.mrb[8].mxu1 }
 0x757   :  { %v3537_v53 = vadd.f32 %v841_v50, %v827_v52  ;;  %v829_v54 = vpop.f32.mrb[9].mxu1 }
 0x758   :  { %v3539_v55 = vadd.f32 %v845_v51, %v829_v54  ;;  %v831_v49 = vpop.f32.mrb[10].mxu1 }
 0x759   :  { %v3541_v56 = vadd.f32 %v841_v50, %v831_v49  ;;  %v833_v57 = vpop.f32.mrb[11].mxu1  ;;  %v945_v61 = vadd.f32 %v938_v40, %v3537_v53 }
 0x75a   :  { %v946_v58 = vadd.f32 %v940_v41, %v3539_v55  ;;  %v3544_v59 = vadd.f32 %v845_v51, %v833_v57 }
 0x75b   :  { %v2687_v62 = vmul.f32 -1.442695, %v945_v61 }
 0x75c   :  { %2941 = vtanh.f32 %v946_v58  ;;  %v2688_v17 = vmul.f32 -1.442695, %v946_v58 }
 0x75d   :  { %2943 = vpow2.f32 %v2687_v62 }
 0x766   :  { %v2942_v60 = vpop.eup %2941 }
 0x767   :  { %962 = vrot.lane.b32.xlu0 %v2942_v60, %s3149_s21  ;;  %v2944_v63 = vpop.eup %2943 }
 0x768   :  { %v953_v0 = vadd.f32 1.0, %v2944_v63 }
 0x76a   :  { %2945 = vrcp.f32 %v953_v0 }
 0x774   :  { %v2946_v1 = vpop.eup %2945 }
 0x775   :  { %v960_v6 = vmul.f32 0.0, %v2946_v1 }
 0x7d9   :  { %v963_v3 = vpop.permute.xlu0 %962 }
 0x7da   :  { %v965_v4 = vmul.f32 %v2946_v1, %v963_v3 }
 0x7dc   :  { %967 = vrot.lane.b32.xlu1 %v965_v4, %s3149_s21 }
 0x84e   :  { %v968_v8 = vpop.permute.xlu1 %967 }
 0x84f   :  { %v970_v9 = vadd.f32 %v968_v8, %v960_v6 }
 0x851   :  { %2947 = vtanh.f32 %v970_v9  ;;  %v1048_v42 = vrot.slane %v970_v9, 6 }
 0x852   :  { %2949 = vpow2.f32 %v2688_v17 }
 0x85b   :  { %v2948_v16 = vpop.eup %2947 }
 0x85c   :  { %973 = vrot.lane.b32.xlu0 %v2948_v16, %s3149_s21  ;;  %v2950_v19 = vpop.eup %2949 }
 0x85d   :  { %v954_v20 = vadd.f32 1.0, %v2950_v19 }
 0x85f   :  { %2951 = vrcp.f32 %v954_v20 }
 0x869   :  { %v2952_v21 = vpop.eup %2951 }
 0x8ce   :  { %v974_v22 = vpop.permute.xlu0 %973 }
 0x8cf   :  { %v976_v23 = vmul.f32 %v2952_v21, %v974_v22 }
 0x8d1   :  { %978 = vst.msk [vmem:[#allocation2] sm:$0x3] %vm977_vm5, %v976_v23  ;;  %v981_v24 = vpack.c.bf16 %v976_v23, %v976_v23 }
 0x8d2   :  { %980 = vst.msk [vmem:[#allocation2 + $0xe] sm:$0x3] %vm979_vm6, %v976_v23 }
 0x8d3   :  { %2689 = vmatmul.mubr.msk.bf16.vlgmr.msra.gmra.mrb[12].mxu1 %vm900_vm7, %v981_v24 }
 0x8d4   :  { %1170 = vmatpush1.bf16.msra.mxu1 %v3426_v7  ;;  %1201 = vmatprep.mubr.bf16.mxu1 %v3148_v2 }
 0x8d5   :  { %1171 = vmatprep.subr.bf16.mxu1 %v3439_v10 }
 0x8d8   :  { %1172 = vmatpush1.bf16.msra.mxu1 %v3445_v11 }
 0x8d9   :  { %1173 = vmatprep.subr.bf16.mxu1 %v3451_v12 }
 0x8dc   :  { %1174 = vmatpush1.bf16.msra.mxu1 %v3456_v13 }
 0x8dd   :  { %1175 = vmatprep.subr.bf16.mxu1 %v3463_v14 }
 0x8e0   :  { %1176 = vmatpush1.bf16.msra.mxu1 %v3468_v15 }
 0x8e1   :  { %1343 = vmatprep.subr.bf16.mxu1 %v3418_v5 }
 0x9a6   :  { %v1019_v26 = vpop.f32.mrb[12].mxu1 }
 0x9a7   :  { %v1021_v27 = vpop.f32.mrb[13].mxu1  ;;  %v1028_v34 = vrot.slane %v1019_v26, 6 }
 0x9a8   :  { %v1029_v28 = vrot.slane %v1021_v27, 6  ;;  %v1023_v29 = vpop.f32.mrb[14].mxu1 }
 0x9a9   :  { %v1024_v30 = vpop.f32.mrb[15].mxu1  ;;  %v1032_v35 = vadd.f32 %v1028_v34, %v3537_v53 }
 0x9aa   :  { %v1033_v32 = vadd.f32 %v1029_v28, %v3539_v55 }
 0x9ab   :  { %v2690_v36 = vmul.f32 -1.442695, %v1032_v35 }
 0x9ac   :  { %2953 = vtanh.f32 %v1033_v32  ;;  %v2691_v51 = vmul.f32 -1.442695, %v1033_v32 }
 0x9ad   :  { %2955 = vpow2.f32 %v2690_v36 }
 0x9b6   :  { %v2954_v33 = vpop.eup %2953 }
 0x9b7   :  { %1052 = vrot.lane.b32.xlu1 %v2954_v33, %s3149_s21  ;;  %v2956_v37 = vpop.eup %2955 }
 0x9b8   :  { %v1040_v38 = vadd.f32 1.0, %v2956_v37 }
 0x9ba   :  { %2957 = vrcp.f32 %v1040_v38 }
 0x9c4   :  { %v2958_v39 = vpop.eup %2957 }
 0x9c5   :  { %v1050_v43 = vmul.f32 %v2958_v39, %v1048_v42 }
 0xa29   :  { %v1053_v40 = vpop.permute.xlu1 %1052 }
 0xa2a   :  { %v1055_v41 = vmul.f32 %v2958_v39, %v1053_v40 }
 0xa2c   :  { %1057 = vrot.lane.b32.xlu0 %v1055_v41, %s3149_s21 }
 0xa9e   :  { %v1058_v44 = vpop.permute.xlu0 %1057 }
 0xa9f   :  { %v1060_v47 = vadd.f32 %v1058_v44, %v1050_v43 }
 0xaa1   :  { %2959 = vtanh.f32 %v1060_v47  ;;  %v1140_v23 = vrot.slane %v1060_v47, 6 }
 0xaa2   :  { %2961 = vpow2.f32 %v2691_v51 }
 0xaab   :  { %v2960_v50 = vpop.eup %2959 }
 0xaac   :  { %1063 = vrot.lane.b32.xlu1 %v2960_v50, %s3149_s21  ;;  %v2962_v52 = vpop.eup %2961 }
 0xaad   :  { %v1041_v54 = vadd.f32 1.0, %v2962_v52 }
 0xaaf   :  { %2963 = vrcp.f32 %v1041_v54 }
 0xab9   :  { %v2964_v49 = vpop.eup %2963 }
 0xb1e   :  { %v1064_v57 = vpop.permute.xlu1 %1063 }
 0xb1f   :  { %v1066_v58 = vmul.f32 %v2964_v49, %v1064_v57 }
 0xb21   :  { %1068 = vst.msk [vmem:[#allocation2] sm:$0xc] %vm1067_vm8, %v1066_v58  ;;  %v1071_v60 = vpack.c.bf16 %v1066_v58, %v1066_v58 }
 0xb22   :  { %1070 = vst.msk [vmem:[#allocation2 + $0xa] sm:$0xc] %vm1069_vm9, %v1066_v58 }
 0xb23   :  { %v1073_v61 = vrot.slane %v1071_v60, 1 }
 0xb25   :  { %2692 = vmatmul.mubr.msk.bf16.vlgmr.msra.gmra.mrb[16].mxu0 %vm900_vm7, %v1073_v61 }
 0xb26   :  { %1262 = vmatpush1.bf16.msra.mxu0 %v3426_v7  ;;  %1293 = vmatprep.mubr.bf16.mxu0 %v3148_v2 }
 0xb27   :  { %1263 = vmatprep.subr.bf16.mxu0 %v3439_v10 }
 0xb2a   :  { %1264 = vmatpush1.bf16.msra.mxu0 %v3445_v11 }
 0xb2b   :  { %1265 = vmatprep.subr.bf16.mxu0 %v3451_v12 }
 0xb2e   :  { %1266 = vmatpush1.bf16.msra.mxu0 %v3456_v13 }
 0xb2f   :  { %1267 = vmatprep.subr.bf16.mxu0 %v3463_v14 }
 0xb32   :  { %1268 = vmatpush1.bf16.msra.mxu0 %v3468_v15 }
 0xb33   :  { %1433 = vmatprep.subr.bf16.mxu0 %v3418_v5 }
 0xbf8   :  { %v1111_v62 = vpop.f32.mrb[16].mxu0 }
 0xbf9   :  { %v1113_v63 = vpop.f32.mrb[17].mxu0  ;;  %v1120_v8 = vrot.slane %v1111_v62, 4 }
 0xbfa   :  { %v1121_v0 = vrot.slane %v1113_v63, 4  ;;  %v1115_v1 = vpop.f32.mrb[18].mxu0 }
 0xbfb   :  { %v1116_v3 = vpop.f32.mrb[19].mxu0  ;;  %v1124_v9 = vadd.f32 %v1120_v8, %v3537_v53 }
 0xbfc   :  { %v1125_v4 = vadd.f32 %v1121_v0, %v3539_v55 }
 0xbfd   :  { %v2693_v16 = vmul.f32 -1.442695, %v1124_v9 }
 0xbfe   :  { %2965 = vtanh.f32 %v1125_v4  ;;  %v2694_v29 = vmul.f32 -1.442695, %v1125_v4 }
 0xbff   :  { %2967 = vpow2.f32 %v2693_v16 }
 0xc08   :  { %v2966_v6 = vpop.eup %2965 }
 0xc09   :  { %1144 = vrot.lane.b32.xlu0 %v2966_v6, %s3149_s21  ;;  %v2968_v17 = vpop.eup %2967 }
 0xc0a   :  { %v1132_v19 = vadd.f32 1.0, %v2968_v17 }
 0xc0c   :  { %2969 = vrcp.f32 %v1132_v19 }
 0xc16   :  { %v2970_v20 = vpop.eup %2969 }
 0xc17   :  { %v1142_v24 = vmul.f32 %v2970_v20, %v1140_v23 }
 0xc7b   :  { %v1145_v21 = vpop.permute.xlu0 %1144 }
 0xc7c   :  { %v1147_v22 = vmul.f32 %v2970_v20, %v1145_v21 }
 0xc7e   :  { %1149 = vrot.lane.b32.xlu1 %v1147_v22, %s3149_s21 }
 0xcf0   :  { %v1150_v26 = vpop.permute.xlu1 %1149 }
 0xcf1   :  { %v1152_v27 = vadd.f32 %v1150_v26, %v1142_v24 }
 0xcf3   :  { %2971 = vtanh.f32 %v1152_v27  ;;  %v1232_v58 = vrot.slane %v1152_v27, 6 }
 0xcf4   :  { %2973 = vpow2.f32 %v2694_v29 }
 0xcfd   :  { %v2972_v28 = vpop.eup %2971 }
 0xcfe   :  { %1155 = vrot.lane.b32.xlu0 %v2972_v28, %s3149_s21  ;;  %v2974_v30 = vpop.eup %2973 }
 0xcff   :  { %v1133_v32 = vadd.f32 1.0, %v2974_v30 }
 0xd01   :  { %2975 = vrcp.f32 %v1133_v32 }
 0xd0b   :  { %v2976_v33 = vpop.eup %2975 }
 0xd70   :  { %v1156_v34 = vpop.permute.xlu0 %1155 }
 0xd71   :  { %v1158_v35 = vmul.f32 %v2976_v33, %v1156_v34 }
 0xd73   :  { %1160 = vst.msk [vmem:[#allocation2] sm:$0x30] %vm1159_vm10, %v1158_v35  ;;  %v1163_v36 = vpack.c.bf16 %v1158_v35, %v1158_v35 }
 0xd74   :  { %1162 = vst.msk [vmem:[#allocation2 + $0x6] sm:$0x30] %vm1161_vm11, %v1158_v35 }
 0xd75   :  { %v1165_v37 = vrot.slane %v1163_v36, 2 }
 0xd77   :  { %2695 = vmatmul.mubr.msk.bf16.vlgmr.msra.gmra.mrb[16].mxu1 %vm900_vm7, %v1165_v37 }
 0xd78   :  { %1344 = vmatpush1.bf16.msra.mxu1 %v3426_v7  ;;  %1375 = vmatprep.mubr.bf16.mxu1 %v3148_v2 }
 0xd79   :  { %1345 = vmatprep.subr.bf16.mxu1 %v3439_v10 }
 0xd7c   :  { %1346 = vmatpush1.bf16.msra.mxu1 %v3445_v11 }
 0xd7d   :  { %1347 = vmatprep.subr.bf16.mxu1 %v3451_v12 }
 0xd80   :  { %1348 = vmatpush1.bf16.msra.mxu1 %v3456_v13 }
 0xd81   :  { %1349 = vmatprep.subr.bf16.mxu1 %v3463_v14 }
 0xd84   :  { %1350 = vmatpush1.bf16.msra.mxu1 %v3468_v15 }
 0xd85   :  { %1523 = vmatprep.subr.bf16.mxu1 %v3418_v5 }
 0xe4a   :  { %v1203_v38 = vpop.f32.mrb[16].mxu1 }
 0xe4b   :  { %v1205_v39 = vpop.f32.mrb[17].mxu1  ;;  %v1212_v47 = vrot.slane %v1203_v38, 2 }
 0xe4c   :  { %v1213_v40 = vrot.slane %v1205_v39, 2  ;;  %v1207_v41 = vpop.f32.mrb[18].mxu1 }
 0xe4d   :  { %v1208_v42 = vpop.f32.mrb[19].mxu1  ;;  %v1216_v50 = vadd.f32 %v1212_v47, %v3537_v53 }
 0xe4e   :  { %v1217_v43 = vadd.f32 %v1213_v40, %v3539_v55 }
 0xe4f   :  { %v2696_v51 = vmul.f32 -1.442695, %v1216_v50 }
 0xe50   :  { %2977 = vtanh.f32 %v1217_v43  ;;  %v2697_v63 = vmul.f32 -1.442695, %v1217_v43 }
 0xe51   :  { %2979 = vpow2.f32 %v2696_v51 }
 0xe5a   :  { %v2978_v44 = vpop.eup %2977 }
 0xe5b   :  { %1236 = vrot.lane.b32.xlu1 %v2978_v44, %s3149_s21  ;;  %v2980_v52 = vpop.eup %2979 }
 0xe5c   :  { %v1224_v54 = vadd.f32 1.0, %v2980_v52 }
 0xe5e   :  { %2981 = vrcp.f32 %v1224_v54 }
 0xe68   :  { %v2982_v5 = vpop.eup %2981 }
 0xe69   :  { %v1234_v60 = vmul.f32 %v2982_v5, %v1232_v58 }
 0xecd   :  { %v1237_v49 = vpop.permute.xlu1 %1236 }
 0xece   :  { %v1239_v57 = vmul.f32 %v2982_v5, %v1237_v49 }
 0xed0   :  { %1241 = vrot.lane.b32.xlu0 %v1239_v57, %s3149_s21 }
 0xf42   :  { %v1242_v55 = vpop.permute.xlu0 %1241 }
 0xf43   :  { %v1244_v61 = vadd.f32 %v1242_v55, %v1234_v60 }
 0xf45   :  { %2983 = vtanh.f32 %v1244_v61  ;;  %v1318_v30 = vrot.slane %v1244_v61, 6 }
 0xf46   :  { %2985 = vpow2.f32 %v2697_v63 }
 0xf4f   :  { %v2984_v62 = vpop.eup %2983 }
 0xf50   :  { %1247 = vrot.lane.b32.xlu1 %v2984_v62, %s3149_s21  ;;  %v2986_v53 = vpop.eup %2985 }
 0xf51   :  { %v1225_v0 = vadd.f32 1.0, %v2986_v53 }
 0xf53   :  { %2987 = vrcp.f32 %v1225_v0 }
 0xf5d   :  { %v2988_v1 = vpop.eup %2987 }
 0xfc2   :  { %v1248_v3 = vpop.permute.xlu1 %1247 }
 0xfc3   :  { %v1250_v4 = vmul.f32 %v2988_v1, %v1248_v3 }
 0xfc5   :  { %1252 = vst.msk [vmem:[#allocation2] sm:$0xc0] %vm1251_vm12, %v1250_v4  ;;  %v1255_v6 = vpack.c.bf16 %v1250_v4, %v1250_v4 }
 0xfc6   :  { %1254 = vst.msk [vmem:[#allocation2 + $0x2] sm:$0xc0] %vm1253_vm13, %v1250_v4 }
 0xfc7   :  { %v1257_v8 = vrot.slane %v1255_v6, 3 }
 0xfc9   :  { %2698 = vmatmul.mubr.msk.bf16.vlgmr.msra.gmra.mrb[20].mxu0 %vm900_vm7, %v1257_v8 }
 0xfca   :  { %1434 = vmatpush1.bf16.msra.mxu0 %v3426_v7  ;;  %1465 = vmatprep.mubr.bf16.mxu0 %v3148_v2 }
 0xfcb   :  { %1435 = vmatprep.subr.bf16.mxu0 %v3439_v10 }
 0xfce   :  { %1436 = vmatpush1.bf16.msra.mxu0 %v3445_v11 }
 0xfcf   :  { %1437 = vmatprep.subr.bf16.mxu0 %v3451_v12 }
 0xfd2   :  { %1438 = vmatpush1.bf16.msra.mxu0 %v3456_v13 }
 0xfd3   :  { %1439 = vmatprep.subr.bf16.mxu0 %v3463_v14 }
 0xfd6   :  { %1440 = vmatpush1.bf16.msra.mxu0 %v3468_v15 }
0x109c   :  { %v1295_v9 = vpop.f32.mrb[20].mxu0 }
0x109d   :  { %v1297_v16 = vpop.f32.mrb[21].mxu0  ;;  %v1302_v22 = vadd.f32 %v1295_v9, %v3541_v56 }
0x109e   :  { %v1303_v17 = vadd.f32 %v1297_v16, %v3544_v59  ;;  %v1299_v19 = vpop.f32.mrb[22].mxu0 }
0x109f   :  { %v1300_v20 = vpop.f32.mrb[23].mxu0  ;;  %v2699_v23 = vmul.f32 -1.442695, %v1302_v22 }
0x10a0   :  { %2989 = vtanh.f32 %v1303_v17  ;;  %v2700_v36 = vmul.f32 -1.442695, %v1303_v17 }
0x10a1   :  { %2991 = vpow2.f32 %v2699_v23 }
0x10aa   :  { %v2990_v21 = vpop.eup %2989 }
0x10ab   :  { %1322 = vrot.lane.b32.xlu0 %v2990_v21, %s3149_s21  ;;  %v2992_v24 = vpop.eup %2991 }
0x10ac   :  { %v1310_v26 = vadd.f32 1.0, %v2992_v24 }
0x10ae   :  { %2993 = vrcp.f32 %v1310_v26 }
0x10b8   :  { %v2994_v27 = vpop.eup %2993 }
0x10b9   :  { %v1320_v32 = vmul.f32 %v2994_v27, %v1318_v30 }
0x111d   :  { %v1323_v28 = vpop.permute.xlu0 %1322 }
0x111e   :  { %v1325_v29 = vmul.f32 %v2994_v27, %v1323_v28 }
0x1120   :  { %1327 = vrot.lane.b32.xlu1 %v1325_v29, %s3149_s21 }
0x1192   :  { %v1328_v33 = vpop.permute.xlu1 %1327 }
0x1193   :  { %v1330_v34 = vadd.f32 %v1328_v33, %v1320_v32 }
0x1195   :  { %2995 = vtanh.f32 %v1330_v34  ;;  %v1406_v49 = vrot.slane %v1330_v34, 6 }
0x1196   :  { %2997 = vpow2.f32 %v2700_v36 }
0x119f   :  { %v2996_v35 = vpop.eup %2995 }
0x11a0   :  { %1333 = vrot.lane.b32.xlu0 %v2996_v35, %s3149_s21  ;;  %v2998_v37 = vpop.eup %2997 }
0x11a1   :  { %v1311_v38 = vadd.f32 1.0, %v2998_v37 }
0x11a3   :  { %2999 = vrcp.f32 %v1311_v38 }
0x11ad   :  { %v3000_v39 = vpop.eup %2999 }
0x1212   :  { %v1334_v40 = vpop.permute.xlu0 %1333 }
0x1213   :  { %v1336_v41 = vmul.f32 %v3000_v39, %v1334_v40 }
0x1215   :  { %1337 = vst.msk [vmem:[#allocation2 + $0x8] sm:$0x3] %vm977_vm5, %v1336_v41  ;;  %v1339_v42 = vpack.c.bf16 %v1336_v41, %v1336_v41 }
0x1216   :  { %1338 = vst.msk [vmem:[#allocation2 + $0x6] sm:$0x3] %vm979_vm6, %v1336_v41 }
0x1217   :  { %2701 = vmatmul.mubr.msk.bf16.vlgmr.msra.gmra.mrb[20].mxu1 %vm900_vm7, %v1339_v42 }
0x1218   :  { %1524 = vmatpush1.bf16.msra.mxu1 %v3426_v7  ;;  %1555 = vmatprep.mubr.bf16.mxu1 %v3148_v2 }
0x1219   :  { %1525 = vmatprep.subr.bf16.mxu1 %v3439_v10 }
0x121c   :  { %1526 = vmatpush1.bf16.msra.mxu1 %v3445_v11 }
0x121d   :  { %1527 = vmatprep.subr.bf16.mxu1 %v3451_v12 }
0x1220   :  { %1528 = vmatpush1.bf16.msra.mxu1 %v3456_v13 }
0x1221   :  { %1529 = vmatprep.subr.bf16.mxu1 %v3463_v14 }
0x1224   :  { %1530 = vmatpush1.bf16.msra.mxu1 %v3468_v15 }
0x12ea   :  { %v1377_v43 = vpop.f32.mrb[20].mxu1 }
0x12eb   :  { %v1379_v44 = vpop.f32.mrb[21].mxu1  ;;  %v1386_v10 = vrot.slane %v1377_v43, 6 }
0x12ec   :  { %v1387_v47 = vrot.slane %v1379_v44, 6  ;;  %v1381_v50 = vpop.f32.mrb[22].mxu1 }
0x12ed   :  { %v1382_v51 = vpop.f32.mrb[23].mxu1  ;;  %v1390_v11 = vadd.f32 %v1386_v10, %v3541_v56 }
0x12ee   :  { %v1391_v7 = vadd.f32 %v1387_v47, %v3544_v59 }
0x12ef   :  { %v2702_v12 = vmul.f32 -1.442695, %v1390_v11 }
0x12f0   :  { %3001 = vtanh.f32 %v1391_v7  ;;  %v2703_v61 = vmul.f32 -1.442695, %v1391_v7 }
0x12f1   :  { %3003 = vpow2.f32 %v2702_v12 }
0x12fa   :  { %v3002_v52 = vpop.eup %3001 }
0x12fb   :  { %1410 = vrot.lane.b32.xlu1 %v3002_v52, %s3149_s21  ;;  %v3004_v13 = vpop.eup %3003 }
0x12fc   :  { %v1398_v14 = vadd.f32 1.0, %v3004_v13 }
0x12fe   :  { %3005 = vrcp.f32 %v1398_v14 }
0x1308   :  { %v3006_v15 = vpop.eup %3005 }
0x1309   :  { %v1408_v57 = vmul.f32 %v3006_v15, %v1406_v49 }
0x136d   :  { %v1411_v54 = vpop.permute.xlu1 %1410 }
0x136e   :  { %v1413_v5 = vmul.f32 %v3006_v15, %v1411_v54 }
0x1370   :  { %1415 = vrot.lane.b32.xlu0 %v1413_v5, %s3149_s21 }
0x13e2   :  { %v1416_v58 = vpop.permute.xlu0 %1415 }
0x13e3   :  { %v1418_v60 = vadd.f32 %v1416_v58, %v1408_v57  ;;  %v2891_v58 = vld [vmem:[%s3952_s15 + $0x4] ss:$8 sps:$4 sm:$0xff]  }
0x13e4   :  { %1686 = vmatprep.subr.bf16.mxu0 %v2891_v58 }
0x13e5   :  { %3007 = vtanh.f32 %v1418_v60  ;;  %v1496_v30 = vrot.slane %v1418_v60, 6 }
0x13e6   :  { %3009 = vpow2.f32 %v2703_v61  ;;  %v2892_v61 = vld [vmem:[%s3952_s15 + $0x10] ss:$8 sps:$4 sm:$0xff]  }
0x13ef   :  { %v3008_v55 = vpop.eup %3007 }
0x13f0   :  { %1421 = vrot.lane.b32.xlu1 %v3008_v55, %s3149_s21  ;;  %v3010_v62 = vpop.eup %3009 }
0x13f1   :  { %v1399_v63 = vadd.f32 1.0, %v3010_v62  ;;  %v2894_v62 = vld [vmem:[%s3952_s15 + $0x14] ss:$8 sps:$4 sm:$0xff]  }
0x13f3   :  { %3011 = vrcp.f32 %v1399_v63  ;;  %v2897_v63 = vld [vmem:[%s3952_s15 + $0x24] ss:$8 sps:$4 sm:$0xff]  }
0x13fd   :  { %v3012_v53 = vpop.eup %3011 }
0x1462   :  { %v1422_v0 = vpop.permute.xlu1 %1421 }
0x1463   :  { %v1424_v1 = vmul.f32 %v3012_v53, %v1422_v0  ;;  %v3671_v53 = vld [vmem:[%s3953_s16 + $0x4] ss:$8 sps:$4 sm:$0xff]   ;;  %v2895_v0 = vld [vmem:[%s3952_s15 + $0x20] ss:$8 sps:$4 sm:$0xff]  }
0x1464   :  { %1879 = vmatprep.subr.bf16.mxu1 %v3671_v53 }
0x1465   :  { %1425 = vst.msk [vmem:[#allocation2 + $0x8] sm:$0xc] %vm1067_vm8, %v1424_v1  ;;  %v1427_v3 = vpack.c.bf16 %v1424_v1, %v1424_v1 }
0x1466   :  { %1426 = vst.msk [vmem:[#allocation2 + $0x2] sm:$0xc] %vm1069_vm9, %v1424_v1  ;;  %v3679_v1 = vld [vmem:[%s3953_s16] ss:$8 sps:$4 sm:$0xff]  }
0x1467   :  { %v1429_v4 = vrot.slane %v1427_v3, 1  ;;  %v2900_v3 = vld [vmem:[%s3952_s15 + $0x34] ss:$8 sps:$4 sm:$0xff]  }
0x1469   :  { %2704 = vmatmul.mubr.msk.bf16.vlgmr.msra.gmra.mrb[24].mxu0 %vm900_vm7, %v1429_v4  ;;  %v2898_v4 = vld [vmem:[%s3952_s15 + $0x30] ss:$8 sps:$4 sm:$0xff]  }
0x146a   :  { %1718 = vmatprep.mubr.bf16.mxu0 %v3148_v2 }
0x153c   :  { %v1467_v6 = vpop.f32.mrb[24].mxu0 }
0x153d   :  { %v1469_v8 = vpop.f32.mrb[25].mxu0  ;;  %v1476_v21 = vrot.slane %v1467_v6, 4  ;;  %v2905_v6 = vld [vmem:[%s3951_s14 + $0x4] ss:$8 sps:$4 sm:$0xff]  }
0x153e   :  { %v1477_v9 = vrot.slane %v1469_v8, 4  ;;  %v1471_v16 = vpop.f32.mrb[26].mxu0 }
0x153f   :  { %v1472_v17 = vpop.f32.mrb[27].mxu0  ;;  %v1480_v22 = vadd.f32 %v1476_v21, %v3541_v56  ;;  %v3701_v16 = vld [vmem:[%s3953_s16 + $0x10] ss:$8 sps:$4 sm:$0xff]  }
0x1540   :  { %v1481_v19 = vadd.f32 %v1477_v9, %v3544_v59  ;;  %v3696_v9 = vld [vmem:[%s3953_s16 + $0x14] ss:$8 sps:$4 sm:$0xff]   ;;  %v3708_v17 = vld [vmem:[%s3953_s16 + $0x24] ss:$8 sps:$4 sm:$0xff]   ;;  %v3725_v21 = vld [vmem:[%s3953_s16 + $0x30] ss:$8 sps:$4 sm:$0xff]  }
0x1541   :  { %v2705_v23 = vmul.f32 -1.442695, %v1480_v22 }
0x1542   :  { %3013 = vtanh.f32 %v1481_v19  ;;  %v2706_v36 = vmul.f32 -1.442695, %v1481_v19  ;;  %v3713_v19 = vld [vmem:[%s3953_s16 + $0x20] ss:$8 sps:$4 sm:$0xff]  }
0x1543   :  { %3015 = vpow2.f32 %v2705_v23 }
0x154c   :  { %v3014_v20 = vpop.eup %3013 }
0x154d   :  { %1500 = vrot.lane.b32.xlu0 %v3014_v20, %s3149_s21  ;;  %v3016_v24 = vpop.eup %3015  ;;  %v3720_v20 = vld [vmem:[%s3953_s16 + $0x34] ss:$8 sps:$4 sm:$0xff]  }
0x154e   :  { %v1488_v26 = vadd.f32 1.0, %v3016_v24 }
0x1550   :  { %3017 = vrcp.f32 %v1488_v26 }
0x155a   :  { %v3018_v27 = vpop.eup %3017 }
0x155b   :  { %v1498_v32 = vmul.f32 %v3018_v27, %v1496_v30 }
0x15bf   :  { %v1501_v28 = vpop.permute.xlu0 %1500 }
0x15c0   :  { %v1503_v29 = vmul.f32 %v3018_v27, %v1501_v28 }
0x15c2   :  { %1505 = vrot.lane.b32.xlu1 %v1503_v29, %s3149_s21 }
0x1634   :  { %v1506_v33 = vpop.permute.xlu1 %1505 }
0x1635   :  { %v1508_v34 = vadd.f32 %v1506_v33, %v1498_v32 }
0x1637   :  { %3019 = vtanh.f32 %v1508_v34 }
0x1638   :  { %3021 = vpow2.f32 %v2706_v36 }
0x1641   :  { %v3020_v35 = vpop.eup %3019 }
0x1642   :  { %1511 = vrot.lane.b32.xlu0 %v3020_v35, %s3149_s21  ;;  %v3022_v37 = vpop.eup %3021 }
0x1643   :  { %v1489_v38 = vadd.f32 1.0, %v3022_v37 }
0x1645   :  { %3023 = vrcp.f32 %v1489_v38 }
0x164f   :  { %v3024_v39 = vpop.eup %3023 }
0x16b4   :  { %v1512_v40 = vpop.permute.xlu0 %1511 }
0x16b5   :  { %v1514_v41 = vmul.f32 %v3024_v39, %v1512_v40  ;;  %v2903_v40 = vld [vmem:[%s3951_s14] ss:$8 sps:$4 sm:$0xff]  }
0x16b7   :  { %1515 = vst.msk [vmem:[#allocation2 + $0x8] sm:$0x30] %vm1159_vm10, %v1514_v41  ;;  %v1517_v42 = vpack.c.bf16 %v1514_v41, %v1514_v41 }
0x16b8   :  { %1516 = vst.msk [vmem:[#allocation2 - $0x2] sm:$0x30] %vm1161_vm11, %v1514_v41 }
0x16b9   :  { %v1519_v43 = vrot.slane %v1517_v42, 2 }
0x16bb   :  { %2707 = vmatmul.mubr.msk.bf16.vlgmr.msra.gmra.mrb[24].mxu1 %vm900_vm7, %v1519_v43 }
0x16bc   :  { %1911 = vmatprep.mubr.bf16.mxu1 %v3148_v2  ;;  %1880 = vmatpush1.bf16.msra.mxu1 %v3679_v1 }
0x16bd   :  { %1881 = vmatprep.subr.bf16.mxu1 %v3696_v9 }
0x16c0   :  { %1882 = vmatpush1.bf16.msra.mxu1 %v3701_v16 }
0x16c1   :  { %1883 = vmatprep.subr.bf16.mxu1 %v3708_v17 }
0x16c4   :  { %1884 = vmatpush1.bf16.msra.mxu1 %v3713_v19 }
0x16c5   :  { %1885 = vmatprep.subr.bf16.mxu1 %v3720_v20 }
0x16c8   :  { %1886 = vmatpush1.bf16.msra.mxu1 %v3725_v21 }
0x16c9   :  { %1958 = vmatprep.subr.bf16.mxu1 %v3671_v53 }
0x16cb   :  { %1912 = vmatmul.mubr.bf16.vlgmr.msra.gmra.mrb[28].mxu1 %v3148_v2 }
0x16cc   :  { %1959 = vmatpush1.bf16.msra.mxu1 %v3679_v1  ;;  %1990 = vmatprep.mubr.bf16.mxu1 %v3148_v2 }
0x16cd   :  { %1960 = vmatprep.subr.bf16.mxu1 %v3696_v9 }
0x16d0   :  { %1961 = vmatpush1.bf16.msra.mxu1 %v3701_v16 }
0x16d1   :  { %1962 = vmatprep.subr.bf16.mxu1 %v3708_v17 }
0x16d4   :  { %1963 = vmatpush1.bf16.msra.mxu1 %v3713_v19 }
0x16d5   :  { %1964 = vmatprep.subr.bf16.mxu1 %v3720_v20 }
0x16d8   :  { %1965 = vmatpush1.bf16.msra.mxu1 %v3725_v21 }
0x16d9   :  { %2138 = vmatprep.subr.bf16.mxu1 %v3671_v53 }
0x178e   :  { %v1557_v44 = vpop.f32.mrb[24].mxu1 }
0x178f   :  { %v1559_v47 = vpop.f32.mrb[25].mxu1  ;;  %v1566_v11 = vrot.slane %v1557_v44, 2  ;;  %v2911_v44 = vld [vmem:[%s3951_s14 + $0x14] ss:$8 sps:$4 sm:$0xff]  }
0x1790   :  { %v1567_v50 = vrot.slane %v1559_v47, 2  ;;  %v1561_v51 = vpop.f32.mrb[26].mxu1  ;;  %v2909_v47 = vld [vmem:[%s3951_s14 + $0x10] ss:$8 sps:$4 sm:$0xff]  }
0x1791   :  { %v1562_v7 = vpop.f32.mrb[27].mxu1  ;;  %v1570_v12 = vadd.f32 %v1566_v11, %v3541_v56  ;;  %v2889_v56 = vld [vmem:[%s3952_s15] ss:$8 sps:$4 sm:$0xff]  }
0x1792   :  { %v3647_v52 = vadd.f32 %v1567_v50, %v3544_v59  ;;  %v1586_v59 = vrot.slane %v1508_v34, 6  ;;  %1687 = vmatpush1.bf16.msra.mxu0 %v2889_v56  ;;  %v2917_v50 = vld [vmem:[%s3951_s14 + $0x24] ss:$8 sps:$4 sm:$0xff]   ;;  %v2915_v51 = vld [vmem:[%s3951_s14 + $0x20] ss:$8 sps:$4 sm:$0xff]  }
0x1793   :  { %v2708_v13 = vmul.f32 -1.442695, %v1570_v12  ;;  %1688 = vmatprep.subr.bf16.mxu0 %v2894_v62  ;;  %v2923_v7 = vld [vmem:[%s3951_s14 + $0x34] ss:$8 sps:$4 sm:$0xff]  }
0x1794   :  { %3025 = vtanh.f32 %v3647_v52  ;;  %v2709_v22 = vmul.f32 -1.442695, %v3647_v52  ;;  %v2921_v52 = vld [vmem:[%s3951_s14 + $0x30] ss:$8 sps:$4 sm:$0xff]  }
0x1795   :  { %3027 = vpow2.f32 %v2708_v13 }
0x1796   :  { %1689 = vmatpush1.bf16.msra.mxu0 %v2892_v61 }
0x1797   :  { %1690 = vmatprep.subr.bf16.mxu0 %v2897_v63 }
0x179a   :  { %1691 = vmatpush1.bf16.msra.mxu0 %v2895_v0 }
0x179b   :  { %1692 = vmatprep.subr.bf16.mxu0 %v2900_v3 }
0x179e   :  { %v3026_v10 = vpop.eup %3025  ;;  %1693 = vmatpush1.bf16.msra.mxu0 %v2898_v4  ;;  %v1913_v11 = vpop.f32.mrb[28].mxu1 }
0x179f   :  { %1590 = vrot.lane.b32.xlu1 %v3026_v10, %s3149_s21  ;;  %v3028_v14 = vpop.eup %3027  ;;  %1772 = vmatprep.subr.bf16.mxu0 %v2905_v6  ;;  %v1915_v12 = vpop.f32.mrb[29].mxu1 }
0x17a0   :  { %v1578_v15 = vadd.f32 1.0, %v3028_v14  ;;  %v1917_v13 = vpop.f32.mrb[30].mxu1 }
0x17a1   :  { %v1918_v14 = vpop.f32.mrb[31].mxu1 }
0x17a2   :  { %3029 = vrcp.f32 %v1578_v15  ;;  %v1815_v15 = vld [vmem:[%s3954_s17] sm:$0x3]  ;;  %s2759_s17 = sld [smem:[#allocation4 + $0x1]] }
0x17a8   :  { %s2580_s6 = sadd.f32 %s2760_s12, %s2759_s17 }
0x17ac   :  { %v3030_v54 = vpop.eup %3029 }
0x17ad   :  { %v1588_v57 = vmul.f32 %v3030_v54, %v1586_v59 }
0x1811   :  { %v1591_v5 = vpop.permute.xlu1 %1590 }
0x1812   :  { %v1593_v49 = vmul.f32 %v3030_v54, %v1591_v5  ;;  %v1820_v54 = vrot.slane %v1815_v15, %v840_v46  ;;  %v1824_v5 = vrot.slane %v1815_v15, %v844_v48 }
0x1814   :  { %1595 = vrot.lane.b32.xlu0 %v1593_v49, %s3149_s21 }
0x1886   :  { %v1596_v60 = vpop.permute.xlu0 %1595 }
0x1887   :  { %v1598_v55 = vadd.f32 %v1596_v60, %v1588_v57 }
0x1889   :  { %3031 = vtanh.f32 %v1598_v55 }
0x188a   :  { %3033 = vpow2.f32 %v2709_v22 }
0x1893   :  { %v3032_v8 = vpop.eup %3031 }
0x1894   :  { %1601 = vrot.lane.b32.xlu1 %v3032_v8, %s3149_s21  ;;  %v3034_v23 = vpop.eup %3033 }
0x1895   :  { %v1579_v24 = vadd.f32 1.0, %v3034_v23 }
0x1897   :  { %3035 = vrcp.f32 %v1579_v24 }
0x18a1   :  { %v3036_v26 = vpop.eup %3035 }
0x1906   :  { %v1602_v27 = vpop.permute.xlu1 %1601 }
0x1907   :  { %v1604_v28 = vmul.f32 %v3036_v26, %v1602_v27 }
0x1909   :  { %1605 = vst.msk [vmem:[#allocation2 + $0x8] sm:$0xc0] %vm1251_vm12, %v1604_v28 }
0x190a   :  { %1606 = vst.msk [vmem:[#allocation2 - $0x6] sm:$0xc0] %vm1253_vm13, %v1604_v28 }
0x1910   :  { %v3745_v30 = vld [vmem:[#allocation2 + $0x8] sm:$0xff] }
0x1911   :  { %v3743_v29 = vld [vmem:[#allocation2] sm:$0xff]  ;;  %v1611_v32 = vrot.slane %v3745_v30, 6  ;;  %v1613_v33 = vrot.slane %v3745_v30, 2 }
0x1912   :  { %v1616_v34 = vrot.slane %v3743_v29, 6  ;;  %v1618_v35 = vrot.slane %v3743_v29, 2  ;;  %v1609_v10 = vpack.c.bf16 %v3745_v30, %v3743_v29 }
0x1913   :  { %v1620_v36 = vsel %vm686_vm2, %v1611_v32, %v1613_v33 }
0x1914   :  { %v1623_v37 = vsel %vm686_vm2, %v1616_v34, %v1618_v35  ;;  %v1621_v38 = vsel %vm688_vm3, %v1620_v36, %v1611_v32 }
0x1915   :  { %v1624_v39 = vsel %vm688_vm3, %v1623_v37, %v1616_v34  ;;  %v1622_v41 = vsel %vm690_vm4, %v1621_v38, %v1613_v33 }
0x1916   :  { %v1625_v42 = vsel %vm690_vm4, %v1624_v39, %v1618_v35 }
0x1917   :  { %v1626_v43 = vpack.c.bf16 %v1625_v42, %v1622_v41 }
0x1919   :  { %2718 = vmatmul.mubr.msk.bf16.vlgmr.msra.gmra.mrb[28].mxu0 %vm900_vm7, %v1626_v43 }
0x191a   :  { %1773 = vmatpush1.bf16.msra.mxu0 %v2903_v40  ;;  %1804 = vmatprep.mubr.bf16.mxu0 %v3148_v2 }
0x191b   :  { %1774 = vmatprep.subr.bf16.mxu0 %v2911_v44 }
0x191e   :  { %1775 = vmatpush1.bf16.msra.mxu0 %v2909_v47 }
0x191f   :  { %1776 = vmatprep.subr.bf16.mxu0 %v2917_v50 }
0x1922   :  { %1777 = vmatpush1.bf16.msra.mxu0 %v2915_v51 }
0x1923   :  { %1778 = vmatprep.subr.bf16.mxu0 %v2923_v7 }
0x1926   :  { %1779 = vmatpush1.bf16.msra.mxu0 %v2921_v52 }
0x1927   :  { %2048 = vmatprep.subr.bf16.mxu0 %v3671_v53 }
0x1929   :  { %2727 = vmatmul.mubr.msk.bf16.vlgmr.msra.gmra.mrb[28].mxu0 %vm900_vm7, %v1609_v10 }
0x192a   :  { %2049 = vmatpush1.bf16.msra.mxu0 %v3679_v1  ;;  %2080 = vmatprep.mubr.bf16.mxu0 %v3148_v2 }
0x192b   :  { %2050 = vmatprep.subr.bf16.mxu0 %v3696_v9 }
0x192e   :  { %2051 = vmatpush1.bf16.msra.mxu0 %v3701_v16 }
0x192f   :  { %2052 = vmatprep.subr.bf16.mxu0 %v3708_v17 }
0x1932   :  { %2053 = vmatpush1.bf16.msra.mxu0 %v3713_v19 }
0x1933   :  { %2054 = vmatprep.subr.bf16.mxu0 %v3720_v20 }
0x1936   :  { %2055 = vmatpush1.bf16.msra.mxu0 %v3725_v21 }
0x1937   :  { %2228 = vmatprep.subr.bf16.mxu0 %v3671_v53 }
0x19fc   :  { %v1806_v49 = vpop.f32.mrb[28].mxu0 }
0x19fd   :  { %v3800_v59 = vadd.f32 %v1820_v54, %v1806_v49  ;;  %v1808_v57 = vpop.f32.mrb[29].mxu0 }
0x19fe   :  { %v3802_v58 = vadd.f32 %v1824_v5, %v1808_v57  ;;  %v1810_v60 = vpop.f32.mrb[30].mxu0 }
0x19ff   :  { %v3804_v56 = vadd.f32 %v1820_v54, %v1810_v60  ;;  %v1812_v55 = vpop.f32.mrb[31].mxu0  ;;  %v1920_v45 = vadd.f32 %v1913_v11, %v3800_v59 }
0x1a00   :  { %v1921_v61 = vadd.f32 %v1915_v12, %v3802_v58  ;;  %v3807_v62 = vadd.f32 %v1824_v5, %v1812_v55 }
0x1a01   :  { %v2736_v46 = vmul.f32 -1.442695, %v1920_v45 }
0x1a02   :  { %3037 = vtanh.f32 %v1921_v61  ;;  %v2737_v26 = vmul.f32 -1.442695, %v1921_v61 }
0x1a03   :  { %3039 = vpow2.f32 %v2736_v46 }
0x1a0c   :  { %v3038_v63 = vpop.eup %3037 }
0x1a0d   :  { %1937 = vrot.lane.b32.xlu0 %v3038_v63, %s3149_s21  ;;  %v3040_v48 = vpop.eup %3039 }
0x1a0e   :  { %v1928_v0 = vadd.f32 1.0, %v3040_v48 }
0x1a10   :  { %3041 = vrcp.f32 %v1928_v0 }
0x1a1a   :  { %v3042_v3 = vpop.eup %3041 }
0x1a1b   :  { %v1935_v8 = vmul.f32 0.0, %v3042_v3 }
0x1a7f   :  { %v1938_v4 = vpop.permute.xlu0 %1937 }
0x1a80   :  { %v1940_v6 = vmul.f32 %v3042_v3, %v1938_v4 }
0x1a82   :  { %1942 = vrot.lane.b32.xlu1 %v1940_v6, %s3149_s21 }
0x1af4   :  { %v1943_v22 = vpop.permute.xlu1 %1942 }
0x1af5   :  { %v1945_v23 = vadd.f32 %v1943_v22, %v1935_v8 }
0x1af7   :  { %3043 = vtanh.f32 %v1945_v23  ;;  %v2021_v11 = vrot.slane %v1945_v23, 6 }
0x1af8   :  { %3045 = vpow2.f32 %v2737_v26 }
0x1b01   :  { %v3044_v24 = vpop.eup %3043 }
0x1b02   :  { %1948 = vrot.lane.b32.xlu0 %v3044_v24, %s3149_s21  ;;  %v3046_v27 = vpop.eup %3045 }
0x1b03   :  { %v1929_v28 = vadd.f32 1.0, %v3046_v27 }
0x1b05   :  { %3047 = vrcp.f32 %v1929_v28 }
0x1b0f   :  { %v3048_v32 = vpop.eup %3047 }
0x1b74   :  { %v1949_v33 = vpop.permute.xlu0 %1948 }
0x1b75   :  { %v1951_v34 = vmul.f32 %v3048_v32, %v1949_v33 }
0x1b77   :  { %1952 = vst.msk [vmem:[#allocation3] sm:$0x3] %vm977_vm5, %v1951_v34  ;;  %v1954_v35 = vpack.c.bf16 %v1951_v34, %v1951_v34 }
0x1b78   :  { %1953 = vst.msk [vmem:[#allocation3 + $0xe] sm:$0x3] %vm979_vm6, %v1951_v34 }
0x1b79   :  { %2738 = vmatmul.mubr.msk.bf16.vlgmr.msra.gmra.mrb[32].mxu1 %vm900_vm7, %v1954_v35 }
0x1b7a   :  { %2139 = vmatpush1.bf16.msra.mxu1 %v3679_v1  ;;  %2170 = vmatprep.mubr.bf16.mxu1 %v3148_v2 }
0x1b7b   :  { %2140 = vmatprep.subr.bf16.mxu1 %v3696_v9 }
0x1b7e   :  { %2141 = vmatpush1.bf16.msra.mxu1 %v3701_v16 }
0x1b7f   :  { %2142 = vmatprep.subr.bf16.mxu1 %v3708_v17 }
0x1b82   :  { %2143 = vmatpush1.bf16.msra.mxu1 %v3713_v19 }
0x1b83   :  { %2144 = vmatprep.subr.bf16.mxu1 %v3720_v20 }
0x1b86   :  { %2145 = vmatpush1.bf16.msra.mxu1 %v3725_v21 }
0x1b87   :  { %2310 = vmatprep.subr.bf16.mxu1 %v3671_v53 }
0x1c4c   :  { %v1992_v36 = vpop.f32.mrb[32].mxu1 }
0x1c4d   :  { %v1994_v37 = vpop.f32.mrb[33].mxu1  ;;  %v2001_v43 = vrot.slane %v1992_v36, 6 }
0x1c4e   :  { %v2002_v38 = vrot.slane %v1994_v37, 6  ;;  %v1996_v39 = vpop.f32.mrb[34].mxu1 }
0x1c4f   :  { %v1997_v40 = vpop.f32.mrb[35].mxu1  ;;  %v2005_v44 = vadd.f32 %v2001_v43, %v3800_v59 }
0x1c50   :  { %v2006_v41 = vadd.f32 %v2002_v38, %v3802_v58 }
0x1c51   :  { %v2739_v47 = vmul.f32 -1.442695, %v2005_v44 }
0x1c52   :  { %3049 = vtanh.f32 %v2006_v41  ;;  %v2740_v54 = vmul.f32 -1.442695, %v2006_v41 }
0x1c53   :  { %3051 = vpow2.f32 %v2739_v47 }
0x1c5c   :  { %v3050_v42 = vpop.eup %3049 }
0x1c5d   :  { %2025 = vrot.lane.b32.xlu1 %v3050_v42, %s3149_s21  ;;  %v3052_v50 = vpop.eup %3051 }
0x1c5e   :  { %v2013_v51 = vadd.f32 1.0, %v3052_v50 }
0x1c60   :  { %3053 = vrcp.f32 %v2013_v51 }
0x1c6a   :  { %v3054_v7 = vpop.eup %3053 }
0x1c6b   :  { %v2023_v12 = vmul.f32 %v3054_v7, %v2021_v11 }
0x1ccf   :  { %v2026_v52 = vpop.permute.xlu1 %2025 }
0x1cd0   :  { %v2028_v10 = vmul.f32 %v3054_v7, %v2026_v52 }
0x1cd2   :  { %2030 = vrot.lane.b32.xlu0 %v2028_v10, %s3149_s21 }
0x1d44   :  { %v2031_v13 = vpop.permute.xlu0 %2030 }
0x1d45   :  { %v2033_v14 = vadd.f32 %v2031_v13, %v2023_v12 }
0x1d47   :  { %3055 = vtanh.f32 %v2033_v14  ;;  %v2111_v33 = vrot.slane %v2033_v14, 6 }
0x1d48   :  { %3057 = vpow2.f32 %v2740_v54 }
0x1d51   :  { %v3056_v15 = vpop.eup %3055 }
0x1d52   :  { %2036 = vrot.lane.b32.xlu1 %v3056_v15, %s3149_s21  ;;  %v3058_v5 = vpop.eup %3057 }
0x1d53   :  { %v2014_v49 = vadd.f32 1.0, %v3058_v5 }
0x1d55   :  { %3059 = vrcp.f32 %v2014_v49 }
0x1d5f   :  { %v3060_v57 = vpop.eup %3059 }
0x1dc4   :  { %v2037_v60 = vpop.permute.xlu1 %2036 }
0x1dc5   :  { %v2039_v55 = vmul.f32 %v3060_v57, %v2037_v60 }
0x1dc7   :  { %2040 = vst.msk [vmem:[#allocation3] sm:$0xc] %vm1067_vm8, %v2039_v55  ;;  %v2042_v61 = vpack.c.bf16 %v2039_v55, %v2039_v55 }
0x1dc8   :  { %2041 = vst.msk [vmem:[#allocation3 + $0xa] sm:$0xc] %vm1069_vm9, %v2039_v55 }
0x1dc9   :  { %v2044_v63 = vrot.slane %v2042_v61, 1 }
0x1dcb   :  { %2741 = vmatmul.mubr.msk.bf16.vlgmr.msra.gmra.mrb[32].mxu0 %vm900_vm7, %v2044_v63 }
0x1dcc   :  { %2229 = vmatpush1.bf16.msra.mxu0 %v3679_v1  ;;  %2260 = vmatprep.mubr.bf16.mxu0 %v3148_v2 }
0x1dcd   :  { %2230 = vmatprep.subr.bf16.mxu0 %v3696_v9 }
0x1dd0   :  { %2231 = vmatpush1.bf16.msra.mxu0 %v3701_v16 }
0x1dd1   :  { %2232 = vmatprep.subr.bf16.mxu0 %v3708_v17 }
0x1dd4   :  { %2233 = vmatpush1.bf16.msra.mxu0 %v3713_v19 }
0x1dd5   :  { %2234 = vmatprep.subr.bf16.mxu0 %v3720_v20 }
0x1dd8   :  { %2235 = vmatpush1.bf16.msra.mxu0 %v3725_v21 }
0x1dd9   :  { %2400 = vmatprep.subr.bf16.mxu0 %v3671_v53 }
0x1e9e   :  { %v2082_v45 = vpop.f32.mrb[32].mxu0 }
0x1e9f   :  { %v2084_v46 = vpop.f32.mrb[33].mxu0  ;;  %v2091_v8 = vrot.slane %v2082_v45, 4 }
0x1ea0   :  { %v2092_v48 = vrot.slane %v2084_v46, 4  ;;  %v2086_v0 = vpop.f32.mrb[34].mxu0 }
0x1ea1   :  { %v2087_v3 = vpop.f32.mrb[35].mxu0  ;;  %v2095_v22 = vadd.f32 %v2091_v8, %v3800_v59 }
0x1ea2   :  { %v2096_v4 = vadd.f32 %v2092_v48, %v3802_v58 }
0x1ea3   :  { %v2742_v23 = vmul.f32 -1.442695, %v2095_v22 }
0x1ea4   :  { %3061 = vtanh.f32 %v2096_v4  ;;  %v2743_v38 = vmul.f32 -1.442695, %v2096_v4 }
0x1ea5   :  { %3063 = vpow2.f32 %v2742_v23 }
0x1eae   :  { %v3062_v6 = vpop.eup %3061 }
0x1eaf   :  { %2115 = vrot.lane.b32.xlu0 %v3062_v6, %s3149_s21  ;;  %v3064_v24 = vpop.eup %3063 }
0x1eb0   :  { %v2103_v26 = vadd.f32 1.0, %v3064_v24 }
0x1eb2   :  { %3065 = vrcp.f32 %v2103_v26 }
0x1ebc   :  { %v3066_v27 = vpop.eup %3065 }
0x1ebd   :  { %v2113_v34 = vmul.f32 %v3066_v27, %v2111_v33 }
0x1f21   :  { %v2116_v28 = vpop.permute.xlu0 %2115 }
0x1f22   :  { %v2118_v32 = vmul.f32 %v3066_v27, %v2116_v28 }
0x1f24   :  { %2120 = vrot.lane.b32.xlu1 %v2118_v32, %s3149_s21 }
0x1f96   :  { %v2121_v35 = vpop.permute.xlu1 %2120 }
0x1f97   :  { %v2123_v36 = vadd.f32 %v2121_v35, %v2113_v34 }
0x1f99   :  { %3067 = vtanh.f32 %v2123_v36  ;;  %v2201_v60 = vrot.slane %v2123_v36, 6 }
0x1f9a   :  { %3069 = vpow2.f32 %v2743_v38 }
0x1fa3   :  { %v3068_v37 = vpop.eup %3067 }
0x1fa4   :  { %2126 = vrot.lane.b32.xlu0 %v3068_v37, %s3149_s21  ;;  %v3070_v39 = vpop.eup %3069 }
0x1fa5   :  { %v2104_v40 = vadd.f32 1.0, %v3070_v39 }
0x1fa7   :  { %3071 = vrcp.f32 %v2104_v40 }
0x1fb1   :  { %v3072_v41 = vpop.eup %3071 }
0x2016   :  { %v2127_v42 = vpop.permute.xlu0 %2126 }
0x2017   :  { %v2129_v43 = vmul.f32 %v3072_v41, %v2127_v42 }
0x2019   :  { %2130 = vst.msk [vmem:[#allocation3] sm:$0x30] %vm1159_vm10, %v2129_v43  ;;  %v2132_v44 = vpack.c.bf16 %v2129_v43, %v2129_v43 }
0x201a   :  { %2131 = vst.msk [vmem:[#allocation3 + $0x6] sm:$0x30] %vm1161_vm11, %v2129_v43 }
0x201b   :  { %v2134_v47 = vrot.slane %v2132_v44, 2 }
0x201d   :  { %2744 = vmatmul.mubr.msk.bf16.vlgmr.msra.gmra.mrb[36].mxu1 %vm900_vm7, %v2134_v47 }
0x201e   :  { %2311 = vmatpush1.bf16.msra.mxu1 %v3679_v1  ;;  %2342 = vmatprep.mubr.bf16.mxu1 %v3148_v2 }
0x201f   :  { %2312 = vmatprep.subr.bf16.mxu1 %v3696_v9 }
0x2022   :  { %2313 = vmatpush1.bf16.msra.mxu1 %v3701_v16 }
0x2023   :  { %2314 = vmatprep.subr.bf16.mxu1 %v3708_v17 }
0x2026   :  { %2315 = vmatpush1.bf16.msra.mxu1 %v3713_v19 }
0x2027   :  { %2316 = vmatprep.subr.bf16.mxu1 %v3720_v20 }
0x202a   :  { %2317 = vmatpush1.bf16.msra.mxu1 %v3725_v21 }
0x202b   :  { %2490 = vmatprep.subr.bf16.mxu1 %v3671_v53 }
0x20f0   :  { %v2172_v50 = vpop.f32.mrb[36].mxu1 }
0x20f1   :  { %v2174_v51 = vpop.f32.mrb[37].mxu1  ;;  %v2181_v13 = vrot.slane %v2172_v50, 2 }
0x20f2   :  { %v2182_v7 = vrot.slane %v2174_v51, 2  ;;  %v2176_v52 = vpop.f32.mrb[38].mxu1 }
0x20f3   :  { %v2177_v10 = vpop.f32.mrb[39].mxu1  ;;  %v2185_v14 = vadd.f32 %v2181_v13, %v3800_v59 }
0x20f4   :  { %v2186_v11 = vadd.f32 %v2182_v7, %v3802_v58 }
0x20f5   :  { %v2745_v15 = vmul.f32 -1.442695, %v2185_v14 }
0x20f6   :  { %3073 = vtanh.f32 %v2186_v11  ;;  %v2746_v45 = vmul.f32 -1.442695, %v2186_v11 }
0x20f7   :  { %3075 = vpow2.f32 %v2745_v15 }
0x2100   :  { %v3074_v12 = vpop.eup %3073 }
0x2101   :  { %2205 = vrot.lane.b32.xlu1 %v3074_v12, %s3149_s21  ;;  %v3076_v54 = vpop.eup %3075 }
0x2102   :  { %v2193_v5 = vadd.f32 1.0, %v3076_v54 }
0x2104   :  { %3077 = vrcp.f32 %v2193_v5 }
0x210e   :  { %v3078_v53 = vpop.eup %3077 }
0x210f   :  { %v2203_v55 = vmul.f32 %v3078_v53, %v2201_v60 }
0x2173   :  { %v2206_v49 = vpop.permute.xlu1 %2205 }
0x2174   :  { %v2208_v57 = vmul.f32 %v3078_v53, %v2206_v49 }
0x2176   :  { %2210 = vrot.lane.b32.xlu0 %v2208_v57, %s3149_s21 }
0x21e8   :  { %v2211_v58 = vpop.permute.xlu0 %2210 }
0x21e9   :  { %v2213_v61 = vadd.f32 %v2211_v58, %v2203_v55 }
0x21eb   :  { %3079 = vtanh.f32 %v2213_v61  ;;  %v2285_v38 = vrot.slane %v2213_v61, 6 }
0x21ec   :  { %3081 = vpow2.f32 %v2746_v45 }
0x21f5   :  { %v3080_v63 = vpop.eup %3079 }
0x21f6   :  { %2216 = vrot.lane.b32.xlu1 %v3080_v63, %s3149_s21  ;;  %v3082_v59 = vpop.eup %3081 }
0x21f7   :  { %v2194_v46 = vadd.f32 1.0, %v3082_v59 }
0x21f9   :  { %3083 = vrcp.f32 %v2194_v46 }
0x2203   :  { %v3084_v48 = vpop.eup %3083 }
0x2268   :  { %v2217_v0 = vpop.permute.xlu1 %2216 }
0x2269   :  { %v2219_v3 = vmul.f32 %v3084_v48, %v2217_v0 }
0x226b   :  { %2220 = vst.msk [vmem:[#allocation3] sm:$0xc0] %vm1251_vm12, %v2219_v3  ;;  %v2222_v4 = vpack.c.bf16 %v2219_v3, %v2219_v3 }
0x226c   :  { %2221 = vst.msk [vmem:[#allocation3 + $0x2] sm:$0xc0] %vm1253_vm13, %v2219_v3 }
0x226d   :  { %v2224_v6 = vrot.slane %v2222_v4, 3 }
0x226f   :  { %2747 = vmatmul.mubr.msk.bf16.vlgmr.msra.gmra.mrb[36].mxu0 %vm900_vm7, %v2224_v6 }
0x2270   :  { %2401 = vmatpush1.bf16.msra.mxu0 %v3679_v1  ;;  %2432 = vmatprep.mubr.bf16.mxu0 %v3148_v2 }
0x2271   :  { %2402 = vmatprep.subr.bf16.mxu0 %v3696_v9 }
0x2274   :  { %2403 = vmatpush1.bf16.msra.mxu0 %v3701_v16 }
0x2275   :  { %2404 = vmatprep.subr.bf16.mxu0 %v3708_v17 }
0x2278   :  { %2405 = vmatpush1.bf16.msra.mxu0 %v3713_v19 }
0x2279   :  { %2406 = vmatprep.subr.bf16.mxu0 %v3720_v20 }
0x227c   :  { %2407 = vmatpush1.bf16.msra.mxu0 %v3725_v21 }
0x2342   :  { %v2262_v8 = vpop.f32.mrb[36].mxu0 }
0x2343   :  { %v2264_v22 = vpop.f32.mrb[37].mxu0  ;;  %v2269_v28 = vadd.f32 %v2262_v8, %v3804_v56 }
0x2344   :  { %v2270_v23 = vadd.f32 %v2264_v22, %v3807_v62  ;;  %v2266_v24 = vpop.f32.mrb[38].mxu0 }
0x2345   :  { %v2267_v26 = vpop.f32.mrb[39].mxu0  ;;  %v2748_v32 = vmul.f32 -1.442695, %v2269_v28 }
0x2346   :  { %3085 = vtanh.f32 %v2270_v23  ;;  %v2749_v43 = vmul.f32 -1.442695, %v2270_v23 }
0x2347   :  { %3087 = vpow2.f32 %v2748_v32 }
0x2350   :  { %v3086_v27 = vpop.eup %3085 }
0x2351   :  { %2289 = vrot.lane.b32.xlu0 %v3086_v27, %s3149_s21  ;;  %v3088_v33 = vpop.eup %3087 }
0x2352   :  { %v2277_v34 = vadd.f32 1.0, %v3088_v33 }
0x2354   :  { %3089 = vrcp.f32 %v2277_v34 }
0x235e   :  { %v3090_v35 = vpop.eup %3089 }
0x235f   :  { %v2287_v39 = vmul.f32 %v3090_v35, %v2285_v38 }
0x23c3   :  { %v2290_v36 = vpop.permute.xlu0 %2289 }
0x23c4   :  { %v2292_v37 = vmul.f32 %v3090_v35, %v2290_v36 }
0x23c6   :  { %2294 = vrot.lane.b32.xlu1 %v2292_v37, %s3149_s21 }
0x2438   :  { %v2295_v40 = vpop.permute.xlu1 %2294 }
0x2439   :  { %v2297_v41 = vadd.f32 %v2295_v40, %v2287_v39 }
0x243b   :  { %3091 = vtanh.f32 %v2297_v41  ;;  %v2373_v5 = vrot.slane %v2297_v41, 6 }
0x243c   :  { %3093 = vpow2.f32 %v2749_v43 }
0x2445   :  { %v3092_v42 = vpop.eup %3091 }
0x2446   :  { %2300 = vrot.lane.b32.xlu0 %v3092_v42, %s3149_s21  ;;  %v3094_v44 = vpop.eup %3093 }
0x2447   :  { %v2278_v47 = vadd.f32 1.0, %v3094_v44 }
0x2449   :  { %3095 = vrcp.f32 %v2278_v47 }
0x2453   :  { %v3096_v50 = vpop.eup %3095 }
0x24b8   :  { %v2301_v51 = vpop.permute.xlu0 %2300 }
0x24b9   :  { %v2303_v7 = vmul.f32 %v3096_v50, %v2301_v51 }
0x24bb   :  { %2304 = vst.msk [vmem:[#allocation3 + $0x8] sm:$0x3] %vm977_vm5, %v2303_v7  ;;  %v2306_v52 = vpack.c.bf16 %v2303_v7, %v2303_v7 }
0x24bc   :  { %2305 = vst.msk [vmem:[#allocation3 + $0x6] sm:$0x3] %vm979_vm6, %v2303_v7 }
0x24bd   :  { %2750 = vmatmul.mubr.msk.bf16.vlgmr.msra.gmra.mrb[40].mxu1 %vm900_vm7, %v2306_v52 }
0x24be   :  { %2491 = vmatpush1.bf16.msra.mxu1 %v3679_v1  ;;  %2522 = vmatprep.mubr.bf16.mxu1 %v3148_v2 }
0x24bf   :  { %2492 = vmatprep.subr.bf16.mxu1 %v3696_v9 }
0x24c2   :  { %2493 = vmatpush1.bf16.msra.mxu1 %v3701_v16 }
0x24c3   :  { %2494 = vmatprep.subr.bf16.mxu1 %v3708_v17 }
0x24c6   :  { %2495 = vmatpush1.bf16.msra.mxu1 %v3713_v19 }
0x24c7   :  { %2496 = vmatprep.subr.bf16.mxu1 %v3720_v20 }
0x24ca   :  { %2497 = vmatpush1.bf16.msra.mxu1 %v3725_v21 }
0x2590   :  { %v2344_v10 = vpop.f32.mrb[40].mxu1 }
0x2591   :  { %v2346_v11 = vpop.f32.mrb[41].mxu1  ;;  %v2353_v9 = vrot.slane %v2344_v10, 6 }
0x2592   :  { %v2354_v12 = vrot.slane %v2346_v11, 6  ;;  %v2348_v13 = vpop.f32.mrb[42].mxu1 }
0x2593   :  { %v2349_v14 = vpop.f32.mrb[43].mxu1  ;;  %v2357_v16 = vadd.f32 %v2353_v9, %v3804_v56 }
0x2594   :  { %v2358_v1 = vadd.f32 %v2354_v12, %v3807_v62 }
0x2595   :  { %v2751_v17 = vmul.f32 -1.442695, %v2357_v16 }
0x2596   :  { %3097 = vtanh.f32 %v2358_v1  ;;  %v2752_v55 = vmul.f32 -1.442695, %v2358_v1 }
0x2597   :  { %3099 = vpow2.f32 %v2751_v17 }
0x25a0   :  { %v3098_v2 = vpop.eup %3097 }
0x25a1   :  { %2377 = vrot.lane.b32.xlu1 %v3098_v2, %s3149_s21  ;;  %v3100_v19 = vpop.eup %3099 }
0x25a2   :  { %v2365_v20 = vadd.f32 1.0, %v3100_v19 }
0x25a4   :  { %3101 = vrcp.f32 %v2365_v20 }
0x25ae   :  { %v3102_v21 = vpop.eup %3101 }
0x25af   :  { %v2375_v53 = vmul.f32 %v3102_v21, %v2373_v5 }
0x2613   :  { %v2378_v15 = vpop.permute.xlu1 %2377 }
0x2614   :  { %v2380_v54 = vmul.f32 %v3102_v21, %v2378_v15 }
0x2616   :  { %2382 = vrot.lane.b32.xlu0 %v2380_v54, %s3149_s21 }
0x2688   :  { %v2383_v49 = vpop.permute.xlu0 %2382 }
0x2689   :  { %v2385_v57 = vadd.f32 %v2383_v49, %v2375_v53 }
0x268b   :  { %3103 = vtanh.f32 %v2385_v57  ;;  %v2463_v36 = vrot.slane %v2385_v57, 6 }
0x268c   :  { %3105 = vpow2.f32 %v2752_v55 }
0x2695   :  { %v3104_v60 = vpop.eup %3103 }
0x2696   :  { %2388 = vrot.lane.b32.xlu1 %v3104_v60, %s3149_s21  ;;  %v3106_v58 = vpop.eup %3105 }
0x2697   :  { %v2366_v61 = vadd.f32 1.0, %v3106_v58 }
0x2699   :  { %3107 = vrcp.f32 %v2366_v61  ;;  %v2581_v61 = vstv %s2580_s6 }
0x26a3   :  { %v3108_v63 = vpop.eup %3107 }
0x2708   :  { %v2389_v45 = vpop.permute.xlu1 %2388 }
0x2709   :  { %v2391_v59 = vmul.f32 %v3108_v63, %v2389_v45  ;;  %v2584_v63 = vstv %s2760_s12 }
0x270b   :  { %2392 = vst.msk [vmem:[#allocation3 + $0x8] sm:$0xc] %vm1067_vm8, %v2391_v59  ;;  %v2394_v46 = vpack.c.bf16 %v2391_v59, %v2391_v59 }
0x270c   :  { %2393 = vst.msk [vmem:[#allocation3 + $0x2] sm:$0xc] %vm1069_vm9, %v2391_v59 }
0x270d   :  { %v2396_v48 = vrot.slane %v2394_v46, 1  ;;  %v2582_v46 = vmul.f32 %v2581_v61, %v3743_v29 }
0x270f   :  { %2753 = vmatmul.mubr.msk.bf16.vlgmr.msra.gmra.mrb[40].mxu0 %vm900_vm7, %v2396_v48  ;;  %v2583_v48 = vmul.f32 %v2581_v61, %v3745_v30 }
0x27e2   :  { %v2434_v0 = vpop.f32.mrb[40].mxu0 }
0x27e3   :  { %v2436_v3 = vpop.f32.mrb[41].mxu0  ;;  %v2443_v24 = vrot.slane %v2434_v0, 4 }
0x27e4   :  { %v2444_v4 = vrot.slane %v2436_v3, 4  ;;  %v2438_v6 = vpop.f32.mrb[42].mxu0 }
0x27e5   :  { %v2439_v8 = vpop.f32.mrb[43].mxu0  ;;  %v2447_v26 = vadd.f32 %v2443_v24, %v3804_v56 }
0x27e6   :  { %v2448_v22 = vadd.f32 %v2444_v4, %v3807_v62 }
0x27e7   :  { %v2754_v27 = vmul.f32 -1.442695, %v2447_v26 }
0x27e8   :  { %3109 = vtanh.f32 %v2448_v22  ;;  %v2755_v41 = vmul.f32 -1.442695, %v2448_v22  ;;  %v2594_v22 = vstv %s2761_s28 }
0x27e9   :  { %3111 = vpow2.f32 %v2754_v27 }
0x27f2   :  { %v3110_v23 = vpop.eup %3109 }
0x27f3   :  { %2467 = vrot.lane.b32.xlu0 %v3110_v23, %s3149_s21  ;;  %v3112_v28 = vpop.eup %3111 }
0x27f4   :  { %v2455_v32 = vadd.f32 1.0, %v3112_v28 }
0x27f6   :  { %3113 = vrcp.f32 %v2455_v32 }
0x2800   :  { %v3114_v33 = vpop.eup %3113 }
0x2801   :  { %v2465_v37 = vmul.f32 %v3114_v33, %v2463_v36 }
0x2865   :  { %v2468_v34 = vpop.permute.xlu0 %2467 }
0x2866   :  { %v2470_v35 = vmul.f32 %v3114_v33, %v2468_v34 }
0x2868   :  { %2472 = vrot.lane.b32.xlu1 %v2470_v35, %s3149_s21 }
0x28da   :  { %v2473_v38 = vpop.permute.xlu1 %2472 }
0x28db   :  { %v2475_v39 = vadd.f32 %v2473_v38, %v2465_v37 }
0x28dd   :  { %3115 = vtanh.f32 %v2475_v39  ;;  %v2553_v54 = vrot.slane %v2475_v39, 6 }
0x28de   :  { %3117 = vpow2.f32 %v2755_v41 }
0x28e7   :  { %v3116_v40 = vpop.eup %3115 }
0x28e8   :  { %2478 = vrot.lane.b32.xlu0 %v3116_v40, %s3149_s21  ;;  %v3118_v42 = vpop.eup %3117 }
0x28e9   :  { %v2456_v43 = vadd.f32 1.0, %v3118_v42 }
0x28eb   :  { %3119 = vrcp.f32 %v2456_v43 }
0x28f5   :  { %v3120_v44 = vpop.eup %3119 }
0x295a   :  { %v2479_v47 = vpop.permute.xlu0 %2478 }
0x295b   :  { %v2481_v50 = vmul.f32 %v3120_v44, %v2479_v47 }
0x295d   :  { %2482 = vst.msk [vmem:[#allocation3 + $0x8] sm:$0x30] %vm1159_vm10, %v2481_v50  ;;  %v2484_v51 = vpack.c.bf16 %v2481_v50, %v2481_v50 }
0x295e   :  { %2483 = vst.msk [vmem:[#allocation3 - $0x2] sm:$0x30] %vm1161_vm11, %v2481_v50 }
0x295f   :  { %v2486_v7 = vrot.slane %v2484_v51, 2 }
0x2961   :  { %2756 = vmatmul.mubr.msk.bf16.vlgmr.msra.gmra.mrb[44].mxu1 %vm900_vm7, %v2486_v7 }
0x2a34   :  { %v2524_v52 = vpop.f32.mrb[44].mxu1 }
0x2a35   :  { %v2526_v10 = vpop.f32.mrb[45].mxu1  ;;  %v2533_v2 = vrot.slane %v2524_v52, 2 }
0x2a36   :  { %v2534_v11 = vrot.slane %v2526_v10, 2  ;;  %v2528_v12 = vpop.f32.mrb[46].mxu1 }
0x2a37   :  { %v2529_v13 = vpop.f32.mrb[47].mxu1  ;;  %v2537_v9 = vadd.f32 %v2533_v2, %v3804_v56 }
0x2a38   :  { %v2538_v14 = vadd.f32 %v2534_v11, %v3807_v62  ;;  %v2590_v62 = vmul.f32 %v2589_v25, %v3488_v18 }
0x2a39   :  { %v2757_v16 = vmul.f32 -1.442695, %v2537_v9 }
0x2a3a   :  { %3121 = vtanh.f32 %v2538_v14  ;;  %v2758_v57 = vmul.f32 -1.442695, %v2538_v14 }
0x2a3b   :  { %3123 = vpow2.f32 %v2757_v16 }
0x2a44   :  { %v3122_v1 = vpop.eup %3121 }
0x2a45   :  { %2557 = vrot.lane.b32.xlu1 %v3122_v1, %s3149_s21  ;;  %v3124_v17 = vpop.eup %3123 }
0x2a46   :  { %v2545_v19 = vadd.f32 1.0, %v3124_v17 }
0x2a48   :  { %3125 = vrcp.f32 %v2545_v19 }
0x2a52   :  { %v3126_v20 = vpop.eup %3125 }
0x2a53   :  { %v2555_v5 = vmul.f32 %v3126_v20, %v2553_v54 }
0x2ab7   :  { %v2558_v21 = vpop.permute.xlu1 %2557 }
0x2ab8   :  { %v2560_v15 = vmul.f32 %v3126_v20, %v2558_v21 }
0x2aba   :  { %2562 = vrot.lane.b32.xlu0 %v2560_v15, %s3149_s21 }
0x2abe   :  { %2601 = vrot.lane.b32.xlu0 %v2590_v62, %s3153_s2 }
0x2b2c   :  { %v2563_v53 = vpop.permute.xlu0 %2562 }
0x2b2d   :  { %v2565_v49 = vadd.f32 %v2563_v53, %v2555_v5 }
0x2b2f   :  { %3127 = vtanh.f32 %v2565_v49 }
0x2b30   :  { %3129 = vpow2.f32 %v2758_v57  ;;  %v2602_v8 = vpop.permute.xlu0 %2601 }
0x2b39   :  { %v3128_v56 = vpop.eup %3127 }
0x2b3a   :  { %2568 = vrot.lane.b32.xlu1 %v3128_v56, %s3149_s21  ;;  %v3130_v60 = vpop.eup %3129 }
0x2b3b   :  { %v2546_v55 = vadd.f32 1.0, %v3130_v60 }
0x2b3d   :  { %3131 = vrcp.f32 %v2546_v55 }
0x2b3e   :  { %2603 = vrot.lane.b32.xlu1 %v3498_v31, %s3153_s2 }
0x2b47   :  { %v3132_v18 = vpop.eup %3131 }
0x2bac   :  { %v2569_v25 = vpop.permute.xlu1 %2568 }
0x2bad   :  { %v2571_v58 = vmul.f32 %v3132_v18, %v2569_v25 }
0x2baf   :  { %2572 = vst.msk [vmem:[#allocation3 + $0x8] sm:$0xc0] %vm1251_vm12, %v2571_v58 }
0x2bb0   :  { %2573 = vst.msk [vmem:[#allocation3 - $0x6] sm:$0xc0] %vm1253_vm13, %v2571_v58  ;;  %v2604_v23 = vpop.permute.xlu1 %2603 }
0x2bb6   :  { %v2575_v59 = vld [vmem:[#allocation3 + $0x8] sm:$0xff] }
0x2bb7   :  { %v2574_v45 = vld [vmem:[#allocation3] sm:$0xff]  ;;  %v2586_v3 = vmul.f32 %v2584_v63, %v2575_v59 }
0x2bb8   :  { %v2585_v0 = vmul.f32 %v2584_v63, %v2574_v45 }
0x2bb9   :  { %v2588_v6 = vadd.f32 %v2586_v3, %v2583_v48 }
0x2bba   :  { %v2587_v4 = vadd.f32 %v2585_v0, %v2582_v46 }
0x2bbb   :  { %v2593_v26 = vadd.f32 %v3498_v31, %v2588_v6  ;;  %v2608_v28 = vadd.f32 %v2604_v23, %v2588_v6 }
0x2bbc   :  { %v2592_v24 = vadd.f32 %v2590_v62, %v2587_v4  ;;  %v2607_v27 = vadd.f32 %v2602_v8, %v2587_v4 }
0x2bbd   :  { %v2596_v33 = vmul.f32 %v2594_v22, %v2593_v26  ;;  %v2610_v35 = vmul.f32 %v2608_v28, %v2594_v22 }
0x2bbe   :  { %v2595_v32 = vmul.f32 %v2594_v22, %v2592_v24  ;;  %v2609_v34 = vmul.f32 %v2607_v27, %v2594_v22 }
0x2bbf   :  { %2598 = vst.msk [vmem:[%s3955_s18 + $0x8] sm:$0xff] %vm420_vm1, %v2596_v33 }
0x2bc0   :  { %2597 = vst.msk [vmem:[%s3955_s18] sm:$0xff] %vm420_vm1, %v2595_v32 }
0x2bc1   :  { %2612 = vst.msk [vmem:[%s3955_s18] sm:$0xff] %vm2611_vm14, %v2609_v34  ;;  %2613 = vst.msk [vmem:[%s3955_s18 + $0x8] sm:$0xff] %vm2611_vm14, %v2610_v35 }
0x2bc2   :  { %2618 = vsyncpa [#allocation5], 1 }

</bundles_post_ra>
